<compile_context>
chip_gen: v7x
topology: tpu7x:2x2x1
jax: 0.10.0
libtpu: 0.0.40
codegen_flags: <defaults>
</compile_context>

<pallas_src>
import functools

import jax
import jax.numpy as jnp
import numpy as np
from jax.experimental import pallas as pl
from jax.experimental.pallas import tpu as pltpu


def _s6_kernel(x_ref, awt_ref, bt_ref, ct_ref, bsel_ref, dvec_ref,
               gamma_ref, beta_ref, o_ref, out_scr, *, d_real, eps):
    cb, cs, batch, dp = x_ref.shape
    rows = cb * batch

    # Natural (chunk, time, batch, d) HBM layout; the time-major relayout is
    # a one-shot VMEM/XLU rearrangement here, not an extra HBM pass outside.
    x4 = x_ref[...].astype(jnp.float32)                       # (cb, cs, B, dp)
    x3 = x4.transpose(1, 0, 2, 3).reshape(cs, rows, dp)       # (cs, rows, dp)

    awt = awt_ref[...]                   # (dp, 2dp) = [A.T | W_sel.T]
    bt = bt_ref[...]                     # (dp, dp)  = B.T
    ct = ct_ref[...]                     # (dp, dp)  = C.T
    mxu_dt = awt.dtype                   # f32 default, bf16 optional
    bsel = bsel_ref[...].astype(jnp.float32)                  # (1, dp)
    dvec = dvec_ref[...].astype(jnp.float32)
    gamma = gamma_ref[...].astype(jnp.float32)
    beta = beta_ref[...].astype(jnp.float32)
    inv_d = np.float32(1.0 / d_real)

    # Hoisted batched matmul: one MXU pass for all (t, row) pairs producing
    # [x@A.T | pre-sigmoid] at once.
    flat = x3.reshape(cs * rows, dp).astype(mxu_dt)
    xa_pre = jnp.dot(flat, awt, preferred_element_type=jnp.float32)
    xa_pre = xa_pre.reshape(cs, rows, 2 * dp)
    xa = xa_pre[..., :dp]
    sel = jax.nn.sigmoid(xa_pre[..., dp:] + bsel)

    # Serial recurrence: only h@B.T is on the critical path.  The independent
    # C projection + skip + per-row LayerNorm for step t are issued right
    # after h_t (fills the MXU bubble, no (cs, rows, dp) h scratch needed).
    # TODO(synk): switch to lax.fori_loop(..., unroll=True) if chunk_size grows.
    h = jnp.zeros((rows, dp), jnp.float32)
    for t in range(cs):
        h = jnp.tanh(xa[t] + jnp.dot(h.astype(mxu_dt), bt,
                                     preferred_element_type=jnp.float32)) * sel[t]
        y = (jnp.dot(h.astype(mxu_dt), ct, preferred_element_type=jnp.float32)
             + x3[t] * dvec)
        # One-pass LayerNorm; padded lanes are exactly zero so sums over dp
        # lanes divided by the real d stay correct, and gamma/beta pads are 0.
        mu = jnp.sum(y, axis=-1, keepdims=True) * inv_d
        var = jnp.sum(y * y, axis=-1, keepdims=True) * inv_d - mu * mu
        out_scr[t] = (y - mu) * jax.lax.rsqrt(var + eps) * gamma + beta

    # Store back in the natural (chunk, time, batch, d) layout: one static
    # slice-store per chunk of this block (cheap VMEM relayout, dense lanes).
    for j in range(cb):
        o_ref[j] = out_scr[:, j * batch:(j + 1) * batch, :].astype(o_ref.dtype)


def _vmem_budget_bytes():
    """Generation-aware VMEM budget (128 MiB on v5e/v6e, 64 MiB on v7x)."""
    try:
        cap = int(pltpu.get_tpu_info().vmem_capacity_bytes)
    except Exception:
        cap = 64 << 20                       # conservative fallback
    return max(int(cap * 0.85), 32 << 20)


def _pick_chunk_block(num_chunks, batch, chunk_size, d_pad, w_bytes, budget):
    """Chunks per grid step: VMEM-aware (real live set), soft vreg cap on the
    recurrence state, and >= 2 grid steps when possible (v7x megacore)."""
    blk_unit = chunk_size * batch * d_pad * 4       # one chunk's f32 tile
    live_factor = 10   # in(x2) + out(x2) + x3 + xa_pre(x2) + sel + scratch + slack
    avail = max(budget - 2 * w_bytes - (4 << 20), blk_unit)
    cb_vmem = max(1, int(avail // (live_factor * blk_unit)))
    rows_cap = max(batch, ((24 * 1024) // d_pad) // 8 * 8)   # keep h near vregs
    cb_vreg = max(1, rows_cap // batch)
    cb = int(min(num_chunks, cb_vmem, cb_vreg))
    if num_chunks >= 2:
        cb = min(cb, max(1, num_chunks // 2))       # >= 2 grid steps
    while num_chunks % cb:
        cb -= 1
    return cb


def selective_state_space(x, params, *, chunk_size=16, eps=1e-5,
                          chunk_block=None, mxu_dtype=None):
    """x: (seq_len, batch, d_model). Matches SelectiveStateSpace.forward."""
    seq_len, batch, d = x.shape
    # TODO(synk): support a ragged final chunk (PyTorch allows it); current
    # callers in MYNET use seq_len that is a multiple of chunk_size.
    assert seq_len % chunk_size == 0, "seq_len must be a multiple of chunk_size"
    num_chunks = seq_len // chunk_size

    A, B, C, Dvec, W_sel, b_sel, gamma, beta = (
        params[k] for k in ("A", "B", "C", "D", "W", "b", "gamma", "beta"))

    # Pad tiny d to a lane-dense width; padded lanes stay exactly zero end-to-end.
    d_pad = d if d % 128 == 0 else ((d + 127) // 128) * 128
    pad = d_pad - d
    w_dtype = jnp.dtype(mxu_dtype) if mxu_dtype is not None else A.dtype

    def pad_mat(m):
        return jnp.pad(m, ((0, pad), (0, pad))) if pad else m

    def pad_vec(v):
        v = jnp.pad(v, (0, pad)) if pad else v
        return v.reshape(1, d_pad).astype(jnp.float32)

    awt = jnp.concatenate([pad_mat(A).T, pad_mat(W_sel).T],
                          axis=1).astype(w_dtype)             # (dp, 2dp)
    bt = pad_mat(B).T.astype(w_dtype)                         # (dp, dp)
    ct = pad_mat(C).T.astype(w_dtype)                         # (dp, dp)
    bsel_r, dvec_r, gamma_r, beta_r = map(pad_vec, (b_sel, Dvec, gamma, beta))

    # x stays in its natural layout (free view); only the tiny-d lane pad
    # (toy regime) costs an extra copy.
    x_p = jnp.pad(x, ((0, 0), (0, 0), (0, pad))) if pad else x
    x_r = x_p.reshape(num_chunks, chunk_size, batch, d_pad)

    w_bytes = int((awt.size + bt.size + ct.size) * awt.dtype.itemsize)
    budget = _vmem_budget_bytes()
    cb = (chunk_block if chunk_block is not None else
          _pick_chunk_block(num_chunks, batch, chunk_size, d_pad, w_bytes,
                            budget))
    assert num_chunks % cb == 0
    grid = (num_chunks // cb,)
    rows = cb * batch

    blk = chunk_size * rows * d_pad * 4
    need = 10 * blk + 2 * w_bytes + (1 << 20)
    vmem_limit = int(min(max(need, 16 << 20), budget))

    x_spec = pl.BlockSpec((cb, chunk_size, batch, d_pad), lambda i: (i, 0, 0, 0))
    out_spec = pl.BlockSpec((cb, chunk_size, batch, d_pad), lambda i: (i, 0, 0, 0))
    awt_spec = pl.BlockSpec((d_pad, 2 * d_pad), lambda i: (0, 0))
    mat_spec = pl.BlockSpec((d_pad, d_pad), lambda i: (0, 0))
    vec_spec = pl.BlockSpec((1, d_pad), lambda i: (0, 0))
    # TODO(synk): single-buffer the constant weight/vector operands with
    # pipeline_mode=pl.Buffered(1) once verified on the target jax version;
    # the chunk-block picker already budgets for 2x weight VMEM.

    kernel = functools.partial(_s6_kernel, d_real=d, eps=eps)

    out_r = pl.pallas_call(
        kernel,
        out_shape=jax.ShapeDtypeStruct((num_chunks, chunk_size, batch, d_pad),
                                       x.dtype),
        grid=grid,
        in_specs=[x_spec, awt_spec, mat_spec, mat_spec,
                  vec_spec, vec_spec, vec_spec, vec_spec],
        out_specs=out_spec,
        scratch_shapes=[pltpu.VMEM((chunk_size, rows, d_pad), jnp.float32)],
        compiler_params=pltpu.CompilerParams(
            dimension_semantics=("parallel",),
            vmem_limit_bytes=vmem_limit),
    )(x_r, awt, bt, ct, bsel_r, dvec_r, gamma_r, beta_r)

    out = out_r.reshape(seq_len, batch, d_pad)     # free view, no HBM transpose
    return out[..., :d] if pad else out


def _reference(x, params, *, chunk_size=16, eps=1e-5):
    """Pure-JAX reference mirroring the PyTorch loop exactly."""
    seq_len, batch, d = x.shape
    A, B, C, Dvec = params["A"], params["B"], params["C"], params["D"]
    W, b = params["W"], params["b"]
    gamma, beta = params["gamma"], params["beta"]

    outs = []
    for i in range(0, seq_len, chunk_size):
        chunk = x[i:i + chunk_size]
        selection = jax.nn.sigmoid(chunk @ W.T + b)
        h = jnp.zeros((batch, d), x.dtype)
        ys = []
        for t in range(chunk.shape[0]):
            x_t = chunk[t]
            sel_t = selection[t]
            h = jnp.tanh(x_t @ A.T + h @ B.T) * sel_t
            y = h @ C.T + x_t * Dvec
            ys.append(y)
        outs.append(jnp.stack(ys, axis=0))
    out = jnp.concatenate(outs, axis=0)
    mean = jnp.mean(out, axis=-1, keepdims=True)
    var = jnp.mean((out - mean) ** 2, axis=-1, keepdims=True)
    return (out - mean) / jnp.sqrt(var + eps) * gamma + beta


def _init_params(key, d_model):
    ks = jax.random.split(key, 6)
    bound = 1.0 / np.sqrt(d_model)
    return {
        "A": 0.1 * jax.random.normal(ks[0], (d_model, d_model), jnp.float32),
        "B": 0.1 * jax.random.normal(ks[1], (d_model, d_model), jnp.float32),
        "C": 0.1 * jax.random.normal(ks[2], (d_model, d_model), jnp.float32),
        "D": 0.1 * jax.random.normal(ks[3], (d_model,), jnp.float32),
        "W": jax.random.uniform(ks[4], (d_model, d_model), jnp.float32,
                                -bound, bound),
        "b": jax.random.uniform(ks[5], (d_model,), jnp.float32, -bound, bound),
        "gamma": jnp.ones((d_model,), jnp.float32),
        "beta": jnp.zeros((d_model,), jnp.float32),
    }


if __name__ == "__main__":
    d_model = 32
    chunk_size = 16
    seq_len = 64          # 4 chunks -> 8 independent recurrence rows
    batch = 2

    key = jax.random.PRNGKey(0)
    k_params, k_x = jax.random.split(key)
    params = _init_params(k_params, d_model)
    x = jax.random.normal(k_x, (seq_len, batch, d_model), jnp.float32)

    ref = jax.block_until_ready(_reference(x, params, chunk_size=chunk_size))

    # f32 MXU path: strict check against the reference.
    out = selective_state_space(x, params, chunk_size=chunk_size)
    out = jax.block_until_ready(out)
    assert out.shape == (seq_len, batch, d_model)
    assert jnp.allclose(out, ref, atol=2e-3, rtol=2e-3), "mismatch vs reference"

    # bf16 MXU path (v6e/v7x perf option): sanity check only -- bf16 error
    # compounds through the recurrence, so only a loose bound is asserted.
    out_bf16 = selective_state_space(x, params, chunk_size=chunk_size,
                                     mxu_dtype=jnp.bfloat16)
    out_bf16 = jax.block_until_ready(out_bf16)
    assert out_bf16.shape == (seq_len, batch, d_model)
    assert bool(jnp.all(jnp.isfinite(out_bf16)))
    assert float(jnp.max(jnp.abs(out_bf16 - ref))) < 0.5

    print("KERNEL_OK")
</pallas_src>

<mosaic_0001>
module attributes {stable_mosaic.version = 11 : i64} {
  func.func @_s6_kernel(%arg0: i32, %arg1: memref<2x16x2x128xf32, #tpu.memory_space<vmem>>, %arg2: memref<128x256xf32, #tpu.memory_space<vmem>>, %arg3: memref<128x128xf32, #tpu.memory_space<vmem>>, %arg4: memref<128x128xf32, #tpu.memory_space<vmem>>, %arg5: memref<1x128xf32, #tpu.memory_space<vmem>>, %arg6: memref<1x128xf32, #tpu.memory_space<vmem>>, %arg7: memref<1x128xf32, #tpu.memory_space<vmem>>, %arg8: memref<1x128xf32, #tpu.memory_space<vmem>>, %arg9: memref<2x16x2x128xf32, #tpu.memory_space<vmem>>, %arg10: memref<16x4x128xf32, #tpu.memory_space<vmem>>) attributes {dimension_semantics = [#tpu.dimension_semantics<parallel>], iteration_bounds = array<i64: 2>, scalar_prefetch = 0 : i64, scratch_operands = 1 : i64, tpu.core_type = #tpu.core_type<tc>, window_params = [{transform_indices = @transform_0, window_bounds = array<i64: 2, 16, 2, 128>}, {pipeline_mode = #tpu.pipeline_mode<synchronous>, transform_indices = @transform_1, window_bounds = array<i64: 128, 256>}, {pipeline_mode = #tpu.pipeline_mode<synchronous>, transform_indices = @transform_2, window_bounds = array<i64: 128, 128>}, {pipeline_mode = #tpu.pipeline_mode<synchronous>, transform_indices = @transform_3, window_bounds = array<i64: 128, 128>}, {pipeline_mode = #tpu.pipeline_mode<synchronous>, transform_indices = @transform_4, window_bounds = array<i64: 1, 128>}, {pipeline_mode = #tpu.pipeline_mode<synchronous>, transform_indices = @transform_5, window_bounds = array<i64: 1, 128>}, {pipeline_mode = #tpu.pipeline_mode<synchronous>, transform_indices = @transform_6, window_bounds = array<i64: 1, 128>}, {pipeline_mode = #tpu.pipeline_mode<synchronous>, transform_indices = @transform_7, window_bounds = array<i64: 1, 128>}, {transform_indices = @transform_8, window_bounds = array<i64: 2, 16, 2, 128>}]} {
    %c0 = arith.constant 0 : index
    %c0_0 = arith.constant 0 : index
    %c0_1 = arith.constant 0 : index
    %c0_2 = arith.constant 0 : index
    %0 = vector.load %arg1[%c0, %c0_0, %c0_1, %c0_2] : memref<2x16x2x128xf32, #tpu.memory_space<vmem>>, vector<2x16x2x128xf32>
    %1 = tpu.transpose %0, [1, 0, 2, 3] : vector<2x16x2x128xf32> -> vector<16x2x2x128xf32>
    %2 = vector.shape_cast %1 : vector<16x2x2x128xf32> to vector<16x4x128xf32>
    %c0_3 = arith.constant 0 : index
    %c0_4 = arith.constant 0 : index
    %3 = vector.load %arg2[%c0_3, %c0_4] : memref<128x256xf32, #tpu.memory_space<vmem>>, vector<128x256xf32>
    %c0_5 = arith.constant 0 : index
    %c0_6 = arith.constant 0 : index
    %4 = vector.load %arg3[%c0_5, %c0_6] : memref<128x128xf32, #tpu.memory_space<vmem>>, vector<128x128xf32>
    %c0_7 = arith.constant 0 : index
    %c0_8 = arith.constant 0 : index
    %5 = vector.load %arg4[%c0_7, %c0_8] : memref<128x128xf32, #tpu.memory_space<vmem>>, vector<128x128xf32>
    %c0_9 = arith.constant 0 : index
    %c0_10 = arith.constant 0 : index
    %6 = vector.load %arg5[%c0_9, %c0_10] : memref<1x128xf32, #tpu.memory_space<vmem>>, vector<1x128xf32>
    %c0_11 = arith.constant 0 : index
    %c0_12 = arith.constant 0 : index
    %7 = vector.load %arg6[%c0_11, %c0_12] : memref<1x128xf32, #tpu.memory_space<vmem>>, vector<1x128xf32>
    %c0_13 = arith.constant 0 : index
    %c0_14 = arith.constant 0 : index
    %8 = vector.load %arg7[%c0_13, %c0_14] : memref<1x128xf32, #tpu.memory_space<vmem>>, vector<1x128xf32>
    %c0_15 = arith.constant 0 : index
    %c0_16 = arith.constant 0 : index
    %9 = vector.load %arg8[%c0_15, %c0_16] : memref<1x128xf32, #tpu.memory_space<vmem>>, vector<1x128xf32>
    %10 = vector.shape_cast %2 : vector<16x4x128xf32> to vector<64x128xf32>
    %cst = arith.constant dense<0.000000e+00> : vector<64x256xf32>
    %11 = tpu.matmul %10, %3, %cst {dimension_numbers = #tpu.dot_dimension_numbers<[1], [0], [0], [1], [0, 0, 1, 1], [], []>} : vector<64x128xf32>, vector<128x256xf32>, vector<64x256xf32> -> vector<64x256xf32>
    %12 = vector.shape_cast %11 : vector<64x256xf32> to vector<16x4x256xf32>
    %13 = vector.extract_strided_slice %12 {offsets = [0, 0, 0], sizes = [16, 4, 128], strides = [1, 1, 1]} : vector<16x4x256xf32> to vector<16x4x128xf32>
    %14 = vector.extract_strided_slice %12 {offsets = [0, 0, 128], sizes = [16, 4, 128], strides = [1, 1, 1]} : vector<16x4x256xf32> to vector<16x4x128xf32>
    %15 = vector.shape_cast %6 : vector<1x128xf32> to vector<1x1x128xf32>
    %16 = vector.broadcast %15 : vector<1x1x128xf32> to vector<16x4x128xf32>
    %17 = arith.addf %14, %16 : vector<16x4x128xf32>
    %18 = arith.negf %17 : vector<16x4x128xf32>
    %19 = math.exp %18 : vector<16x4x128xf32>
    %cst_17 = arith.constant 1.000000e+00 : f32
    %20 = vector.broadcast %cst_17 : f32 to vector<16x4x128xf32>
    %21 = arith.addf %20, %19 : vector<16x4x128xf32>
    %22 = arith.divf %20, %21 : vector<16x4x128xf32>
    %cst_18 = arith.constant 0.000000e+00 : f32
    %23 = vector.broadcast %cst_18 : f32 to vector<4x128xf32>
    %24 = vector.extract_strided_slice %13 {offsets = [0, 0, 0], sizes = [1, 4, 128], strides = [1, 1, 1]} : vector<16x4x128xf32> to vector<1x4x128xf32>
    %25 = vector.shape_cast %24 : vector<1x4x128xf32> to vector<4x128xf32>
    %cst_19 = arith.constant dense<0.000000e+00> : vector<4x128xf32>
    %26 = tpu.matmul %23, %4, %cst_19 {dimension_numbers = #tpu.dot_dimension_numbers<[1], [0], [0], [1], [0, 0, 1, 1], [], []>} : vector<4x128xf32>, vector<128x128xf32>, vector<4x128xf32> -> vector<4x128xf32>
    %27 = arith.addf %25, %26 : vector<4x128xf32>
    %28 = math.tanh %27 : vector<4x128xf32>
    %29 = vector.extract_strided_slice %22 {offsets = [0, 0, 0], sizes = [1, 4, 128], strides = [1, 1, 1]} : vector<16x4x128xf32> to vector<1x4x128xf32>
    %30 = vector.shape_cast %29 : vector<1x4x128xf32> to vector<4x128xf32>
    %31 = arith.mulf %28, %30 : vector<4x128xf32>
    %cst_20 = arith.constant dense<0.000000e+00> : vector<4x128xf32>
    %32 = tpu.matmul %31, %5, %cst_20 {dimension_numbers = #tpu.dot_dimension_numbers<[1], [0], [0], [1], [0, 0, 1, 1], [], []>} : vector<4x128xf32>, vector<128x128xf32>, vector<4x128xf32> -> vector<4x128xf32>
    %33 = vector.extract_strided_slice %2 {offsets = [0, 0, 0], sizes = [1, 4, 128], strides = [1, 1, 1]} : vector<16x4x128xf32> to vector<1x4x128xf32>
    %34 = vector.shape_cast %33 : vector<1x4x128xf32> to vector<4x128xf32>
    %35 = vector.broadcast %7 : vector<1x128xf32> to vector<4x128xf32>
    %36 = arith.mulf %34, %35 : vector<4x128xf32>
    %37 = arith.addf %32, %36 : vector<4x128xf32>
    %cst_21 = arith.constant dense<0.000000e+00> : vector<4xf32>
    %38 = vector.multi_reduction <add>, %37, %cst_21 [1] : vector<4x128xf32> to vector<4xf32>
    %39 = vector.shape_cast %38 : vector<4xf32> to vector<4x1xf32>
    %cst_22 = arith.constant 3.125000e-02 : f32
    %40 = vector.broadcast %cst_22 : f32 to vector<4x1xf32>
    %41 = arith.mulf %39, %40 : vector<4x1xf32>
    %42 = arith.mulf %37, %37 : vector<4x128xf32>
    %cst_23 = arith.constant dense<0.000000e+00> : vector<4xf32>
    %43 = vector.multi_reduction <add>, %42, %cst_23 [1] : vector<4x128xf32> to vector<4xf32>
    %44 = vector.shape_cast %43 : vector<4xf32> to vector<4x1xf32>
    %cst_24 = arith.constant 3.125000e-02 : f32
    %45 = vector.broadcast %cst_24 : f32 to vector<4x1xf32>
    %46 = arith.mulf %44, %45 : vector<4x1xf32>
    %47 = arith.mulf %41, %41 : vector<4x1xf32>
    %48 = arith.subf %46, %47 : vector<4x1xf32>
    %49 = vector.broadcast %41 : vector<4x1xf32> to vector<4x128xf32>
    %50 = arith.subf %37, %49 : vector<4x128xf32>
    %cst_25 = arith.constant 9.99999974E-6 : f32
    %51 = vector.broadcast %cst_25 : f32 to vector<4x1xf32>
    %52 = arith.addf %48, %51 : vector<4x1xf32>
    %53 = math.rsqrt %52 : vector<4x1xf32>
    %54 = vector.broadcast %53 : vector<4x1xf32> to vector<4x128xf32>
    %55 = arith.mulf %50, %54 : vector<4x128xf32>
    %56 = vector.broadcast %8 : vector<1x128xf32> to vector<4x128xf32>
    %57 = arith.mulf %55, %56 : vector<4x128xf32>
    %58 = vector.broadcast %9 : vector<1x128xf32> to vector<4x128xf32>
    %59 = arith.addf %57, %58 : vector<4x128xf32>
    %c0_26 = arith.constant 0 : index
    %c0_27 = arith.constant 0 : index
    %c0_28 = arith.constant 0 : index
    %60 = vector.load %arg10[%c0_26, %c0_27, %c0_28] : memref<16x4x128xf32, #tpu.memory_space<vmem>>, vector<1x4x128xf32>
    %61 = vector.shape_cast %60 : vector<1x4x128xf32> to vector<4x128xf32>
    %62 = vector.shape_cast %59 : vector<4x128xf32> to vector<1x4x128xf32>
    tpu.vector_store %arg10[%c0_26, %c0_27, %c0_28], %62 {strides = array<i32>} : memref<16x4x128xf32, #tpu.memory_space<vmem>>, vector<1x4x128xf32>,
    %63 = vector.extract_strided_slice %13 {offsets = [1, 0, 0], sizes = [1, 4, 128], strides = [1, 1, 1]} : vector<16x4x128xf32> to vector<1x4x128xf32>
    %64 = vector.shape_cast %63 : vector<1x4x128xf32> to vector<4x128xf32>
    %cst_29 = arith.constant dense<0.000000e+00> : vector<4x128xf32>
    %65 = tpu.matmul %31, %4, %cst_29 {dimension_numbers = #tpu.dot_dimension_numbers<[1], [0], [0], [1], [0, 0, 1, 1], [], []>} : vector<4x128xf32>, vector<128x128xf32>, vector<4x128xf32> -> vector<4x128xf32>
    %66 = arith.addf %64, %65 : vector<4x128xf32>
    %67 = math.tanh %66 : vector<4x128xf32>
    %68 = vector.extract_strided_slice %22 {offsets = [1, 0, 0], sizes = [1, 4, 128], strides = [1, 1, 1]} : vector<16x4x128xf32> to vector<1x4x128xf32>
    %69 = vector.shape_cast %68 : vector<1x4x128xf32> to vector<4x128xf32>
    %70 = arith.mulf %67, %69 : vector<4x128xf32>
    %cst_30 = arith.constant dense<0.000000e+00> : vector<4x128xf32>
    %71 = tpu.matmul %70, %5, %cst_30 {dimension_numbers = #tpu.dot_dimension_numbers<[1], [0], [0], [1], [0, 0, 1, 1], [], []>} : vector<4x128xf32>, vector<128x128xf32>, vector<4x128xf32> -> vector<4x128xf32>
    %72 = vector.extract_strided_slice %2 {offsets = [1, 0, 0], sizes = [1, 4, 128], strides = [1, 1, 1]} : vector<16x4x128xf32> to vector<1x4x128xf32>
    %73 = vector.shape_cast %72 : vector<1x4x128xf32> to vector<4x128xf32>
    %74 = vector.broadcast %7 : vector<1x128xf32> to vector<4x128xf32>
    %75 = arith.mulf %73, %74 : vector<4x128xf32>
    %76 = arith.addf %71, %75 : vector<4x128xf32>
    %cst_31 = arith.constant dense<0.000000e+00> : vector<4xf32>
    %77 = vector.multi_reduction <add>, %76, %cst_31 [1] : vector<4x128xf32> to vector<4xf32>
    %78 = vector.shape_cast %77 : vector<4xf32> to vector<4x1xf32>
    %cst_32 = arith.constant 3.125000e-02 : f32
    %79 = vector.broadcast %cst_32 : f32 to vector<4x1xf32>
    %80 = arith.mulf %78, %79 : vector<4x1xf32>
    %81 = arith.mulf %76, %76 : vector<4x128xf32>
    %cst_33 = arith.constant dense<0.000000e+00> : vector<4xf32>
    %82 = vector.multi_reduction <add>, %81, %cst_33 [1] : vector<4x128xf32> to vector<4xf32>
    %83 = vector.shape_cast %82 : vector<4xf32> to vector<4x1xf32>
    %cst_34 = arith.constant 3.125000e-02 : f32
    %84 = vector.broadcast %cst_34 : f32 to vector<4x1xf32>
    %85 = arith.mulf %83, %84 : vector<4x1xf32>
    %86 = arith.mulf %80, %80 : vector<4x1xf32>
    %87 = arith.subf %85, %86 : vector<4x1xf32>
    %88 = vector.broadcast %80 : vector<4x1xf32> to vector<4x128xf32>
    %89 = arith.subf %76, %88 : vector<4x128xf32>
    %cst_35 = arith.constant 9.99999974E-6 : f32
    %90 = vector.broadcast %cst_35 : f32 to vector<4x1xf32>
    %91 = arith.addf %87, %90 : vector<4x1xf32>
    %92 = math.rsqrt %91 : vector<4x1xf32>
    %93 = vector.broadcast %92 : vector<4x1xf32> to vector<4x128xf32>
    %94 = arith.mulf %89, %93 : vector<4x128xf32>
    %95 = vector.broadcast %8 : vector<1x128xf32> to vector<4x128xf32>
    %96 = arith.mulf %94, %95 : vector<4x128xf32>
    %97 = vector.broadcast %9 : vector<1x128xf32> to vector<4x128xf32>
    %98 = arith.addf %96, %97 : vector<4x128xf32>
    %c1 = arith.constant 1 : index
    %c0_36 = arith.constant 0 : index
    %c0_37 = arith.constant 0 : index
    %99 = vector.load %arg10[%c1, %c0_36, %c0_37] : memref<16x4x128xf32, #tpu.memory_space<vmem>>, vector<1x4x128xf32>
    %100 = vector.shape_cast %99 : vector<1x4x128xf32> to vector<4x128xf32>
    %101 = vector.shape_cast %98 : vector<4x128xf32> to vector<1x4x128xf32>
    tpu.vector_store %arg10[%c1, %c0_36, %c0_37], %101 {strides = array<i32>} : memref<16x4x128xf32, #tpu.memory_space<vmem>>, vector<1x4x128xf32>,
    %102 = vector.extract_strided_slice %13 {offsets = [2, 0, 0], sizes = [1, 4, 128], strides = [1, 1, 1]} : vector<16x4x128xf32> to vector<1x4x128xf32>
    %103 = vector.shape_cast %102 : vector<1x4x128xf32> to vector<4x128xf32>
    %cst_38 = arith.constant dense<0.000000e+00> : vector<4x128xf32>
    %104 = tpu.matmul %70, %4, %cst_38 {dimension_numbers = #tpu.dot_dimension_numbers<[1], [0], [0], [1], [0, 0, 1, 1], [], []>} : vector<4x128xf32>, vector<128x128xf32>, vector<4x128xf32> -> vector<4x128xf32>
    %105 = arith.addf %103, %104 : vector<4x128xf32>
    %106 = math.tanh %105 : vector<4x128xf32>
    %107 = vector.extract_strided_slice %22 {offsets = [2, 0, 0], sizes = [1, 4, 128], strides = [1, 1, 1]} : vector<16x4x128xf32> to vector<1x4x128xf32>
    %108 = vector.shape_cast %107 : vector<1x4x128xf32> to vector<4x128xf32>
    %109 = arith.mulf %106, %108 : vector<4x128xf32>
    %cst_39 = arith.constant dense<0.000000e+00> : vector<4x128xf32>
    %110 = tpu.matmul %109, %5, %cst_39 {dimension_numbers = #tpu.dot_dimension_numbers<[1], [0], [0], [1], [0, 0, 1, 1], [], []>} : vector<4x128xf32>, vector<128x128xf32>, vector<4x128xf32> -> vector<4x128xf32>
    %111 = vector.extract_strided_slice %2 {offsets = [2, 0, 0], sizes = [1, 4, 128], strides = [1, 1, 1]} : vector<16x4x128xf32> to vector<1x4x128xf32>
    %112 = vector.shape_cast %111 : vector<1x4x128xf32> to vector<4x128xf32>
    %113 = vector.broadcast %7 : vector<1x128xf32> to vector<4x128xf32>
    %114 = arith.mulf %112, %113 : vector<4x128xf32>
    %115 = arith.addf %110, %114 : vector<4x128xf32>
    %cst_40 = arith.constant dense<0.000000e+00> : vector<4xf32>
    %116 = vector.multi_reduction <add>, %115, %cst_40 [1] : vector<4x128xf32> to vector<4xf32>
    %117 = vector.shape_cast %116 : vector<4xf32> to vector<4x1xf32>
    %cst_41 = arith.constant 3.125000e-02 : f32
    %118 = vector.broadcast %cst_41 : f32 to vector<4x1xf32>
    %119 = arith.mulf %117, %118 : vector<4x1xf32>
    %120 = arith.mulf %115, %115 : vector<4x128xf32>
    %cst_42 = arith.constant dense<0.000000e+00> : vector<4xf32>
    %121 = vector.multi_reduction <add>, %120, %cst_42 [1] : vector<4x128xf32> to vector<4xf32>
    %122 = vector.shape_cast %121 : vector<4xf32> to vector<4x1xf32>
    %cst_43 = arith.constant 3.125000e-02 : f32
    %123 = vector.broadcast %cst_43 : f32 to vector<4x1xf32>
    %124 = arith.mulf %122, %123 : vector<4x1xf32>
    %125 = arith.mulf %119, %119 : vector<4x1xf32>
    %126 = arith.subf %124, %125 : vector<4x1xf32>
    %127 = vector.broadcast %119 : vector<4x1xf32> to vector<4x128xf32>
    %128 = arith.subf %115, %127 : vector<4x128xf32>
    %cst_44 = arith.constant 9.99999974E-6 : f32
    %129 = vector.broadcast %cst_44 : f32 to vector<4x1xf32>
    %130 = arith.addf %126, %129 : vector<4x1xf32>
    %131 = math.rsqrt %130 : vector<4x1xf32>
    %132 = vector.broadcast %131 : vector<4x1xf32> to vector<4x128xf32>
    %133 = arith.mulf %128, %132 : vector<4x128xf32>
    %134 = vector.broadcast %8 : vector<1x128xf32> to vector<4x128xf32>
    %135 = arith.mulf %133, %134 : vector<4x128xf32>
    %136 = vector.broadcast %9 : vector<1x128xf32> to vector<4x128xf32>
    %137 = arith.addf %135, %136 : vector<4x128xf32>
    %c2 = arith.constant 2 : index
    %c0_45 = arith.constant 0 : index
    %c0_46 = arith.constant 0 : index
    %138 = vector.load %arg10[%c2, %c0_45, %c0_46] : memref<16x4x128xf32, #tpu.memory_space<vmem>>, vector<1x4x128xf32>
    %139 = vector.shape_cast %138 : vector<1x4x128xf32> to vector<4x128xf32>
    %140 = vector.shape_cast %137 : vector<4x128xf32> to vector<1x4x128xf32>
    tpu.vector_store %arg10[%c2, %c0_45, %c0_46], %140 {strides = array<i32>} : memref<16x4x128xf32, #tpu.memory_space<vmem>>, vector<1x4x128xf32>,
    %141 = vector.extract_strided_slice %13 {offsets = [3, 0, 0], sizes = [1, 4, 128], strides = [1, 1, 1]} : vector<16x4x128xf32> to vector<1x4x128xf32>
    %142 = vector.shape_cast %141 : vector<1x4x128xf32> to vector<4x128xf32>
    %cst_47 = arith.constant dense<0.000000e+00> : vector<4x128xf32>
    %143 = tpu.matmul %109, %4, %cst_47 {dimension_numbers = #tpu.dot_dimension_numbers<[1], [0], [0], [1], [0, 0, 1, 1], [], []>} : vector<4x128xf32>, vector<128x128xf32>, vector<4x128xf32> -> vector<4x128xf32>
    %144 = arith.addf %142, %143 : vector<4x128xf32>
    %145 = math.tanh %144 : vector<4x128xf32>
    %146 = vector.extract_strided_slice %22 {offsets = [3, 0, 0], sizes = [1, 4, 128], strides = [1, 1, 1]} : vector<16x4x128xf32> to vector<1x4x128xf32>
    %147 = vector.shape_cast %146 : vector<1x4x128xf32> to vector<4x128xf32>
    %148 = arith.mulf %145, %147 : vector<4x128xf32>
    %cst_48 = arith.constant dense<0.000000e+00> : vector<4x128xf32>
    %149 = tpu.matmul %148, %5, %cst_48 {dimension_numbers = #tpu.dot_dimension_numbers<[1], [0], [0], [1], [0, 0, 1, 1], [], []>} : vector<4x128xf32>, vector<128x128xf32>, vector<4x128xf32> -> vector<4x128xf32>
    %150 = vector.extract_strided_slice %2 {offsets = [3, 0, 0], sizes = [1, 4, 128], strides = [1, 1, 1]} : vector<16x4x128xf32> to vector<1x4x128xf32>
    %151 = vector.shape_cast %150 : vector<1x4x128xf32> to vector<4x128xf32>
    %152 = vector.broadcast %7 : vector<1x128xf32> to vector<4x128xf32>
    %153 = arith.mulf %151, %152 : vector<4x128xf32>
    %154 = arith.addf %149, %153 : vector<4x128xf32>
    %cst_49 = arith.constant dense<0.000000e+00> : vector<4xf32>
    %155 = vector.multi_reduction <add>, %154, %cst_49 [1] : vector<4x128xf32> to vector<4xf32>
    %156 = vector.shape_cast %155 : vector<4xf32> to vector<4x1xf32>
    %cst_50 = arith.constant 3.125000e-02 : f32
    %157 = vector.broadcast %cst_50 : f32 to vector<4x1xf32>
    %158 = arith.mulf %156, %157 : vector<4x1xf32>
    %159 = arith.mulf %154, %154 : vector<4x128xf32>
    %cst_51 = arith.constant dense<0.000000e+00> : vector<4xf32>
    %160 = vector.multi_reduction <add>, %159, %cst_51 [1] : vector<4x128xf32> to vector<4xf32>
    %161 = vector.shape_cast %160 : vector<4xf32> to vector<4x1xf32>
    %cst_52 = arith.constant 3.125000e-02 : f32
    %162 = vector.broadcast %cst_52 : f32 to vector<4x1xf32>
    %163 = arith.mulf %161, %162 : vector<4x1xf32>
    %164 = arith.mulf %158, %158 : vector<4x1xf32>
    %165 = arith.subf %163, %164 : vector<4x1xf32>
    %166 = vector.broadcast %158 : vector<4x1xf32> to vector<4x128xf32>
    %167 = arith.subf %154, %166 : vector<4x128xf32>
    %cst_53 = arith.constant 9.99999974E-6 : f32
    %168 = vector.broadcast %cst_53 : f32 to vector<4x1xf32>
    %169 = arith.addf %165, %168 : vector<4x1xf32>
    %170 = math.rsqrt %169 : vector<4x1xf32>
    %171 = vector.broadcast %170 : vector<4x1xf32> to vector<4x128xf32>
    %172 = arith.mulf %167, %171 : vector<4x128xf32>
    %173 = vector.broadcast %8 : vector<1x128xf32> to vector<4x128xf32>
    %174 = arith.mulf %172, %173 : vector<4x128xf32>
    %175 = vector.broadcast %9 : vector<1x128xf32> to vector<4x128xf32>
    %176 = arith.addf %174, %175 : vector<4x128xf32>
    %c3 = arith.constant 3 : index
    %c0_54 = arith.constant 0 : index
    %c0_55 = arith.constant 0 : index
    %177 = vector.load %arg10[%c3, %c0_54, %c0_55] : memref<16x4x128xf32, #tpu.memory_space<vmem>>, vector<1x4x128xf32>
    %178 = vector.shape_cast %177 : vector<1x4x128xf32> to vector<4x128xf32>
    %179 = vector.shape_cast %176 : vector<4x128xf32> to vector<1x4x128xf32>
    tpu.vector_store %arg10[%c3, %c0_54, %c0_55], %179 {strides = array<i32>} : memref<16x4x128xf32, #tpu.memory_space<vmem>>, vector<1x4x128xf32>,
    %180 = vector.extract_strided_slice %13 {offsets = [4, 0, 0], sizes = [1, 4, 128], strides = [1, 1, 1]} : vector<16x4x128xf32> to vector<1x4x128xf32>
    %181 = vector.shape_cast %180 : vector<1x4x128xf32> to vector<4x128xf32>
    %cst_56 = arith.constant dense<0.000000e+00> : vector<4x128xf32>
    %182 = tpu.matmul %148, %4, %cst_56 {dimension_numbers = #tpu.dot_dimension_numbers<[1], [0], [0], [1], [0, 0, 1, 1], [], []>} : vector<4x128xf32>, vector<128x128xf32>, vector<4x128xf32> -> vector<4x128xf32>
    %183 = arith.addf %181, %182 : vector<4x128xf32>
    %184 = math.tanh %183 : vector<4x128xf32>
    %185 = vector.extract_strided_slice %22 {offsets = [4, 0, 0], sizes = [1, 4, 128], strides = [1, 1, 1]} : vector<16x4x128xf32> to vector<1x4x128xf32>
    %186 = vector.shape_cast %185 : vector<1x4x128xf32> to vector<4x128xf32>
    %187 = arith.mulf %184, %186 : vector<4x128xf32>
    %cst_57 = arith.constant dense<0.000000e+00> : vector<4x128xf32>
    %188 = tpu.matmul %187, %5, %cst_57 {dimension_numbers = #tpu.dot_dimension_numbers<[1], [0], [0], [1], [0, 0, 1, 1], [], []>} : vector<4x128xf32>, vector<128x128xf32>, vector<4x128xf32> -> vector<4x128xf32>
    %189 = vector.extract_strided_slice %2 {offsets = [4, 0, 0], sizes = [1, 4, 128], strides = [1, 1, 1]} : vector<16x4x128xf32> to vector<1x4x128xf32>
    %190 = vector.shape_cast %189 : vector<1x4x128xf32> to vector<4x128xf32>
    %191 = vector.broadcast %7 : vector<1x128xf32> to vector<4x128xf32>
    %192 = arith.mulf %190, %191 : vector<4x128xf32>
    %193 = arith.addf %188, %192 : vector<4x128xf32>
    %cst_58 = arith.constant dense<0.000000e+00> : vector<4xf32>
    %194 = vector.multi_reduction <add>, %193, %cst_58 [1] : vector<4x128xf32> to vector<4xf32>
    %195 = vector.shape_cast %194 : vector<4xf32> to vector<4x1xf32>
    %cst_59 = arith.constant 3.125000e-02 : f32
    %196 = vector.broadcast %cst_59 : f32 to vector<4x1xf32>
    %197 = arith.mulf %195, %196 : vector<4x1xf32>
    %198 = arith.mulf %193, %193 : vector<4x128xf32>
    %cst_60 = arith.constant dense<0.000000e+00> : vector<4xf32>
    %199 = vector.multi_reduction <add>, %198, %cst_60 [1] : vector<4x128xf32> to vector<4xf32>
    %200 = vector.shape_cast %199 : vector<4xf32> to vector<4x1xf32>
    %cst_61 = arith.constant 3.125000e-02 : f32
    %201 = vector.broadcast %cst_61 : f32 to vector<4x1xf32>
    %202 = arith.mulf %200, %201 : vector<4x1xf32>
    %203 = arith.mulf %197, %197 : vector<4x1xf32>
    %204 = arith.subf %202, %203 : vector<4x1xf32>
    %205 = vector.broadcast %197 : vector<4x1xf32> to vector<4x128xf32>
    %206 = arith.subf %193, %205 : vector<4x128xf32>
    %cst_62 = arith.constant 9.99999974E-6 : f32
    %207 = vector.broadcast %cst_62 : f32 to vector<4x1xf32>
    %208 = arith.addf %204, %207 : vector<4x1xf32>
    %209 = math.rsqrt %208 : vector<4x1xf32>
    %210 = vector.broadcast %209 : vector<4x1xf32> to vector<4x128xf32>
    %211 = arith.mulf %206, %210 : vector<4x128xf32>
    %212 = vector.broadcast %8 : vector<1x128xf32> to vector<4x128xf32>
    %213 = arith.mulf %211, %212 : vector<4x128xf32>
    %214 = vector.broadcast %9 : vector<1x128xf32> to vector<4x128xf32>
    %215 = arith.addf %213, %214 : vector<4x128xf32>
    %c4 = arith.constant 4 : index
    %c0_63 = arith.constant 0 : index
    %c0_64 = arith.constant 0 : index
    %216 = vector.load %arg10[%c4, %c0_63, %c0_64] : memref<16x4x128xf32, #tpu.memory_space<vmem>>, vector<1x4x128xf32>
    %217 = vector.shape_cast %216 : vector<1x4x128xf32> to vector<4x128xf32>
    %218 = vector.shape_cast %215 : vector<4x128xf32> to vector<1x4x128xf32>
    tpu.vector_store %arg10[%c4, %c0_63, %c0_64], %218 {strides = array<i32>} : memref<16x4x128xf32, #tpu.memory_space<vmem>>, vector<1x4x128xf32>,
    %219 = vector.extract_strided_slice %13 {offsets = [5, 0, 0], sizes = [1, 4, 128], strides = [1, 1, 1]} : vector<16x4x128xf32> to vector<1x4x128xf32>
    %220 = vector.shape_cast %219 : vector<1x4x128xf32> to vector<4x128xf32>
    %cst_65 = arith.constant dense<0.000000e+00> : vector<4x128xf32>
    %221 = tpu.matmul %187, %4, %cst_65 {dimension_numbers = #tpu.dot_dimension_numbers<[1], [0], [0], [1], [0, 0, 1, 1], [], []>} : vector<4x128xf32>, vector<128x128xf32>, vector<4x128xf32> -> vector<4x128xf32>
    %222 = arith.addf %220, %221 : vector<4x128xf32>
    %223 = math.tanh %222 : vector<4x128xf32>
    %224 = vector.extract_strided_slice %22 {offsets = [5, 0, 0], sizes = [1, 4, 128], strides = [1, 1, 1]} : vector<16x4x128xf32> to vector<1x4x128xf32>
    %225 = vector.shape_cast %224 : vector<1x4x128xf32> to vector<4x128xf32>
    %226 = arith.mulf %223, %225 : vector<4x128xf32>
    %cst_66 = arith.constant dense<0.000000e+00> : vector<4x128xf32>
    %227 = tpu.matmul %226, %5, %cst_66 {dimension_numbers = #tpu.dot_dimension_numbers<[1], [0], [0], [1], [0, 0, 1, 1], [], []>} : vector<4x128xf32>, vector<128x128xf32>, vector<4x128xf32> -> vector<4x128xf32>
    %228 = vector.extract_strided_slice %2 {offsets = [5, 0, 0], sizes = [1, 4, 128], strides = [1, 1, 1]} : vector<16x4x128xf32> to vector<1x4x128xf32>
    %229 = vector.shape_cast %228 : vector<1x4x128xf32> to vector<4x128xf32>
    %230 = vector.broadcast %7 : vector<1x128xf32> to vector<4x128xf32>
    %231 = arith.mulf %229, %230 : vector<4x128xf32>
    %232 = arith.addf %227, %231 : vector<4x128xf32>
    %cst_67 = arith.constant dense<0.000000e+00> : vector<4xf32>
    %233 = vector.multi_reduction <add>, %232, %cst_67 [1] : vector<4x128xf32> to vector<4xf32>
    %234 = vector.shape_cast %233 : vector<4xf32> to vector<4x1xf32>
    %cst_68 = arith.constant 3.125000e-02 : f32
    %235 = vector.broadcast %cst_68 : f32 to vector<4x1xf32>
    %236 = arith.mulf %234, %235 : vector<4x1xf32>
    %237 = arith.mulf %232, %232 : vector<4x128xf32>
    %cst_69 = arith.constant dense<0.000000e+00> : vector<4xf32>
    %238 = vector.multi_reduction <add>, %237, %cst_69 [1] : vector<4x128xf32> to vector<4xf32>
    %239 = vector.shape_cast %238 : vector<4xf32> to vector<4x1xf32>
    %cst_70 = arith.constant 3.125000e-02 : f32
    %240 = vector.broadcast %cst_70 : f32 to vector<4x1xf32>
    %241 = arith.mulf %239, %240 : vector<4x1xf32>
    %242 = arith.mulf %236, %236 : vector<4x1xf32>
    %243 = arith.subf %241, %242 : vector<4x1xf32>
    %244 = vector.broadcast %236 : vector<4x1xf32> to vector<4x128xf32>
    %245 = arith.subf %232, %244 : vector<4x128xf32>
    %cst_71 = arith.constant 9.99999974E-6 : f32
    %246 = vector.broadcast %cst_71 : f32 to vector<4x1xf32>
    %247 = arith.addf %243, %246 : vector<4x1xf32>
    %248 = math.rsqrt %247 : vector<4x1xf32>
    %249 = vector.broadcast %248 : vector<4x1xf32> to vector<4x128xf32>
    %250 = arith.mulf %245, %249 : vector<4x128xf32>
    %251 = vector.broadcast %8 : vector<1x128xf32> to vector<4x128xf32>
    %252 = arith.mulf %250, %251 : vector<4x128xf32>
    %253 = vector.broadcast %9 : vector<1x128xf32> to vector<4x128xf32>
    %254 = arith.addf %252, %253 : vector<4x128xf32>
    %c5 = arith.constant 5 : index
    %c0_72 = arith.constant 0 : index
    %c0_73 = arith.constant 0 : index
    %255 = vector.load %arg10[%c5, %c0_72, %c0_73] : memref<16x4x128xf32, #tpu.memory_space<vmem>>, vector<1x4x128xf32>
    %256 = vector.shape_cast %255 : vector<1x4x128xf32> to vector<4x128xf32>
    %257 = vector.shape_cast %254 : vector<4x128xf32> to vector<1x4x128xf32>
    tpu.vector_store %arg10[%c5, %c0_72, %c0_73], %257 {strides = array<i32>} : memref<16x4x128xf32, #tpu.memory_space<vmem>>, vector<1x4x128xf32>,
    %258 = vector.extract_strided_slice %13 {offsets = [6, 0, 0], sizes = [1, 4, 128], strides = [1, 1, 1]} : vector<16x4x128xf32> to vector<1x4x128xf32>
    %259 = vector.shape_cast %258 : vector<1x4x128xf32> to vector<4x128xf32>
    %cst_74 = arith.constant dense<0.000000e+00> : vector<4x128xf32>
    %260 = tpu.matmul %226, %4, %cst_74 {dimension_numbers = #tpu.dot_dimension_numbers<[1], [0], [0], [1], [0, 0, 1, 1], [], []>} : vector<4x128xf32>, vector<128x128xf32>, vector<4x128xf32> -> vector<4x128xf32>
    %261 = arith.addf %259, %260 : vector<4x128xf32>
    %262 = math.tanh %261 : vector<4x128xf32>
    %263 = vector.extract_strided_slice %22 {offsets = [6, 0, 0], sizes = [1, 4, 128], strides = [1, 1, 1]} : vector<16x4x128xf32> to vector<1x4x128xf32>
    %264 = vector.shape_cast %263 : vector<1x4x128xf32> to vector<4x128xf32>
    %265 = arith.mulf %262, %264 : vector<4x128xf32>
    %cst_75 = arith.constant dense<0.000000e+00> : vector<4x128xf32>
    %266 = tpu.matmul %265, %5, %cst_75 {dimension_numbers = #tpu.dot_dimension_numbers<[1], [0], [0], [1], [0, 0, 1, 1], [], []>} : vector<4x128xf32>, vector<128x128xf32>, vector<4x128xf32> -> vector<4x128xf32>
    %267 = vector.extract_strided_slice %2 {offsets = [6, 0, 0], sizes = [1, 4, 128], strides = [1, 1, 1]} : vector<16x4x128xf32> to vector<1x4x128xf32>
    %268 = vector.shape_cast %267 : vector<1x4x128xf32> to vector<4x128xf32>
    %269 = vector.broadcast %7 : vector<1x128xf32> to vector<4x128xf32>
    %270 = arith.mulf %268, %269 : vector<4x128xf32>
    %271 = arith.addf %266, %270 : vector<4x128xf32>
    %cst_76 = arith.constant dense<0.000000e+00> : vector<4xf32>
    %272 = vector.multi_reduction <add>, %271, %cst_76 [1] : vector<4x128xf32> to vector<4xf32>
    %273 = vector.shape_cast %272 : vector<4xf32> to vector<4x1xf32>
    %cst_77 = arith.constant 3.125000e-02 : f32
    %274 = vector.broadcast %cst_77 : f32 to vector<4x1xf32>
    %275 = arith.mulf %273, %274 : vector<4x1xf32>
    %276 = arith.mulf %271, %271 : vector<4x128xf32>
    %cst_78 = arith.constant dense<0.000000e+00> : vector<4xf32>
    %277 = vector.multi_reduction <add>, %276, %cst_78 [1] : vector<4x128xf32> to vector<4xf32>
    %278 = vector.shape_cast %277 : vector<4xf32> to vector<4x1xf32>
    %cst_79 = arith.constant 3.125000e-02 : f32
    %279 = vector.broadcast %cst_79 : f32 to vector<4x1xf32>
    %280 = arith.mulf %278, %279 : vector<4x1xf32>
    %281 = arith.mulf %275, %275 : vector<4x1xf32>
    %282 = arith.subf %280, %281 : vector<4x1xf32>
    %283 = vector.broadcast %275 : vector<4x1xf32> to vector<4x128xf32>
    %284 = arith.subf %271, %283 : vector<4x128xf32>
    %cst_80 = arith.constant 9.99999974E-6 : f32
    %285 = vector.broadcast %cst_80 : f32 to vector<4x1xf32>
    %286 = arith.addf %282, %285 : vector<4x1xf32>
    %287 = math.rsqrt %286 : vector<4x1xf32>
    %288 = vector.broadcast %287 : vector<4x1xf32> to vector<4x128xf32>
    %289 = arith.mulf %284, %288 : vector<4x128xf32>
    %290 = vector.broadcast %8 : vector<1x128xf32> to vector<4x128xf32>
    %291 = arith.mulf %289, %290 : vector<4x128xf32>
    %292 = vector.broadcast %9 : vector<1x128xf32> to vector<4x128xf32>
    %293 = arith.addf %291, %292 : vector<4x128xf32>
    %c6 = arith.constant 6 : index
    %c0_81 = arith.constant 0 : index
    %c0_82 = arith.constant 0 : index
    %294 = vector.load %arg10[%c6, %c0_81, %c0_82] : memref<16x4x128xf32, #tpu.memory_space<vmem>>, vector<1x4x128xf32>
    %295 = vector.shape_cast %294 : vector<1x4x128xf32> to vector<4x128xf32>
    %296 = vector.shape_cast %293 : vector<4x128xf32> to vector<1x4x128xf32>
    tpu.vector_store %arg10[%c6, %c0_81, %c0_82], %296 {strides = array<i32>} : memref<16x4x128xf32, #tpu.memory_space<vmem>>, vector<1x4x128xf32>,
    %297 = vector.extract_strided_slice %13 {offsets = [7, 0, 0], sizes = [1, 4, 128], strides = [1, 1, 1]} : vector<16x4x128xf32> to vector<1x4x128xf32>
    %298 = vector.shape_cast %297 : vector<1x4x128xf32> to vector<4x128xf32>
    %cst_83 = arith.constant dense<0.000000e+00> : vector<4x128xf32>
    %299 = tpu.matmul %265, %4, %cst_83 {dimension_numbers = #tpu.dot_dimension_numbers<[1], [0], [0], [1], [0, 0, 1, 1], [], []>} : vector<4x128xf32>, vector<128x128xf32>, vector<4x128xf32> -> vector<4x128xf32>
    %300 = arith.addf %298, %299 : vector<4x128xf32>
    %301 = math.tanh %300 : vector<4x128xf32>
    %302 = vector.extract_strided_slice %22 {offsets = [7, 0, 0], sizes = [1, 4, 128], strides = [1, 1, 1]} : vector<16x4x128xf32> to vector<1x4x128xf32>
    %303 = vector.shape_cast %302 : vector<1x4x128xf32> to vector<4x128xf32>
    %304 = arith.mulf %301, %303 : vector<4x128xf32>
    %cst_84 = arith.constant dense<0.000000e+00> : vector<4x128xf32>
    %305 = tpu.matmul %304, %5, %cst_84 {dimension_numbers = #tpu.dot_dimension_numbers<[1], [0], [0], [1], [0, 0, 1, 1], [], []>} : vector<4x128xf32>, vector<128x128xf32>, vector<4x128xf32> -> vector<4x128xf32>
    %306 = vector.extract_strided_slice %2 {offsets = [7, 0, 0], sizes = [1, 4, 128], strides = [1, 1, 1]} : vector<16x4x128xf32> to vector<1x4x128xf32>
    %307 = vector.shape_cast %306 : vector<1x4x128xf32> to vector<4x128xf32>
    %308 = vector.broadcast %7 : vector<1x128xf32> to vector<4x128xf32>
    %309 = arith.mulf %307, %308 : vector<4x128xf32>
    %310 = arith.addf %305, %309 : vector<4x128xf32>
    %cst_85 = arith.constant dense<0.000000e+00> : vector<4xf32>
    %311 = vector.multi_reduction <add>, %310, %cst_85 [1] : vector<4x128xf32> to vector<4xf32>
    %312 = vector.shape_cast %311 : vector<4xf32> to vector<4x1xf32>
    %cst_86 = arith.constant 3.125000e-02 : f32
    %313 = vector.broadcast %cst_86 : f32 to vector<4x1xf32>
    %314 = arith.mulf %312, %313 : vector<4x1xf32>
    %315 = arith.mulf %310, %310 : vector<4x128xf32>
    %cst_87 = arith.constant dense<0.000000e+00> : vector<4xf32>
    %316 = vector.multi_reduction <add>, %315, %cst_87 [1] : vector<4x128xf32> to vector<4xf32>
    %317 = vector.shape_cast %316 : vector<4xf32> to vector<4x1xf32>
    %cst_88 = arith.constant 3.125000e-02 : f32
    %318 = vector.broadcast %cst_88 : f32 to vector<4x1xf32>
    %319 = arith.mulf %317, %318 : vector<4x1xf32>
    %320 = arith.mulf %314, %314 : vector<4x1xf32>
    %321 = arith.subf %319, %320 : vector<4x1xf32>
    %322 = vector.broadcast %314 : vector<4x1xf32> to vector<4x128xf32>
    %323 = arith.subf %310, %322 : vector<4x128xf32>
    %cst_89 = arith.constant 9.99999974E-6 : f32
    %324 = vector.broadcast %cst_89 : f32 to vector<4x1xf32>
    %325 = arith.addf %321, %324 : vector<4x1xf32>
    %326 = math.rsqrt %325 : vector<4x1xf32>
    %327 = vector.broadcast %326 : vector<4x1xf32> to vector<4x128xf32>
    %328 = arith.mulf %323, %327 : vector<4x128xf32>
    %329 = vector.broadcast %8 : vector<1x128xf32> to vector<4x128xf32>
    %330 = arith.mulf %328, %329 : vector<4x128xf32>
    %331 = vector.broadcast %9 : vector<1x128xf32> to vector<4x128xf32>
    %332 = arith.addf %330, %331 : vector<4x128xf32>
    %c7 = arith.constant 7 : index
    %c0_90 = arith.constant 0 : index
    %c0_91 = arith.constant 0 : index
    %333 = vector.load %arg10[%c7, %c0_90, %c0_91] : memref<16x4x128xf32, #tpu.memory_space<vmem>>, vector<1x4x128xf32>
    %334 = vector.shape_cast %333 : vector<1x4x128xf32> to vector<4x128xf32>
    %335 = vector.shape_cast %332 : vector<4x128xf32> to vector<1x4x128xf32>
    tpu.vector_store %arg10[%c7, %c0_90, %c0_91], %335 {strides = array<i32>} : memref<16x4x128xf32, #tpu.memory_space<vmem>>, vector<1x4x128xf32>,
    %336 = vector.extract_strided_slice %13 {offsets = [8, 0, 0], sizes = [1, 4, 128], strides = [1, 1, 1]} : vector<16x4x128xf32> to vector<1x4x128xf32>
    %337 = vector.shape_cast %336 : vector<1x4x128xf32> to vector<4x128xf32>
    %cst_92 = arith.constant dense<0.000000e+00> : vector<4x128xf32>
    %338 = tpu.matmul %304, %4, %cst_92 {dimension_numbers = #tpu.dot_dimension_numbers<[1], [0], [0], [1], [0, 0, 1, 1], [], []>} : vector<4x128xf32>, vector<128x128xf32>, vector<4x128xf32> -> vector<4x128xf32>
    %339 = arith.addf %337, %338 : vector<4x128xf32>
    %340 = math.tanh %339 : vector<4x128xf32>
    %341 = vector.extract_strided_slice %22 {offsets = [8, 0, 0], sizes = [1, 4, 128], strides = [1, 1, 1]} : vector<16x4x128xf32> to vector<1x4x128xf32>
    %342 = vector.shape_cast %341 : vector<1x4x128xf32> to vector<4x128xf32>
    %343 = arith.mulf %340, %342 : vector<4x128xf32>
    %cst_93 = arith.constant dense<0.000000e+00> : vector<4x128xf32>
    %344 = tpu.matmul %343, %5, %cst_93 {dimension_numbers = #tpu.dot_dimension_numbers<[1], [0], [0], [1], [0, 0, 1, 1], [], []>} : vector<4x128xf32>, vector<128x128xf32>, vector<4x128xf32> -> vector<4x128xf32>
    %345 = vector.extract_strided_slice %2 {offsets = [8, 0, 0], sizes = [1, 4, 128], strides = [1, 1, 1]} : vector<16x4x128xf32> to vector<1x4x128xf32>
    %346 = vector.shape_cast %345 : vector<1x4x128xf32> to vector<4x128xf32>
    %347 = vector.broadcast %7 : vector<1x128xf32> to vector<4x128xf32>
    %348 = arith.mulf %346, %347 : vector<4x128xf32>
    %349 = arith.addf %344, %348 : vector<4x128xf32>
    %cst_94 = arith.constant dense<0.000000e+00> : vector<4xf32>
    %350 = vector.multi_reduction <add>, %349, %cst_94 [1] : vector<4x128xf32> to vector<4xf32>
    %351 = vector.shape_cast %350 : vector<4xf32> to vector<4x1xf32>
    %cst_95 = arith.constant 3.125000e-02 : f32
    %352 = vector.broadcast %cst_95 : f32 to vector<4x1xf32>
    %353 = arith.mulf %351, %352 : vector<4x1xf32>
    %354 = arith.mulf %349, %349 : vector<4x128xf32>
    %cst_96 = arith.constant dense<0.000000e+00> : vector<4xf32>
    %355 = vector.multi_reduction <add>, %354, %cst_96 [1] : vector<4x128xf32> to vector<4xf32>
    %356 = vector.shape_cast %355 : vector<4xf32> to vector<4x1xf32>
    %cst_97 = arith.constant 3.125000e-02 : f32
    %357 = vector.broadcast %cst_97 : f32 to vector<4x1xf32>
    %358 = arith.mulf %356, %357 : vector<4x1xf32>
    %359 = arith.mulf %353, %353 : vector<4x1xf32>
    %360 = arith.subf %358, %359 : vector<4x1xf32>
    %361 = vector.broadcast %353 : vector<4x1xf32> to vector<4x128xf32>
    %362 = arith.subf %349, %361 : vector<4x128xf32>
    %cst_98 = arith.constant 9.99999974E-6 : f32
    %363 = vector.broadcast %cst_98 : f32 to vector<4x1xf32>
    %364 = arith.addf %360, %363 : vector<4x1xf32>
    %365 = math.rsqrt %364 : vector<4x1xf32>
    %366 = vector.broadcast %365 : vector<4x1xf32> to vector<4x128xf32>
    %367 = arith.mulf %362, %366 : vector<4x128xf32>
    %368 = vector.broadcast %8 : vector<1x128xf32> to vector<4x128xf32>
    %369 = arith.mulf %367, %368 : vector<4x128xf32>
    %370 = vector.broadcast %9 : vector<1x128xf32> to vector<4x128xf32>
    %371 = arith.addf %369, %370 : vector<4x128xf32>
    %c8 = arith.constant 8 : index
    %c0_99 = arith.constant 0 : index
    %c0_100 = arith.constant 0 : index
    %372 = vector.load %arg10[%c8, %c0_99, %c0_100] : memref<16x4x128xf32, #tpu.memory_space<vmem>>, vector<1x4x128xf32>
    %373 = vector.shape_cast %372 : vector<1x4x128xf32> to vector<4x128xf32>
    %374 = vector.shape_cast %371 : vector<4x128xf32> to vector<1x4x128xf32>
    tpu.vector_store %arg10[%c8, %c0_99, %c0_100], %374 {strides = array<i32>} : memref<16x4x128xf32, #tpu.memory_space<vmem>>, vector<1x4x128xf32>,
    %375 = vector.extract_strided_slice %13 {offsets = [9, 0, 0], sizes = [1, 4, 128], strides = [1, 1, 1]} : vector<16x4x128xf32> to vector<1x4x128xf32>
    %376 = vector.shape_cast %375 : vector<1x4x128xf32> to vector<4x128xf32>
    %cst_101 = arith.constant dense<0.000000e+00> : vector<4x128xf32>
    %377 = tpu.matmul %343, %4, %cst_101 {dimension_numbers = #tpu.dot_dimension_numbers<[1], [0], [0], [1], [0, 0, 1, 1], [], []>} : vector<4x128xf32>, vector<128x128xf32>, vector<4x128xf32> -> vector<4x128xf32>
    %378 = arith.addf %376, %377 : vector<4x128xf32>
    %379 = math.tanh %378 : vector<4x128xf32>
    %380 = vector.extract_strided_slice %22 {offsets = [9, 0, 0], sizes = [1, 4, 128], strides = [1, 1, 1]} : vector<16x4x128xf32> to vector<1x4x128xf32>
    %381 = vector.shape_cast %380 : vector<1x4x128xf32> to vector<4x128xf32>
    %382 = arith.mulf %379, %381 : vector<4x128xf32>
    %cst_102 = arith.constant dense<0.000000e+00> : vector<4x128xf32>
    %383 = tpu.matmul %382, %5, %cst_102 {dimension_numbers = #tpu.dot_dimension_numbers<[1], [0], [0], [1], [0, 0, 1, 1], [], []>} : vector<4x128xf32>, vector<128x128xf32>, vector<4x128xf32> -> vector<4x128xf32>
    %384 = vector.extract_strided_slice %2 {offsets = [9, 0, 0], sizes = [1, 4, 128], strides = [1, 1, 1]} : vector<16x4x128xf32> to vector<1x4x128xf32>
    %385 = vector.shape_cast %384 : vector<1x4x128xf32> to vector<4x128xf32>
    %386 = vector.broadcast %7 : vector<1x128xf32> to vector<4x128xf32>
    %387 = arith.mulf %385, %386 : vector<4x128xf32>
    %388 = arith.addf %383, %387 : vector<4x128xf32>
    %cst_103 = arith.constant dense<0.000000e+00> : vector<4xf32>
    %389 = vector.multi_reduction <add>, %388, %cst_103 [1] : vector<4x128xf32> to vector<4xf32>
    %390 = vector.shape_cast %389 : vector<4xf32> to vector<4x1xf32>
    %cst_104 = arith.constant 3.125000e-02 : f32
    %391 = vector.broadcast %cst_104 : f32 to vector<4x1xf32>
    %392 = arith.mulf %390, %391 : vector<4x1xf32>
    %393 = arith.mulf %388, %388 : vector<4x128xf32>
    %cst_105 = arith.constant dense<0.000000e+00> : vector<4xf32>
    %394 = vector.multi_reduction <add>, %393, %cst_105 [1] : vector<4x128xf32> to vector<4xf32>
    %395 = vector.shape_cast %394 : vector<4xf32> to vector<4x1xf32>
    %cst_106 = arith.constant 3.125000e-02 : f32
    %396 = vector.broadcast %cst_106 : f32 to vector<4x1xf32>
    %397 = arith.mulf %395, %396 : vector<4x1xf32>
    %398 = arith.mulf %392, %392 : vector<4x1xf32>
    %399 = arith.subf %397, %398 : vector<4x1xf32>
    %400 = vector.broadcast %392 : vector<4x1xf32> to vector<4x128xf32>
    %401 = arith.subf %388, %400 : vector<4x128xf32>
    %cst_107 = arith.constant 9.99999974E-6 : f32
    %402 = vector.broadcast %cst_107 : f32 to vector<4x1xf32>
    %403 = arith.addf %399, %402 : vector<4x1xf32>
    %404 = math.rsqrt %403 : vector<4x1xf32>
    %405 = vector.broadcast %404 : vector<4x1xf32> to vector<4x128xf32>
    %406 = arith.mulf %401, %405 : vector<4x128xf32>
    %407 = vector.broadcast %8 : vector<1x128xf32> to vector<4x128xf32>
    %408 = arith.mulf %406, %407 : vector<4x128xf32>
    %409 = vector.broadcast %9 : vector<1x128xf32> to vector<4x128xf32>
    %410 = arith.addf %408, %409 : vector<4x128xf32>
    %c9 = arith.constant 9 : index
    %c0_108 = arith.constant 0 : index
    %c0_109 = arith.constant 0 : index
    %411 = vector.load %arg10[%c9, %c0_108, %c0_109] : memref<16x4x128xf32, #tpu.memory_space<vmem>>, vector<1x4x128xf32>
    %412 = vector.shape_cast %411 : vector<1x4x128xf32> to vector<4x128xf32>
    %413 = vector.shape_cast %410 : vector<4x128xf32> to vector<1x4x128xf32>
    tpu.vector_store %arg10[%c9, %c0_108, %c0_109], %413 {strides = array<i32>} : memref<16x4x128xf32, #tpu.memory_space<vmem>>, vector<1x4x128xf32>,
    %414 = vector.extract_strided_slice %13 {offsets = [10, 0, 0], sizes = [1, 4, 128], strides = [1, 1, 1]} : vector<16x4x128xf32> to vector<1x4x128xf32>
    %415 = vector.shape_cast %414 : vector<1x4x128xf32> to vector<4x128xf32>
    %cst_110 = arith.constant dense<0.000000e+00> : vector<4x128xf32>
    %416 = tpu.matmul %382, %4, %cst_110 {dimension_numbers = #tpu.dot_dimension_numbers<[1], [0], [0], [1], [0, 0, 1, 1], [], []>} : vector<4x128xf32>, vector<128x128xf32>, vector<4x128xf32> -> vector<4x128xf32>
    %417 = arith.addf %415, %416 : vector<4x128xf32>
    %418 = math.tanh %417 : vector<4x128xf32>
    %419 = vector.extract_strided_slice %22 {offsets = [10, 0, 0], sizes = [1, 4, 128], strides = [1, 1, 1]} : vector<16x4x128xf32> to vector<1x4x128xf32>
    %420 = vector.shape_cast %419 : vector<1x4x128xf32> to vector<4x128xf32>
    %421 = arith.mulf %418, %420 : vector<4x128xf32>
    %cst_111 = arith.constant dense<0.000000e+00> : vector<4x128xf32>
    %422 = tpu.matmul %421, %5, %cst_111 {dimension_numbers = #tpu.dot_dimension_numbers<[1], [0], [0], [1], [0, 0, 1, 1], [], []>} : vector<4x128xf32>, vector<128x128xf32>, vector<4x128xf32> -> vector<4x128xf32>
    %423 = vector.extract_strided_slice %2 {offsets = [10, 0, 0], sizes = [1, 4, 128], strides = [1, 1, 1]} : vector<16x4x128xf32> to vector<1x4x128xf32>
    %424 = vector.shape_cast %423 : vector<1x4x128xf32> to vector<4x128xf32>
    %425 = vector.broadcast %7 : vector<1x128xf32> to vector<4x128xf32>
    %426 = arith.mulf %424, %425 : vector<4x128xf32>
    %427 = arith.addf %422, %426 : vector<4x128xf32>
    %cst_112 = arith.constant dense<0.000000e+00> : vector<4xf32>
    %428 = vector.multi_reduction <add>, %427, %cst_112 [1] : vector<4x128xf32> to vector<4xf32>
    %429 = vector.shape_cast %428 : vector<4xf32> to vector<4x1xf32>
    %cst_113 = arith.constant 3.125000e-02 : f32
    %430 = vector.broadcast %cst_113 : f32 to vector<4x1xf32>
    %431 = arith.mulf %429, %430 : vector<4x1xf32>
    %432 = arith.mulf %427, %427 : vector<4x128xf32>
    %cst_114 = arith.constant dense<0.000000e+00> : vector<4xf32>
    %433 = vector.multi_reduction <add>, %432, %cst_114 [1] : vector<4x128xf32> to vector<4xf32>
    %434 = vector.shape_cast %433 : vector<4xf32> to vector<4x1xf32>
    %cst_115 = arith.constant 3.125000e-02 : f32
    %435 = vector.broadcast %cst_115 : f32 to vector<4x1xf32>
    %436 = arith.mulf %434, %435 : vector<4x1xf32>
    %437 = arith.mulf %431, %431 : vector<4x1xf32>
    %438 = arith.subf %436, %437 : vector<4x1xf32>
    %439 = vector.broadcast %431 : vector<4x1xf32> to vector<4x128xf32>
    %440 = arith.subf %427, %439 : vector<4x128xf32>
    %cst_116 = arith.constant 9.99999974E-6 : f32
    %441 = vector.broadcast %cst_116 : f32 to vector<4x1xf32>
    %442 = arith.addf %438, %441 : vector<4x1xf32>
    %443 = math.rsqrt %442 : vector<4x1xf32>
    %444 = vector.broadcast %443 : vector<4x1xf32> to vector<4x128xf32>
    %445 = arith.mulf %440, %444 : vector<4x128xf32>
    %446 = vector.broadcast %8 : vector<1x128xf32> to vector<4x128xf32>
    %447 = arith.mulf %445, %446 : vector<4x128xf32>
    %448 = vector.broadcast %9 : vector<1x128xf32> to vector<4x128xf32>
    %449 = arith.addf %447, %448 : vector<4x128xf32>
    %c10 = arith.constant 10 : index
    %c0_117 = arith.constant 0 : index
    %c0_118 = arith.constant 0 : index
    %450 = vector.load %arg10[%c10, %c0_117, %c0_118] : memref<16x4x128xf32, #tpu.memory_space<vmem>>, vector<1x4x128xf32>
    %451 = vector.shape_cast %450 : vector<1x4x128xf32> to vector<4x128xf32>
    %452 = vector.shape_cast %449 : vector<4x128xf32> to vector<1x4x128xf32>
    tpu.vector_store %arg10[%c10, %c0_117, %c0_118], %452 {strides = array<i32>} : memref<16x4x128xf32, #tpu.memory_space<vmem>>, vector<1x4x128xf32>,
    %453 = vector.extract_strided_slice %13 {offsets = [11, 0, 0], sizes = [1, 4, 128], strides = [1, 1, 1]} : vector<16x4x128xf32> to vector<1x4x128xf32>
    %454 = vector.shape_cast %453 : vector<1x4x128xf32> to vector<4x128xf32>
    %cst_119 = arith.constant dense<0.000000e+00> : vector<4x128xf32>
    %455 = tpu.matmul %421, %4, %cst_119 {dimension_numbers = #tpu.dot_dimension_numbers<[1], [0], [0], [1], [0, 0, 1, 1], [], []>} : vector<4x128xf32>, vector<128x128xf32>, vector<4x128xf32> -> vector<4x128xf32>
    %456 = arith.addf %454, %455 : vector<4x128xf32>
    %457 = math.tanh %456 : vector<4x128xf32>
    %458 = vector.extract_strided_slice %22 {offsets = [11, 0, 0], sizes = [1, 4, 128], strides = [1, 1, 1]} : vector<16x4x128xf32> to vector<1x4x128xf32>
    %459 = vector.shape_cast %458 : vector<1x4x128xf32> to vector<4x128xf32>
    %460 = arith.mulf %457, %459 : vector<4x128xf32>
    %cst_120 = arith.constant dense<0.000000e+00> : vector<4x128xf32>
    %461 = tpu.matmul %460, %5, %cst_120 {dimension_numbers = #tpu.dot_dimension_numbers<[1], [0], [0], [1], [0, 0, 1, 1], [], []>} : vector<4x128xf32>, vector<128x128xf32>, vector<4x128xf32> -> vector<4x128xf32>
    %462 = vector.extract_strided_slice %2 {offsets = [11, 0, 0], sizes = [1, 4, 128], strides = [1, 1, 1]} : vector<16x4x128xf32> to vector<1x4x128xf32>
    %463 = vector.shape_cast %462 : vector<1x4x128xf32> to vector<4x128xf32>
    %464 = vector.broadcast %7 : vector<1x128xf32> to vector<4x128xf32>
    %465 = arith.mulf %463, %464 : vector<4x128xf32>
    %466 = arith.addf %461, %465 : vector<4x128xf32>
    %cst_121 = arith.constant dense<0.000000e+00> : vector<4xf32>
    %467 = vector.multi_reduction <add>, %466, %cst_121 [1] : vector<4x128xf32> to vector<4xf32>
    %468 = vector.shape_cast %467 : vector<4xf32> to vector<4x1xf32>
    %cst_122 = arith.constant 3.125000e-02 : f32
    %469 = vector.broadcast %cst_122 : f32 to vector<4x1xf32>
    %470 = arith.mulf %468, %469 : vector<4x1xf32>
    %471 = arith.mulf %466, %466 : vector<4x128xf32>
    %cst_123 = arith.constant dense<0.000000e+00> : vector<4xf32>
    %472 = vector.multi_reduction <add>, %471, %cst_123 [1] : vector<4x128xf32> to vector<4xf32>
    %473 = vector.shape_cast %472 : vector<4xf32> to vector<4x1xf32>
    %cst_124 = arith.constant 3.125000e-02 : f32
    %474 = vector.broadcast %cst_124 : f32 to vector<4x1xf32>
    %475 = arith.mulf %473, %474 : vector<4x1xf32>
    %476 = arith.mulf %470, %470 : vector<4x1xf32>
    %477 = arith.subf %475, %476 : vector<4x1xf32>
    %478 = vector.broadcast %470 : vector<4x1xf32> to vector<4x128xf32>
    %479 = arith.subf %466, %478 : vector<4x128xf32>
    %cst_125 = arith.constant 9.99999974E-6 : f32
    %480 = vector.broadcast %cst_125 : f32 to vector<4x1xf32>
    %481 = arith.addf %477, %480 : vector<4x1xf32>
    %482 = math.rsqrt %481 : vector<4x1xf32>
    %483 = vector.broadcast %482 : vector<4x1xf32> to vector<4x128xf32>
    %484 = arith.mulf %479, %483 : vector<4x128xf32>
    %485 = vector.broadcast %8 : vector<1x128xf32> to vector<4x128xf32>
    %486 = arith.mulf %484, %485 : vector<4x128xf32>
    %487 = vector.broadcast %9 : vector<1x128xf32> to vector<4x128xf32>
    %488 = arith.addf %486, %487 : vector<4x128xf32>
    %c11 = arith.constant 11 : index
    %c0_126 = arith.constant 0 : index
    %c0_127 = arith.constant 0 : index
    %489 = vector.load %arg10[%c11, %c0_126, %c0_127] : memref<16x4x128xf32, #tpu.memory_space<vmem>>, vector<1x4x128xf32>
    %490 = vector.shape_cast %489 : vector<1x4x128xf32> to vector<4x128xf32>
    %491 = vector.shape_cast %488 : vector<4x128xf32> to vector<1x4x128xf32>
    tpu.vector_store %arg10[%c11, %c0_126, %c0_127], %491 {strides = array<i32>} : memref<16x4x128xf32, #tpu.memory_space<vmem>>, vector<1x4x128xf32>,
    %492 = vector.extract_strided_slice %13 {offsets = [12, 0, 0], sizes = [1, 4, 128], strides = [1, 1, 1]} : vector<16x4x128xf32> to vector<1x4x128xf32>
    %493 = vector.shape_cast %492 : vector<1x4x128xf32> to vector<4x128xf32>
    %cst_128 = arith.constant dense<0.000000e+00> : vector<4x128xf32>
    %494 = tpu.matmul %460, %4, %cst_128 {dimension_numbers = #tpu.dot_dimension_numbers<[1], [0], [0], [1], [0, 0, 1, 1], [], []>} : vector<4x128xf32>, vector<128x128xf32>, vector<4x128xf32> -> vector<4x128xf32>
    %495 = arith.addf %493, %494 : vector<4x128xf32>
    %496 = math.tanh %495 : vector<4x128xf32>
    %497 = vector.extract_strided_slice %22 {offsets = [12, 0, 0], sizes = [1, 4, 128], strides = [1, 1, 1]} : vector<16x4x128xf32> to vector<1x4x128xf32>
    %498 = vector.shape_cast %497 : vector<1x4x128xf32> to vector<4x128xf32>
    %499 = arith.mulf %496, %498 : vector<4x128xf32>
    %cst_129 = arith.constant dense<0.000000e+00> : vector<4x128xf32>
    %500 = tpu.matmul %499, %5, %cst_129 {dimension_numbers = #tpu.dot_dimension_numbers<[1], [0], [0], [1], [0, 0, 1, 1], [], []>} : vector<4x128xf32>, vector<128x128xf32>, vector<4x128xf32> -> vector<4x128xf32>
    %501 = vector.extract_strided_slice %2 {offsets = [12, 0, 0], sizes = [1, 4, 128], strides = [1, 1, 1]} : vector<16x4x128xf32> to vector<1x4x128xf32>
    %502 = vector.shape_cast %501 : vector<1x4x128xf32> to vector<4x128xf32>
    %503 = vector.broadcast %7 : vector<1x128xf32> to vector<4x128xf32>
    %504 = arith.mulf %502, %503 : vector<4x128xf32>
    %505 = arith.addf %500, %504 : vector<4x128xf32>
    %cst_130 = arith.constant dense<0.000000e+00> : vector<4xf32>
    %506 = vector.multi_reduction <add>, %505, %cst_130 [1] : vector<4x128xf32> to vector<4xf32>
    %507 = vector.shape_cast %506 : vector<4xf32> to vector<4x1xf32>
    %cst_131 = arith.constant 3.125000e-02 : f32
    %508 = vector.broadcast %cst_131 : f32 to vector<4x1xf32>
    %509 = arith.mulf %507, %508 : vector<4x1xf32>
    %510 = arith.mulf %505, %505 : vector<4x128xf32>
    %cst_132 = arith.constant dense<0.000000e+00> : vector<4xf32>
    %511 = vector.multi_reduction <add>, %510, %cst_132 [1] : vector<4x128xf32> to vector<4xf32>
    %512 = vector.shape_cast %511 : vector<4xf32> to vector<4x1xf32>
    %cst_133 = arith.constant 3.125000e-02 : f32
    %513 = vector.broadcast %cst_133 : f32 to vector<4x1xf32>
    %514 = arith.mulf %512, %513 : vector<4x1xf32>
    %515 = arith.mulf %509, %509 : vector<4x1xf32>
    %516 = arith.subf %514, %515 : vector<4x1xf32>
    %517 = vector.broadcast %509 : vector<4x1xf32> to vector<4x128xf32>
    %518 = arith.subf %505, %517 : vector<4x128xf32>
    %cst_134 = arith.constant 9.99999974E-6 : f32
    %519 = vector.broadcast %cst_134 : f32 to vector<4x1xf32>
    %520 = arith.addf %516, %519 : vector<4x1xf32>
    %521 = math.rsqrt %520 : vector<4x1xf32>
    %522 = vector.broadcast %521 : vector<4x1xf32> to vector<4x128xf32>
    %523 = arith.mulf %518, %522 : vector<4x128xf32>
    %524 = vector.broadcast %8 : vector<1x128xf32> to vector<4x128xf32>
    %525 = arith.mulf %523, %524 : vector<4x128xf32>
    %526 = vector.broadcast %9 : vector<1x128xf32> to vector<4x128xf32>
    %527 = arith.addf %525, %526 : vector<4x128xf32>
    %c12 = arith.constant 12 : index
    %c0_135 = arith.constant 0 : index
    %c0_136 = arith.constant 0 : index
    %528 = vector.load %arg10[%c12, %c0_135, %c0_136] : memref<16x4x128xf32, #tpu.memory_space<vmem>>, vector<1x4x128xf32>
    %529 = vector.shape_cast %528 : vector<1x4x128xf32> to vector<4x128xf32>
    %530 = vector.shape_cast %527 : vector<4x128xf32> to vector<1x4x128xf32>
    tpu.vector_store %arg10[%c12, %c0_135, %c0_136], %530 {strides = array<i32>} : memref<16x4x128xf32, #tpu.memory_space<vmem>>, vector<1x4x128xf32>,
    %531 = vector.extract_strided_slice %13 {offsets = [13, 0, 0], sizes = [1, 4, 128], strides = [1, 1, 1]} : vector<16x4x128xf32> to vector<1x4x128xf32>
    %532 = vector.shape_cast %531 : vector<1x4x128xf32> to vector<4x128xf32>
    %cst_137 = arith.constant dense<0.000000e+00> : vector<4x128xf32>
    %533 = tpu.matmul %499, %4, %cst_137 {dimension_numbers = #tpu.dot_dimension_numbers<[1], [0], [0], [1], [0, 0, 1, 1], [], []>} : vector<4x128xf32>, vector<128x128xf32>, vector<4x128xf32> -> vector<4x128xf32>
    %534 = arith.addf %532, %533 : vector<4x128xf32>
    %535 = math.tanh %534 : vector<4x128xf32>
    %536 = vector.extract_strided_slice %22 {offsets = [13, 0, 0], sizes = [1, 4, 128], strides = [1, 1, 1]} : vector<16x4x128xf32> to vector<1x4x128xf32>
    %537 = vector.shape_cast %536 : vector<1x4x128xf32> to vector<4x128xf32>
    %538 = arith.mulf %535, %537 : vector<4x128xf32>
    %cst_138 = arith.constant dense<0.000000e+00> : vector<4x128xf32>
    %539 = tpu.matmul %538, %5, %cst_138 {dimension_numbers = #tpu.dot_dimension_numbers<[1], [0], [0], [1], [0, 0, 1, 1], [], []>} : vector<4x128xf32>, vector<128x128xf32>, vector<4x128xf32> -> vector<4x128xf32>
    %540 = vector.extract_strided_slice %2 {offsets = [13, 0, 0], sizes = [1, 4, 128], strides = [1, 1, 1]} : vector<16x4x128xf32> to vector<1x4x128xf32>
    %541 = vector.shape_cast %540 : vector<1x4x128xf32> to vector<4x128xf32>
    %542 = vector.broadcast %7 : vector<1x128xf32> to vector<4x128xf32>
    %543 = arith.mulf %541, %542 : vector<4x128xf32>
    %544 = arith.addf %539, %543 : vector<4x128xf32>
    %cst_139 = arith.constant dense<0.000000e+00> : vector<4xf32>
    %545 = vector.multi_reduction <add>, %544, %cst_139 [1] : vector<4x128xf32> to vector<4xf32>
    %546 = vector.shape_cast %545 : vector<4xf32> to vector<4x1xf32>
    %cst_140 = arith.constant 3.125000e-02 : f32
    %547 = vector.broadcast %cst_140 : f32 to vector<4x1xf32>
    %548 = arith.mulf %546, %547 : vector<4x1xf32>
    %549 = arith.mulf %544, %544 : vector<4x128xf32>
    %cst_141 = arith.constant dense<0.000000e+00> : vector<4xf32>
    %550 = vector.multi_reduction <add>, %549, %cst_141 [1] : vector<4x128xf32> to vector<4xf32>
    %551 = vector.shape_cast %550 : vector<4xf32> to vector<4x1xf32>
    %cst_142 = arith.constant 3.125000e-02 : f32
    %552 = vector.broadcast %cst_142 : f32 to vector<4x1xf32>
    %553 = arith.mulf %551, %552 : vector<4x1xf32>
    %554 = arith.mulf %548, %548 : vector<4x1xf32>
    %555 = arith.subf %553, %554 : vector<4x1xf32>
    %556 = vector.broadcast %548 : vector<4x1xf32> to vector<4x128xf32>
    %557 = arith.subf %544, %556 : vector<4x128xf32>
    %cst_143 = arith.constant 9.99999974E-6 : f32
    %558 = vector.broadcast %cst_143 : f32 to vector<4x1xf32>
    %559 = arith.addf %555, %558 : vector<4x1xf32>
    %560 = math.rsqrt %559 : vector<4x1xf32>
    %561 = vector.broadcast %560 : vector<4x1xf32> to vector<4x128xf32>
    %562 = arith.mulf %557, %561 : vector<4x128xf32>
    %563 = vector.broadcast %8 : vector<1x128xf32> to vector<4x128xf32>
    %564 = arith.mulf %562, %563 : vector<4x128xf32>
    %565 = vector.broadcast %9 : vector<1x128xf32> to vector<4x128xf32>
    %566 = arith.addf %564, %565 : vector<4x128xf32>
    %c13 = arith.constant 13 : index
    %c0_144 = arith.constant 0 : index
    %c0_145 = arith.constant 0 : index
    %567 = vector.load %arg10[%c13, %c0_144, %c0_145] : memref<16x4x128xf32, #tpu.memory_space<vmem>>, vector<1x4x128xf32>
    %568 = vector.shape_cast %567 : vector<1x4x128xf32> to vector<4x128xf32>
    %569 = vector.shape_cast %566 : vector<4x128xf32> to vector<1x4x128xf32>
    tpu.vector_store %arg10[%c13, %c0_144, %c0_145], %569 {strides = array<i32>} : memref<16x4x128xf32, #tpu.memory_space<vmem>>, vector<1x4x128xf32>,
    %570 = vector.extract_strided_slice %13 {offsets = [14, 0, 0], sizes = [1, 4, 128], strides = [1, 1, 1]} : vector<16x4x128xf32> to vector<1x4x128xf32>
    %571 = vector.shape_cast %570 : vector<1x4x128xf32> to vector<4x128xf32>
    %cst_146 = arith.constant dense<0.000000e+00> : vector<4x128xf32>
    %572 = tpu.matmul %538, %4, %cst_146 {dimension_numbers = #tpu.dot_dimension_numbers<[1], [0], [0], [1], [0, 0, 1, 1], [], []>} : vector<4x128xf32>, vector<128x128xf32>, vector<4x128xf32> -> vector<4x128xf32>
    %573 = arith.addf %571, %572 : vector<4x128xf32>
    %574 = math.tanh %573 : vector<4x128xf32>
    %575 = vector.extract_strided_slice %22 {offsets = [14, 0, 0], sizes = [1, 4, 128], strides = [1, 1, 1]} : vector<16x4x128xf32> to vector<1x4x128xf32>
    %576 = vector.shape_cast %575 : vector<1x4x128xf32> to vector<4x128xf32>
    %577 = arith.mulf %574, %576 : vector<4x128xf32>
    %cst_147 = arith.constant dense<0.000000e+00> : vector<4x128xf32>
    %578 = tpu.matmul %577, %5, %cst_147 {dimension_numbers = #tpu.dot_dimension_numbers<[1], [0], [0], [1], [0, 0, 1, 1], [], []>} : vector<4x128xf32>, vector<128x128xf32>, vector<4x128xf32> -> vector<4x128xf32>
    %579 = vector.extract_strided_slice %2 {offsets = [14, 0, 0], sizes = [1, 4, 128], strides = [1, 1, 1]} : vector<16x4x128xf32> to vector<1x4x128xf32>
    %580 = vector.shape_cast %579 : vector<1x4x128xf32> to vector<4x128xf32>
    %581 = vector.broadcast %7 : vector<1x128xf32> to vector<4x128xf32>
    %582 = arith.mulf %580, %581 : vector<4x128xf32>
    %583 = arith.addf %578, %582 : vector<4x128xf32>
    %cst_148 = arith.constant dense<0.000000e+00> : vector<4xf32>
    %584 = vector.multi_reduction <add>, %583, %cst_148 [1] : vector<4x128xf32> to vector<4xf32>
    %585 = vector.shape_cast %584 : vector<4xf32> to vector<4x1xf32>
    %cst_149 = arith.constant 3.125000e-02 : f32
    %586 = vector.broadcast %cst_149 : f32 to vector<4x1xf32>
    %587 = arith.mulf %585, %586 : vector<4x1xf32>
    %588 = arith.mulf %583, %583 : vector<4x128xf32>
    %cst_150 = arith.constant dense<0.000000e+00> : vector<4xf32>
    %589 = vector.multi_reduction <add>, %588, %cst_150 [1] : vector<4x128xf32> to vector<4xf32>
    %590 = vector.shape_cast %589 : vector<4xf32> to vector<4x1xf32>
    %cst_151 = arith.constant 3.125000e-02 : f32
    %591 = vector.broadcast %cst_151 : f32 to vector<4x1xf32>
    %592 = arith.mulf %590, %591 : vector<4x1xf32>
    %593 = arith.mulf %587, %587 : vector<4x1xf32>
    %594 = arith.subf %592, %593 : vector<4x1xf32>
    %595 = vector.broadcast %587 : vector<4x1xf32> to vector<4x128xf32>
    %596 = arith.subf %583, %595 : vector<4x128xf32>
    %cst_152 = arith.constant 9.99999974E-6 : f32
    %597 = vector.broadcast %cst_152 : f32 to vector<4x1xf32>
    %598 = arith.addf %594, %597 : vector<4x1xf32>
    %599 = math.rsqrt %598 : vector<4x1xf32>
    %600 = vector.broadcast %599 : vector<4x1xf32> to vector<4x128xf32>
    %601 = arith.mulf %596, %600 : vector<4x128xf32>
    %602 = vector.broadcast %8 : vector<1x128xf32> to vector<4x128xf32>
    %603 = arith.mulf %601, %602 : vector<4x128xf32>
    %604 = vector.broadcast %9 : vector<1x128xf32> to vector<4x128xf32>
    %605 = arith.addf %603, %604 : vector<4x128xf32>
    %c14 = arith.constant 14 : index
    %c0_153 = arith.constant 0 : index
    %c0_154 = arith.constant 0 : index
    %606 = vector.load %arg10[%c14, %c0_153, %c0_154] : memref<16x4x128xf32, #tpu.memory_space<vmem>>, vector<1x4x128xf32>
    %607 = vector.shape_cast %606 : vector<1x4x128xf32> to vector<4x128xf32>
    %608 = vector.shape_cast %605 : vector<4x128xf32> to vector<1x4x128xf32>
    tpu.vector_store %arg10[%c14, %c0_153, %c0_154], %608 {strides = array<i32>} : memref<16x4x128xf32, #tpu.memory_space<vmem>>, vector<1x4x128xf32>,
    %609 = vector.extract_strided_slice %13 {offsets = [15, 0, 0], sizes = [1, 4, 128], strides = [1, 1, 1]} : vector<16x4x128xf32> to vector<1x4x128xf32>
    %610 = vector.shape_cast %609 : vector<1x4x128xf32> to vector<4x128xf32>
    %cst_155 = arith.constant dense<0.000000e+00> : vector<4x128xf32>
    %611 = tpu.matmul %577, %4, %cst_155 {dimension_numbers = #tpu.dot_dimension_numbers<[1], [0], [0], [1], [0, 0, 1, 1], [], []>} : vector<4x128xf32>, vector<128x128xf32>, vector<4x128xf32> -> vector<4x128xf32>
    %612 = arith.addf %610, %611 : vector<4x128xf32>
    %613 = math.tanh %612 : vector<4x128xf32>
    %614 = vector.extract_strided_slice %22 {offsets = [15, 0, 0], sizes = [1, 4, 128], strides = [1, 1, 1]} : vector<16x4x128xf32> to vector<1x4x128xf32>
    %615 = vector.shape_cast %614 : vector<1x4x128xf32> to vector<4x128xf32>
    %616 = arith.mulf %613, %615 : vector<4x128xf32>
    %cst_156 = arith.constant dense<0.000000e+00> : vector<4x128xf32>
    %617 = tpu.matmul %616, %5, %cst_156 {dimension_numbers = #tpu.dot_dimension_numbers<[1], [0], [0], [1], [0, 0, 1, 1], [], []>} : vector<4x128xf32>, vector<128x128xf32>, vector<4x128xf32> -> vector<4x128xf32>
    %618 = vector.extract_strided_slice %2 {offsets = [15, 0, 0], sizes = [1, 4, 128], strides = [1, 1, 1]} : vector<16x4x128xf32> to vector<1x4x128xf32>
    %619 = vector.shape_cast %618 : vector<1x4x128xf32> to vector<4x128xf32>
    %620 = vector.broadcast %7 : vector<1x128xf32> to vector<4x128xf32>
    %621 = arith.mulf %619, %620 : vector<4x128xf32>
    %622 = arith.addf %617, %621 : vector<4x128xf32>
    %cst_157 = arith.constant dense<0.000000e+00> : vector<4xf32>
    %623 = vector.multi_reduction <add>, %622, %cst_157 [1] : vector<4x128xf32> to vector<4xf32>
    %624 = vector.shape_cast %623 : vector<4xf32> to vector<4x1xf32>
    %cst_158 = arith.constant 3.125000e-02 : f32
    %625 = vector.broadcast %cst_158 : f32 to vector<4x1xf32>
    %626 = arith.mulf %624, %625 : vector<4x1xf32>
    %627 = arith.mulf %622, %622 : vector<4x128xf32>
    %cst_159 = arith.constant dense<0.000000e+00> : vector<4xf32>
    %628 = vector.multi_reduction <add>, %627, %cst_159 [1] : vector<4x128xf32> to vector<4xf32>
    %629 = vector.shape_cast %628 : vector<4xf32> to vector<4x1xf32>
    %cst_160 = arith.constant 3.125000e-02 : f32
    %630 = vector.broadcast %cst_160 : f32 to vector<4x1xf32>
    %631 = arith.mulf %629, %630 : vector<4x1xf32>
    %632 = arith.mulf %626, %626 : vector<4x1xf32>
    %633 = arith.subf %631, %632 : vector<4x1xf32>
    %634 = vector.broadcast %626 : vector<4x1xf32> to vector<4x128xf32>
    %635 = arith.subf %622, %634 : vector<4x128xf32>
    %cst_161 = arith.constant 9.99999974E-6 : f32
    %636 = vector.broadcast %cst_161 : f32 to vector<4x1xf32>
    %637 = arith.addf %633, %636 : vector<4x1xf32>
    %638 = math.rsqrt %637 : vector<4x1xf32>
    %639 = vector.broadcast %638 : vector<4x1xf32> to vector<4x128xf32>
    %640 = arith.mulf %635, %639 : vector<4x128xf32>
    %641 = vector.broadcast %8 : vector<1x128xf32> to vector<4x128xf32>
    %642 = arith.mulf %640, %641 : vector<4x128xf32>
    %643 = vector.broadcast %9 : vector<1x128xf32> to vector<4x128xf32>
    %644 = arith.addf %642, %643 : vector<4x128xf32>
    %c15 = arith.constant 15 : index
    %c0_162 = arith.constant 0 : index
    %c0_163 = arith.constant 0 : index
    %645 = vector.load %arg10[%c15, %c0_162, %c0_163] : memref<16x4x128xf32, #tpu.memory_space<vmem>>, vector<1x4x128xf32>
    %646 = vector.shape_cast %645 : vector<1x4x128xf32> to vector<4x128xf32>
    %647 = vector.shape_cast %644 : vector<4x128xf32> to vector<1x4x128xf32>
    tpu.vector_store %arg10[%c15, %c0_162, %c0_163], %647 {strides = array<i32>} : memref<16x4x128xf32, #tpu.memory_space<vmem>>, vector<1x4x128xf32>,
    %c0_164 = arith.constant 0 : index
    %c0_165 = arith.constant 0 : index
    %c0_166 = arith.constant 0 : index
    %648 = vector.load %arg10[%c0_164, %c0_165, %c0_166] : memref<16x4x128xf32, #tpu.memory_space<vmem>>, vector<16x2x128xf32>
    %c0_167 = arith.constant 0 : index
    %c0_168 = arith.constant 0 : index
    %c0_169 = arith.constant 0 : index
    %c0_170 = arith.constant 0 : index
    %649 = vector.load %arg9[%c0_167, %c0_168, %c0_169, %c0_170] : memref<2x16x2x128xf32, #tpu.memory_space<vmem>>, vector<1x16x2x128xf32>
    %650 = vector.shape_cast %649 : vector<1x16x2x128xf32> to vector<16x2x128xf32>
    %651 = vector.shape_cast %648 : vector<16x2x128xf32> to vector<1x16x2x128xf32>
    tpu.vector_store %arg9[%c0_167, %c0_168, %c0_169, %c0_170], %651 {strides = array<i32>} : memref<2x16x2x128xf32, #tpu.memory_space<vmem>>, vector<1x16x2x128xf32>,
    %c0_171 = arith.constant 0 : index
    %c2_172 = arith.constant 2 : index
    %c0_173 = arith.constant 0 : index
    %652 = vector.load %arg10[%c0_171, %c2_172, %c0_173] : memref<16x4x128xf32, #tpu.memory_space<vmem>>, vector<16x2x128xf32>
    %c1_174 = arith.constant 1 : index
    %c0_175 = arith.constant 0 : index
    %c0_176 = arith.constant 0 : index
    %c0_177 = arith.constant 0 : index
    %653 = vector.load %arg9[%c1_174, %c0_175, %c0_176, %c0_177] : memref<2x16x2x128xf32, #tpu.memory_space<vmem>>, vector<1x16x2x128xf32>
    %654 = vector.shape_cast %653 : vector<1x16x2x128xf32> to vector<16x2x128xf32>
    %655 = vector.shape_cast %652 : vector<16x2x128xf32> to vector<1x16x2x128xf32>
    tpu.vector_store %arg9[%c1_174, %c0_175, %c0_176, %c0_177], %655 {strides = array<i32>} : memref<2x16x2x128xf32, #tpu.memory_space<vmem>>, vector<1x16x2x128xf32>,
    return
  }
  func.func @transform_0(%arg0: i32) -> (i32, i32, i32, i32) {
    %c0_i32 = arith.constant 0 : i32
    %c0_i32_0 = arith.constant 0 : i32
    %c0_i32_1 = arith.constant 0 : i32
    %c0_i32_2 = arith.constant 0 : i32
    return %arg0, %c0_i32, %c0_i32_0, %c0_i32_1 : i32, i32, i32, i32
  }
  func.func @transform_1(%arg0: i32) -> (i32, i32) {
    %c0_i32 = arith.constant 0 : i32
    %c0_i32_0 = arith.constant 0 : i32
    %c0_i32_1 = arith.constant 0 : i32
    return %c0_i32, %c0_i32_0 : i32, i32
  }
  func.func @transform_2(%arg0: i32) -> (i32, i32) {
    %c0_i32 = arith.constant 0 : i32
    %c0_i32_0 = arith.constant 0 : i32
    %c0_i32_1 = arith.constant 0 : i32
    return %c0_i32, %c0_i32_0 : i32, i32
  }
  func.func @transform_3(%arg0: i32) -> (i32, i32) {
    %c0_i32 = arith.constant 0 : i32
    %c0_i32_0 = arith.constant 0 : i32
    %c0_i32_1 = arith.constant 0 : i32
    return %c0_i32, %c0_i32_0 : i32, i32
  }
  func.func @transform_4(%arg0: i32) -> (i32, i32) {
    %c0_i32 = arith.constant 0 : i32
    %c0_i32_0 = arith.constant 0 : i32
    %c0_i32_1 = arith.constant 0 : i32
    return %c0_i32, %c0_i32_0 : i32, i32
  }
  func.func @transform_5(%arg0: i32) -> (i32, i32) {
    %c0_i32 = arith.constant 0 : i32
    %c0_i32_0 = arith.constant 0 : i32
    %c0_i32_1 = arith.constant 0 : i32
    return %c0_i32, %c0_i32_0 : i32, i32
  }
  func.func @transform_6(%arg0: i32) -> (i32, i32) {
    %c0_i32 = arith.constant 0 : i32
    %c0_i32_0 = arith.constant 0 : i32
    %c0_i32_1 = arith.constant 0 : i32
    return %c0_i32, %c0_i32_0 : i32, i32
  }
  func.func @transform_7(%arg0: i32) -> (i32, i32) {
    %c0_i32 = arith.constant 0 : i32
    %c0_i32_0 = arith.constant 0 : i32
    %c0_i32_1 = arith.constant 0 : i32
    return %c0_i32, %c0_i32_0 : i32, i32
  }
  func.func @transform_8(%arg0: i32) -> (i32, i32, i32, i32) {
    %c0_i32 = arith.constant 0 : i32
    %c0_i32_0 = arith.constant 0 : i32
    %c0_i32_1 = arith.constant 0 : i32
    %c0_i32_2 = arith.constant 0 : i32
    return %arg0, %c0_i32, %c0_i32_0, %c0_i32_1 : i32, i32, i32, i32
  }
}

</mosaic_0001>

<bundles_post_ra>
// kernel: tpu_custom_call.1
= control target key start
LH: loop header
LB: loop body
LE: loop exit
PB: predicated region body
PF: predicated region fallthrough
CT: control target
= control target key end

     0   :  { %s8249_s0 = inlined_call_operand.hbm [shape: f32[4,16,2,128], index: 0, kind: input, shape index: {}]   ;;  %s8250_s1 = inlined_call_operand.hbm [shape: f32[128,256], index: 1, kind: input, shape index: {}]   ;;  %s8251_s2 = inlined_call_operand.hbm [shape: f32[128,128], index: 2, kind: input, shape index: {}]   ;;  %s8252_s3 = inlined_call_operand.hbm [shape: f32[128,128], index: 3, kind: input, shape index: {}]   ;;  %s8253_s4 = inlined_call_operand.vmem [shape: f32[1,128], index: 4, kind: input, shape index: {}]   ;;  %s8254_s5 = inlined_call_operand.vmem [shape: f32[1,128], index: 5, kind: input, shape index: {}]   ;;  %s8255_s6 = inlined_call_operand.vmem [shape: f32[1,128], index: 6, kind: input, shape index: {}]   ;;  %s8256_s7 = inlined_call_operand.vmem [shape: f32[1,128], index: 7, kind: input, shape index: {}]   ;;  %s8257_s8 = inlined_call_operand.hbm [shape: f32[4,16,2,128], index: 8, kind: output, shape index: {}]  }
   0x1   :  { %8263 = sst [smem:[#allocation18_spill]] %s8250_s1 }
   0x2   :  { %13 = vsyncpa [#allocation4], 0 }
   0x3   :  { %15 = vsyncpa [#allocation4 + $0x1], 0 }
   0x4   :  { %16 = vsyncpa [#allocation7], 0 }
   0x5   :  { %17 = vsyncpa [#allocation10], 0 }
   0x6   :  { %18 = vsyncpa [#allocation5], 0 }
   0x7   :  { %20 = vsyncpa [#allocation5 + $0x1], 0  ;;  %s6992_s27 = smov 0   ;;  %s6994_s28 = smov 0  }
   0x8   :  { %s6996_s29 = smov 0   ;;  %s6998_s30 = smov 0  }
   0x9 LB: > { %8264 = sst [smem:[#allocation16_spill]] %s6916_s27  ;;  %s7013_s9 = sadd.s32 4294967295, %s6928_s30   ;;  %s6928_s30 = sphi %s6998_s30, %s8288_s30   ;;  %s6924_s29 = sphi %s6996_s29, %s8287_s29   ;;  %s6920_s28 = sphi %s6994_s28, %s8286_s28   ;;  %s6916_s27 = sphi %s6992_s27, %s8285_s27  }
   0xa   : > { %s3967_s10 = sadd.s32 4294967294, %s6928_s30   ;;  %p46_p0 = scmp.ne.s32.totalorder %s6920_s28, %s6916_s27 }
   0xb   : > { %p8258_p1 = scmp.eq.s32.totalorder %s7013_s9, 0  ;;  %p223_p3 = scmp.eq.s32.totalorder %s3967_s10, 1 }
   0xc   : > { %p3968_p5 = scmp.ge.s32.totalorder %s6928_s30, 1  ;;  %p230_p7 = scmp.lt.s32.totalorder %s6928_s30, 3 }
   0xd   : > { %p7022_p4 = por %p8258_p1, %p46_p0  ;;  %p7027_p6 = por %p223_p3, %p46_p0 }
   0xe   : > { %p7032_p8 = pnand %p3968_p5, %p230_p7  ;;  %s6930_s14 = smov [#allocation6]  }
   0xf   : > { %s8265_s11 = scalar_select %p7022_p4, 1, 0 }
  0x10   : > { %s8266_s12 = scalar_select %p7027_p6, 1, 0 }
  0x11   : > { %s8268_s13 = scalar_select %p7032_p8, 1, 0 }
  0x12   : > { %8267 = sst [smem:[#allocation17_spill]] %s8266_s12  ;;  %s242_s15 = sshll.u32 %s6930_s14, 4  ;;  %s7036_s15 = int_to_ptr.vmem [resolvable:$true] %s242_s15 }
  0x13   : > { %p6509_p9 = pneg %p7032_p8  ;;  %s6931_s17 = smov [#allocation8]  }
  0x14   : > { %s255_s18 = sshll.u32 %s6931_s17, 4  ;;  %s8270_s1 = sld [smem:[#allocation18_spill]]  ;;  %s7047_s18 = int_to_ptr.vmem [resolvable:$true] %s255_s18 }
  0x15   : > { %p7043_p11 = pnand %p6509_p9, %p8258_p1 }
  0x17   : > { %p7057_p13 = pneg %p7043_p11 }
  0x1a   : > { %s6740_s21 = scalar_lea.hbm %s8270_s1, 4096 }
  0x1b   : > { %p6741_p12 = scmp.ne.s32.totalorder %s8270_s1, %s6740_s21  ;;  %p6747_p5 = scmp.lt.u32.totalorder %s6740_s21, %s8270_s1 }
  0x1d   : > { %p6743_p0 = pnand %p7057_p13, %p6741_p12 }
  0x1f   : > { %p6744_p3 = pneg %p6743_p0 }
  0x21   : > { %p6749_p7 = pnand %p6747_p5, %p6744_p3 }
  0x23   : > { %6752 = shalt.err (!%p6749_p7)
}
  0x24   : > { %s6753_s10 = scalar_lea.vmem %s7036_s15, 4096  ;;  %p6761_p2 = scmp.lt.s32.totalorder %s7036_s15, %s7036_s15 }
  0x25   : > { %p6754_p9 = scmp.ne.s32.totalorder %s7036_s15, %s6753_s10  ;;  %p6762_p6 = scmp.lt.s32.totalorder %s6753_s10, %s6753_s10 }
  0x27   : > { %p6756_p10 = pnand %p6754_p9, %p7057_p13  ;;  %p6763_p12 = por %p6762_p6, %p6761_p2 }
  0x29   : > { %p6757_p1 = pneg %p6756_p10 }
  0x2b   : > { %p6764_p0 = pnand %p6763_p12, %p6757_p1 }
  0x2d   : > { %6767 = shalt.err (!%p6764_p0)
}
  0x2e   : > { %s6932_s14 = smov 256   ;;  %s6933_s17 = smov 16  }
  0x2f   : > { %6512 = dma.hbm_to_vmem [thread:$0]  (!%p7043_p11), %s8270_s1, 4096, %s7036_s15, [#allocation7], %s6932_s14, %s6932_s14, %s6933_s17  }
  0x30   : > { %s6768_s23 = scalar_lea.hbm %s8251_s2, 2048 }
  0x31   : > { %p6769_p2 = scmp.ne.s32.totalorder %s8251_s2, %s6768_s23  ;;  %p6775_p10 = scmp.lt.u32.totalorder %s6768_s23, %s8251_s2 }
  0x33   : > { %p6771_p1 = pnand %p6769_p2, %p7057_p13 }
  0x35   : > { %p6772_p6 = pneg %p6771_p1 }
  0x37   : > { %p6777_p3 = pnand %p6775_p10, %p6772_p6 }
  0x39   : > { %6780 = shalt.err (!%p6777_p3)
}
  0x3a   : > { %s6781_s15 = scalar_lea.vmem %s7047_s18, 2048  ;;  %p6789_p12 = scmp.lt.s32.totalorder %s7047_s18, %s7047_s18 }
  0x3b   : > { %p6782_p5 = scmp.ne.s32.totalorder %s7047_s18, %s6781_s15  ;;  %p6790_p0 = scmp.lt.s32.totalorder %s6781_s15, %s6781_s15 }
  0x3d   : > { %p6784_p7 = pnand %p6782_p5, %p7057_p13  ;;  %p6791_p2 = por %p6790_p0, %p6789_p12 }
  0x3f   : > { %p6785_p9 = pneg %p6784_p7 }
  0x41   : > { %p6792_p1 = pnand %p6791_p2, %p6785_p9 }
  0x43   : > { %6795 = shalt.err (!%p6792_p1)
}
  0x44   : > { %s6934_s14 = smov 128   ;;  %s6935_s12 = smov 8  }
  0x45   : > { %6515 = dma.hbm_to_vmem [thread:$0]  (!%p7043_p11), %s8251_s2, 2048, %s7047_s18, [#allocation7], %s6934_s14, %s6934_s14, %s6935_s12  }
  0x46   : > { %s6936_s20 = smov [#allocation9]   ;;  %s7102_s22 = sadd.s32 1, %s6928_s30  }
  0x47   : > { %s268_s21 = sshll.u32 %s6936_s20, 4  ;;  %s6796_s26 = scalar_lea.hbm %s8252_s3, 2048  ;;  %s269_s21 = int_to_ptr.vmem [resolvable:$true] %s268_s21 }
  0x48   : > { %p6797_p6 = scmp.ne.s32.totalorder %s8252_s3, %s6796_s26  ;;  %p6803_p5 = scmp.lt.u32.totalorder %s6796_s26, %s8252_s3 }
  0x4a   : > { %p6799_p10 = pnand %p6797_p6, %p7057_p13 }
  0x4c   : > { %p6800_p3 = pneg %p6799_p10 }
  0x4e   : > { %p6805_p7 = pnand %p6803_p5, %p6800_p3 }
  0x50   : > { %6808 = shalt.err (!%p6805_p7)
}
  0x51   : > { %s6809_s18 = scalar_lea.vmem %s269_s21, 2048  ;;  %p6817_p2 = scmp.lt.s32.totalorder %s269_s21, %s269_s21 }
  0x52   : > { %p6810_p9 = scmp.ne.s32.totalorder %s269_s21, %s6809_s18  ;;  %p6818_p1 = scmp.lt.s32.totalorder %s6809_s18, %s6809_s18 }
  0x54   : > { %p6812_p12 = pnand %p6810_p9, %p7057_p13  ;;  %p6819_p4 = por %p6818_p1, %p6817_p2 }
  0x56   : > { %p6813_p0 = pneg %p6812_p12 }
  0x58   : > { %p6820_p8 = pnand %p6819_p4, %p6813_p0 }
  0x5a   : > { %6823 = shalt.err (!%p6820_p8)
}
  0x5b   : > { %6518 = dma.hbm_to_vmem [thread:$0]  (!%p7043_p11), %s8252_s3, 2048, %s269_s21, [#allocation10], %s6934_s14, %s6934_s14, %s6935_s12  }
  0x5c   : > { %s30_s1 = ssub.s32 %s6928_s30, %s7102_s22  ;;  %s33_s27 = sadd.s32 1, %s6924_s29 }
  0x5d   : > { %p31_p4 = scmp.eq.s32.totalorder %s30_s1, 0  ;;  %p40_p8 = scmp.ne.s32.totalorder %s6924_s29, %s6920_s28 }
  0x5e   : > { %p41_p13 = scmp.eq.s32.totalorder %s6928_s30, 0  ;;  %p6530_p6 = scmp.lt.s32.totalorder %s6928_s30, 2 }
  0x5f   : > { %s7130_s16 = scalar_select %p31_p4, %s6924_s29, %s33_s27  }
  0x60   : > { %p42_p10 = por %p41_p13, %p40_p8  ;;  %p8272_p3 = scmp.eq.s32.totalorder %s7013_s9, 1 }
  0x61   : > { %s294_s20 = sand.u32 1, %s6924_s29   ;;  %s4026_s23 = sshll.u32 %s6928_s30, 10 }
  0x62   : > { %p7134_p5 = por %p8272_p3, %p40_p8  ;;  %s3973_s25 = sshll.u32 %s294_s20, 6 }
  0x63   : > { %s7143_s14 = scalar_lea.hbm %s8249_s0, %s4026_s23  ;;  %s298_s12 = scalar_lea.vmem [#allocation3], %s3973_s25 }
  0x64   : > { %s306_s21 = sshll.u32 %s298_s12, 4  ;;  %p7145_p11 = pnand %p6530_p6, %p42_p10  ;;  %s7149_s21 = int_to_ptr.vmem [resolvable:$true] %s306_s21 }
  0x65   : > { %s7151_s18 = scalar_lea.sflag [#allocation4], %s294_s20  ;;  %s6824_s17 = scalar_lea.hbm %s7143_s14, 1024 }
  0x66   : > { %p6825_p7 = scmp.ne.s32.totalorder %s7143_s14, %s6824_s17  ;;  %p6826_p9 = pneg %p7145_p11 }
  0x67   : > { %s6829_s27 = scalar_lea.hbm %s8249_s0, 2048  ;;  %p6830_p2 = scmp.lt.u32.totalorder %s7143_s14, %s8249_s0 }
  0x68   : > { %p6827_p12 = pnand %p6826_p9, %p6825_p7  ;;  %p6831_p1 = scmp.lt.u32.totalorder %s6829_s27, %s6824_s17 }
  0x69   : > { %p6833_p8 = scmp.lt.u32.totalorder %s6824_s17, %s7143_s14 }
  0x6a   : > { %p6828_p0 = pneg %p6827_p12  ;;  %p6832_p4 = por %p6831_p1, %p6830_p2 }
  0x6c   : > { %p6834_p13 = por %p6833_p8, %p6832_p4 }
  0x6e   : > { %p6835_p6 = pnand %p6834_p13, %p6828_p0 }
  0x70   : > { %6838 = shalt.err (!%p6835_p6)
}
  0x71   : > { %s6839_s20 = scalar_lea.vmem %s7149_s21, 1024  ;;  %s6937_s26 = smov [#allocation3]  }
  0x72   : > { %p6840_p10 = scmp.ne.s32.totalorder %s7149_s21, %s6839_s20  ;;  %s6844_s10 = sshll.u32 %s6937_s26, 4  ;;  %s6845_s10 = int_to_ptr.vmem [resolvable:$false] %s6844_s10 }
  0x73   : > { %s6846_s12 = scalar_lea.vmem %s6845_s10, 2048  ;;  %p6847_p12 = scmp.lt.s32.totalorder %s7149_s21, %s6845_s10 }
  0x74   : > { %p6842_p3 = pnand %p6840_p10, %p6826_p9  ;;  %p6848_p2 = scmp.lt.s32.totalorder %s6846_s12, %s6839_s20 }
  0x76   : > { %p6843_p7 = pneg %p6842_p3  ;;  %p6849_p1 = por %p6848_p2, %p6847_p12 }
  0x78   : > { %p6850_p4 = pnand %p6849_p1, %p6843_p7 }
  0x7a   : > { %6853 = shalt.err (!%p6850_p4)
}
  0x7b   : > { %s6938_s17 = smov 32   ;;  %s6939_s19 = smov 2  }
  0x7c   : > { %6522 = dma.hbm_to_vmem [thread:$0]  (!%p7145_p11), %s7143_s14, 1024, %s7149_s21, %s7151_s18, %s6938_s17, %s6938_s17, %s6939_s19  }
  0x7d   : > { %p8275_p9 = scmp.ne.s32.totalorder %s8268_s13, 0 }
  0x7e   : > { %s7182_s1 = sand.u32 (!%p8275_p9), 1, %s6920_s28   ;;  %p8276_p0 = scmp.ne.s32.totalorder (!%p8275_p9), %s8265_s11, 0 }
  0x7f   : > { %318 = sbr.rel (%p8275_p9) target bundleno = 4237 (0x108d), region = 52  ;;  %s3978_s27 = sshll.u32 (!%p8275_p9), %s7182_s1, 6 }
  0x80   : > { %s321_s23 = scalar_lea.sflag (!%p8275_p9), [#allocation4], %s7182_s1  ;;  %s7188_s25 = scalar_lea.vmem (!%p8275_p9), [#allocation3], %s3978_s27 }
  0x86   : > { %6899 = dma.done.wait (%p8276_p0), %s321_s23, 1024  }
  0x87   : > { %6901 = vsyncadd (%p8276_p0), %s321_s23, 4294966272  ;;  %p8277_p11 = scmp.eq.s32.totalorder %s7013_s9, 0 }
  0x89   : > { %6903 = dma.done.wait (%p8277_p11), [#allocation7], 6144   ;;  %p8278_p8 = pmov %p8277_p11 }
  0x8b   : > { %6905 = vsyncadd (%p8278_p8), [#allocation7], 4294961152  ;;  %p8279_p13 = pmov %p8278_p8 }
  0x8c   : > { %p8280_p6 = pmov %p8278_p8 }
  0x8d   : > { %6907 = dma.done.wait (%p8279_p13), [#allocation10], 2048  }
  0x8e   : > { %6909 = vsyncadd (%p8280_p6), [#allocation10], 4294965248  ;;  %v6940_v0 = vmov 0.0|0.0   ;;  %v6941_v1 = vmov 0.0   ;;  %vm6942_vm0 = vmmov 0   ;;  %v404_v2 = vld [vmem:[#allocation6 + $0x8] sm:$0xff]  ;;  %v508_v49 = vlaneseq }
  0x8f   : > { %5725 = vmatprep.subr.bf16.mxu1 %v6940_v0  ;;  %711 = vmatprep.mubr.f32.mxu0 %v6941_v1  ;;  %v406_v3 = vld [vmem:[#allocation6 + $0x18] sm:$0xff]  ;;  %v403_v4 = vld [vmem:[#allocation6] sm:$0xff]  ;;  %v405_v6 = vld [vmem:[#allocation6 + $0x10] sm:$0xff]  ;;  %v6943_v47 = vmov 1983009808   ;;  %vm1129_vm1 = vcmask 1043456  }
  0x90   : > { %4605 = vmatprep.mubr.msk.f32.mxu1 %vm6942_vm0, %v6941_v1  ;;  %v5693_v5 = vpack.c.bf16 %v406_v3, %v404_v2  ;;  %v408_v7 = vld [vmem:[#allocation6 + $0x28] sm:$0xff]  ;;  %v410_v8 = vld [vmem:[#allocation6 + $0x38] sm:$0xff]  ;;  %v5695_v9 = vpack.c.bf16 %v405_v6, %v403_v4  ;;  %v435_v11 = vld [vmem:[#allocation8] sm:$0xff]  ;;  %v506_v48 = vunpack.c.l.s4 %v6943_v47  ;;  %v509_v61 = vshrl.u32 %v508_v49, 7  ;;  %s7515_s10 = scalar_lea.vmem [#allocation11], %s3978_s27  ;;  %s4028_s20 = sshll.u32 %s7013_s9, 10 }
  0x91   : > { %v5697_v10 = vpack.c.bf16 %v410_v8, %v408_v7  ;;  %v436_v12 = vld [vmem:[#allocation8 + $0x8] sm:$0xff]  ;;  %v407_v13 = vld [vmem:[#allocation6 + $0x20] sm:$0xff]  ;;  %v409_v15 = vld [vmem:[#allocation6 + $0x30] sm:$0xff]  ;;  %s3865_s26 = sshll.u32 %s7515_s10, 4  ;;  %s8201_s19 = scalar_lea.hbm %s8257_s8, %s4028_s20  ;;  %s8203_s26 = int_to_ptr.vmem [resolvable:$true] %s3865_s26 }
  0x92   : > { %5694 = vmatprep.subr.bf16.mxu0 %v5693_v5  ;;  %v7206_v14 = vpack.c.bf16 %v436_v12, %v435_v11  ;;  %v412_v16 = vld [vmem:[#allocation6 + $0x48] sm:$0xff]  ;;  %v414_v17 = vld [vmem:[#allocation6 + $0x58] sm:$0xff]  ;;  %v5699_v18 = vpack.c.bf16 %v409_v15, %v407_v13  ;;  %v437_v19 = vld [vmem:[#allocation8 + $0x10] sm:$0xff]  ;;  %v507_v60 = vunpack.c.0.s8 %v506_v48  ;;  %s3851_s27 = scalar_lea.sflag [#allocation5], %s7182_s1  ;;  %s6854_s23 = scalar_lea.vmem %s8203_s26, 1024 }
  0x93   : > { %5696 = vmatpush1.bf16.msra.mxu0 %v5695_v9  ;;  %v438_v20 = vld [vmem:[#allocation8 + $0x18] sm:$0xff]  ;;  %v5701_v21 = vpack.c.bf16 %v414_v17, %v412_v16  ;;  %v411_v23 = vld [vmem:[#allocation6 + $0x40] sm:$0xff]  ;;  %v413_v24 = vld [vmem:[#allocation6 + $0x50] sm:$0xff]  ;;  %p6855_p10 = scmp.ne.s32.totalorder %s8203_s26, %s6854_s23  ;;  %s6944_s9 = smov [#allocation11]  }
  0x94   : > { %5698 = vmatprep.subr.bf16.mxu0 %v5697_v10  ;;  %5727 = vmatpush3.bf16.msra.mxu1 %v7206_v14  ;;  %v7209_v22 = vpack.c.bf16 %v438_v20, %v437_v19  ;;  %v416_v25 = vld [vmem:[#allocation6 + $0x68] sm:$0xff]  ;;  %v418_v26 = vld [vmem:[#allocation6 + $0x78] sm:$0xff]  ;;  %v439_v27 = vld [vmem:[#allocation8 + $0x20] sm:$0xff]  ;;  %v5703_v29 = vpack.c.bf16 %v413_v24, %v411_v23  ;;  %v7244_v15 = vsub.s32 %v507_v60, %v509_v61  ;;  %s6858_s11 = sshll.u32 %s6944_s9, 4  ;;  %s6859_s11 = int_to_ptr.vmem [resolvable:$false] %s6858_s11 }
  0x95   : > { %5728 = vmatprep.subr.bf16.mxu1 %v6940_v0  ;;  %v440_v28 = vld [vmem:[#allocation8 + $0x28] sm:$0xff]  ;;  %v5705_v30 = vpack.c.bf16 %v418_v26, %v416_v25  ;;  %v415_v32 = vld [vmem:[#allocation6 + $0x60] sm:$0xff]  ;;  %v417_v33 = vld [vmem:[#allocation6 + $0x70] sm:$0xff]  ;;  %p6856_p3 = pnand %p6855_p10, %p7134_p5  ;;  %s6860_s13 = scalar_lea.vmem %s6859_s11, 2048 }
  0x96   : > { %v7213_v31 = vpack.c.bf16 %v440_v28, %v439_v27  ;;  %v420_v34 = vld [vmem:[#allocation6 + $0x88] sm:$0xff]  ;;  %v422_v35 = vld [vmem:[#allocation6 + $0x98] sm:$0xff]  ;;  %v441_v36 = vld [vmem:[#allocation8 + $0x30] sm:$0xff]  ;;  %v5707_v38 = vpack.c.bf16 %v417_v33, %v415_v32  ;;  %p6861_p12 = scmp.lt.s32.totalorder %s8203_s26, %s6859_s11  ;;  %p6862_p2 = scmp.lt.s32.totalorder %s6860_s13, %s6854_s23 }
  0x97   : > { %5700 = vmatpush1.bf16.msra.mxu0 %v5699_v18  ;;  %v442_v37 = vld [vmem:[#allocation8 + $0x38] sm:$0xff]  ;;  %v5709_v39 = vpack.c.bf16 %v422_v35, %v420_v34  ;;  %v419_v41 = vld [vmem:[#allocation6 + $0x80] sm:$0xff]  ;;  %v421_v42 = vld [vmem:[#allocation6 + $0x90] sm:$0xff]  ;;  %p6857_p7 = pneg %p6856_p3 }
  0x98   : > { %5702 = vmatprep.subr.bf16.mxu0 %v5701_v21  ;;  %5730 = vmatpush3.bf16.msra.mxu1 %v7209_v22  ;;  %v7217_v40 = vpack.c.bf16 %v442_v37, %v441_v36  ;;  %v424_v43 = vld [vmem:[#allocation6 + $0xa8] sm:$0xff]  ;;  %v426_v44 = vld [vmem:[#allocation6 + $0xb8] sm:$0xff]  ;;  %v443_v45 = vld [vmem:[#allocation8 + $0x40] sm:$0xff]  ;;  %v5711_v50 = vpack.c.bf16 %v421_v42, %v419_v41  ;;  %p6863_p1 = por %p6862_p2, %p6861_p12 }
  0x99   : > { %5731 = vmatprep.subr.bf16.mxu1 %v6940_v0  ;;  %v444_v46 = vld [vmem:[#allocation8 + $0x48] sm:$0xff]  ;;  %v5713_v51 = vpack.c.bf16 %v426_v44, %v424_v43  ;;  %v423_v53 = vld [vmem:[#allocation6 + $0xa0] sm:$0xff]  ;;  %v425_v54 = vld [vmem:[#allocation6 + $0xb0] sm:$0xff] }
  0x9a   : > { %v7221_v52 = vpack.c.bf16 %v444_v46, %v443_v45  ;;  %v428_v55 = vld [vmem:[#allocation6 + $0xc8] sm:$0xff]  ;;  %v430_v56 = vld [vmem:[#allocation6 + $0xd8] sm:$0xff]  ;;  %v445_v57 = vld [vmem:[#allocation8 + $0x50] sm:$0xff]  ;;  %v5715_v62 = vpack.c.bf16 %v425_v54, %v423_v53  ;;  %p6864_p4 = pnand %p6863_p1, %p6857_p7 }
  0x9b   : > { %5704 = vmatpush1.bf16.msra.mxu0 %v5703_v29  ;;  %v446_v58 = vld [vmem:[#allocation8 + $0x58] sm:$0xff]  ;;  %v7225_v59 = vld [vmem:[%s7188_s25] sm:$0x3]  ;;  %v7228_v63 = vld [vmem:[%s7188_s25 + $0x2] sm:$0x3]  ;;  %v5717_v4 = vpack.c.bf16 %v430_v56, %v428_v55 }
  0x9c   : > { %5706 = vmatprep.subr.bf16.mxu0 %v5705_v30  ;;  %5733 = vmatpush3.bf16.msra.mxu1 %v7213_v31  ;;  %v7231_v2 = vld [vmem:[%s7188_s25 + $0x20] sm:$0x3]  ;;  %v7234_v3 = vld [vmem:[%s7188_s25 + $0x22] sm:$0x3]  ;;  %v7237_v5 = vpack.c.bf16 %v446_v58, %v445_v57  ;;  %v429_v7 = vld [vmem:[#allocation6 + $0xd0] sm:$0xff] }
  0x9d   : > { %5734 = vmatprep.subr.bf16.mxu1 %v6940_v0  ;;  %v427_v6 = vld [vmem:[#allocation6 + $0xc0] sm:$0xff]  ;;  %v432_v8 = vld [vmem:[#allocation6 + $0xe8] sm:$0xff]  ;;  %v434_v9 = vld [vmem:[#allocation6 + $0xf8] sm:$0xff]  ;;  %v503_v12 = vcombine.low %v7225_v59, %v7231_v2  ;;  %v504_v13 = vcombine.low %v7228_v63, %v7234_v3 }
  0x9e   : > { %v447_v10 = vld [vmem:[#allocation8 + $0x60] sm:$0xff]  ;;  %v448_v11 = vld [vmem:[#allocation8 + $0x68] sm:$0xff]  ;;  %v5719_v16 = vpack.c.bf16 %v429_v7, %v427_v6  ;;  %v5721_v17 = vpack.c.bf16 %v434_v9, %v432_v8  ;;  %v433_v20 = vld [vmem:[#allocation6 + $0xf0] sm:$0xff] }
  0x9f   : > { %5708 = vmatpush1.bf16.msra.mxu0 %v5707_v38  ;;  %v7247_v18 = vpack.c.bf16 %v448_v11, %v447_v10  ;;  %v431_v19 = vld [vmem:[#allocation6 + $0xe0] sm:$0xff]  ;;  %v449_v21 = vld [vmem:[#allocation8 + $0x70] sm:$0xff]  ;;  %v450_v23 = vld [vmem:[#allocation8 + $0x78] sm:$0xff]  ;;  %v511_v24 = vrot.slane %v503_v12, %v7244_v15  ;;  %v518_v25 = vrot.slane %v504_v13, %v7244_v15 }
  0xa0   : > { %5710 = vmatprep.subr.bf16.mxu0 %v5709_v39  ;;  %5736 = vmatpush3.bf16.msra.mxu1 %v7217_v40  ;;  %v5723_v26 = vpack.c.bf16 %v433_v20, %v431_v19  ;;  %v7253_v27 = vpack.c.bf16 %v450_v23, %v449_v21  ;;  %v7280_v29 = vld [vmem:[%s7188_s25 + $0x4] sm:$0x3]  ;;  %v7283_v30 = vld [vmem:[%s7188_s25 + $0x6] sm:$0x3]  ;;  %v452_v34 = vld [vmem:[#allocation9 + $0x8] sm:$0xff] }
  0xa1   : > { %5737 = vmatprep.subr.bf16.mxu1 %v6940_v0  ;;  %v519_v28 = vcombine.low %v511_v24, %v518_v25  ;;  %v7286_v32 = vld [vmem:[%s7188_s25 + $0x24] sm:$0x3]  ;;  %v7289_v35 = vld [vmem:[%s7188_s25 + $0x26] sm:$0x3]  ;;  %v375_v42 = vld [vmem:[%s7188_s25 + $0x8] sm:$0x3] }
  0xa2   : > { %v451_v33 = vld [vmem:[#allocation9] sm:$0xff]  ;;  %v520_v36 = vcombine.low %v7280_v29, %v7286_v32  ;;  %v521_v38 = vcombine.low %v7283_v30, %v7289_v35  ;;  %v376_v43 = vld [vmem:[%s7188_s25 + $0xa] sm:$0x3]  ;;  %v391_v44 = vld [vmem:[%s7188_s25 + $0x28] sm:$0x3] }
  0xa3   : > { %5712 = vmatpush1.bf16.msra.mxu0 %v5711_v50  ;;  %v7293_v37 = vpack.c.bf16 %v452_v34, %v451_v33  ;;  %v453_v45 = vld [vmem:[#allocation9 + $0x10] sm:$0xff]  ;;  %v454_v46 = vld [vmem:[#allocation9 + $0x18] sm:$0xff]  ;;  %v392_v47 = vld [vmem:[%s7188_s25 + $0x2a] sm:$0x3]  ;;  %v537_v48 = vcombine.low %v375_v42, %v391_v44 }
  0xa4   : > { %5714 = vmatprep.subr.bf16.mxu0 %v5713_v51  ;;  %5739 = vmatpush3.bf16.msra.mxu1 %v7221_v52  ;;  %v528_v39 = vrot.slane %v520_v36, %v7244_v15  ;;  %v535_v41 = vrot.slane %v521_v38, %v7244_v15  ;;  %v7305_v50 = vpack.c.bf16 %v454_v46, %v453_v45  ;;  %v377_v55 = vld [vmem:[%s7188_s25 + $0xc] sm:$0x3]  ;;  %v378_v56 = vld [vmem:[%s7188_s25 + $0xe] sm:$0x3]  ;;  %v455_v58 = vld [vmem:[#allocation9 + $0x20] sm:$0xff] }
  0xa5   : > { %5740 = vmatprep.subr.bf16.mxu1 %v6940_v0  ;;  %v538_v51 = vcombine.low %v376_v43, %v392_v47  ;;  %v545_v53 = vrot.slane %v537_v48, %v7244_v15  ;;  %v393_v57 = vld [vmem:[%s7188_s25 + $0x2c] sm:$0x3]  ;;  %v394_v61 = vld [vmem:[%s7188_s25 + $0x2e] sm:$0x3]  ;;  %v379_v10 = vld [vmem:[%s7188_s25 + $0x10] sm:$0x3] }
  0xa6   : > { %v536_v49 = vcombine.low %v528_v39, %v535_v41  ;;  %v456_v60 = vld [vmem:[#allocation9 + $0x28] sm:$0xff]  ;;  %v555_v7 = vcombine.low %v378_v56, %v394_v61  ;;  %v380_v11 = vld [vmem:[%s7188_s25 + $0x12] sm:$0x3]  ;;  %v395_v12 = vld [vmem:[%s7188_s25 + $0x30] sm:$0x3] }
  0xa7   : > { %5716 = vmatpush1.bf16.msra.mxu0 %v5715_v62  ;;  %v552_v54 = vrot.slane %v538_v51, %v7244_v15  ;;  %v554_v62 = vcombine.low %v377_v55, %v393_v57  ;;  %v7316_v6 = vpack.c.bf16 %v456_v60, %v455_v58  ;;  %v457_v13 = vld [vmem:[#allocation9 + $0x30] sm:$0xff]  ;;  %v571_v19 = vcombine.low %v379_v10, %v395_v12  ;;  %v459_v34 = vld [vmem:[#allocation9 + $0x40] sm:$0xff]  ;;  %v460_v36 = vld [vmem:[#allocation9 + $0x48] sm:$0xff] }
  0xa8   : > { %5718 = vmatprep.subr.bf16.mxu0 %v5717_v4  ;;  %5742 = vmatpush3.bf16.msra.mxu1 %v7237_v5  ;;  %v569_v9 = vrot.slane %v555_v7, %v7244_v15  ;;  %v397_v33 = vld [vmem:[%s7188_s25 + $0x34] sm:$0x3]  ;;  %v398_v38 = vld [vmem:[%s7188_s25 + $0x36] sm:$0x3]  ;;  %v7338_v42 = vpack.c.bf16 %v460_v36, %v459_v34  ;;  %v383_v46 = vld [vmem:[%s7188_s25 + $0x18] sm:$0x3] }
  0xa9   : > { %5743 = vmatprep.subr.bf16.mxu1 %v6940_v0  ;;  %v553_v4 = vcombine.low %v545_v53, %v552_v54  ;;  %v562_v8 = vrot.slane %v554_v62, %v7244_v15  ;;  %v579_v24 = vrot.slane %v571_v19, %v7244_v15  ;;  %v384_v47 = vld [vmem:[%s7188_s25 + $0x1a] sm:$0x3]  ;;  %v399_v48 = vld [vmem:[%s7188_s25 + $0x38] sm:$0x3]  ;;  %v463_v58 = vld [vmem:[#allocation9 + $0x60] sm:$0xff] }
  0xaa   : > { %v462_v51 = vld [vmem:[#allocation9 + $0x58] sm:$0xff]  ;;  %v605_v54 = vcombine.low %v383_v46, %v399_v48  ;;  %v464_v60 = vld [vmem:[#allocation9 + $0x68] sm:$0xff]  ;;  %v465_v19 = vld [vmem:[#allocation9 + $0x70] sm:$0xff] }
  0xab   : > { %5720 = vmatpush1.bf16.msra.mxu0 %v5719_v16  ;;  %v458_v16 = vld [vmem:[#allocation9 + $0x38] sm:$0xff]  ;;  %v570_v20 = vcombine.low %v562_v8, %v569_v9  ;;  %v7359_v12 = vpack.c.bf16 %v464_v60, %v463_v58 }
  0xac   : > { %5722 = vmatprep.subr.bf16.mxu0 %v5721_v17  ;;  %5745 = vmatpush3.bf16.msra.mxu1 %v7247_v18  ;;  %v396_v17 = vld [vmem:[%s7188_s25 + $0x32] sm:$0x3]  ;;  %v7327_v21 = vpack.c.bf16 %v458_v16, %v457_v13  ;;  %v400_v53 = vld [vmem:[%s7188_s25 + $0x3a] sm:$0x3]  ;;  %v385_v61 = vld [vmem:[%s7188_s25 + $0x1c] sm:$0x3]  ;;  %v613_v62 = vrot.slane %v605_v54, %v7244_v15 }
  0xad   : > { %5746 = vmatprep.subr.bf16.mxu1 %v6940_v0  ;;  %v572_v23 = vcombine.low %v380_v11, %v396_v17  ;;  %v606_v57 = vcombine.low %v384_v47, %v400_v53  ;;  %v401_v7 = vld [vmem:[%s7188_s25 + $0x3c] sm:$0x3]  ;;  %v402_v8 = vld [vmem:[%s7188_s25 + $0x3e] sm:$0x3] }
  0xae   : > { %v622_v10 = vcombine.low %v385_v61, %v401_v7 }
  0xaf   : > { %5724 = vmatpush1.bf16.msra.mxu0 %v5723_v26  ;;  %v586_v25 = vrot.slane %v572_v23, %v7244_v15  ;;  %v381_v26 = vld [vmem:[%s7188_s25 + $0x14] sm:$0x3]  ;;  %v620_v9 = vrot.slane %v606_v57, %v7244_v15 }
  0xb0   : > { %5748 = vmatpush3.bf16.msra.mxu1 %v7253_v27  ;;  %5749 = vmatprep.subr.bf16.mxu0 %v6940_v0  ;;  %v588_v39 = vcombine.low %v381_v26, %v397_v33  ;;  %v630_v16 = vrot.slane %v622_v10, %v7244_v15 }
  0xb1   : > { %5773 = vmatprep.subr.bf16.mxu1 %v6940_v0  ;;  %v587_v41 = vcombine.low %v579_v24, %v586_v25  ;;  %v621_v13 = vcombine.low %v613_v62, %v620_v9 }
  0xb2   : > { %712 = vmatmul.mubr.f32.vlgmr.msra.gmra.mrb[0].mxu0 %v519_v28  ;;  %v382_v28 = vld [vmem:[%s7188_s25 + $0x16] sm:$0x3]  ;;  %v596_v44 = vrot.slane %v588_v39, %v7244_v15 }
  0xb3   : > { %4606 = vmatmul.mubr.f32.vlgmr.msra.gmra.mrb[0].mxu1 %v6941_v1  ;;  %717 = vmatprep.mubr.f32.mxu0 %v6941_v1  ;;  %v589_v43 = vcombine.low %v382_v28, %v398_v38  ;;  %v7378_v38 = vld [vmem:[%s8253_s4] ss:$0 sm:$0xff] }
  0xb4   : > { %5775 = vmatpush3.bf16.msra.mxu1 %v7206_v14  ;;  %4675 = vmatprep.mubr.msk.f32.mxu1 %vm6942_vm0, %v6941_v1 }
  0xb5   : > { %5776 = vmatprep.subr.bf16.mxu1 %v6940_v0  ;;  %5751 = vmatpush3.bf16.msra.mxu0 %v7293_v37  ;;  %v603_v45 = vrot.slane %v589_v43, %v7244_v15 }
  0xb6   : > { %5752 = vmatprep.subr.bf16.mxu0 %v6940_v0  ;;  %718 = vmatmul.mubr.f32.gmra.mrb[2].mxu0 %v536_v49  ;;  %v461_v49 = vld [vmem:[#allocation9 + $0x50] sm:$0xff] }
  0xb7   : > { %723 = vmatprep.mubr.f32.mxu0 %v6941_v1  ;;  %v604_v55 = vcombine.low %v596_v44, %v603_v45  ;;  %v7349_v56 = vpack.c.bf16 %v462_v51, %v461_v49 }
  0xb8   : > { %5778 = vmatpush3.bf16.msra.mxu1 %v7209_v22 }
  0xb9   : > { %5779 = vmatprep.subr.bf16.mxu1 %v6940_v0  ;;  %5754 = vmatpush3.bf16.msra.mxu0 %v7305_v50 }
  0xba   : > { %5755 = vmatprep.subr.bf16.mxu0 %v6940_v0  ;;  %724 = vmatmul.mubr.f32.gmra.mrb[4].mxu0 %v553_v4  ;;  %v386_v4 = vld [vmem:[%s7188_s25 + $0x1e] sm:$0x3] }
  0xbb   : > { %729 = vmatprep.mubr.f32.mxu0 %v6941_v1  ;;  %v623_v11 = vcombine.low %v386_v4, %v402_v8 }
  0xbc   : > { %5781 = vmatpush3.bf16.msra.mxu1 %v7213_v31 }
  0xbd   : > { %5782 = vmatprep.subr.bf16.mxu1 %v6940_v0  ;;  %5757 = vmatpush3.bf16.msra.mxu0 %v7316_v6  ;;  %v637_v17 = vrot.slane %v623_v11, %v7244_v15 }
  0xbe   : > { %5758 = vmatprep.subr.bf16.mxu0 %v6940_v0  ;;  %730 = vmatmul.mubr.f32.gmra.mrb[6].mxu0 %v570_v20  ;;  %v466_v20 = vld [vmem:[#allocation9 + $0x78] sm:$0xff] }
  0xbf   : > { %735 = vmatprep.mubr.f32.mxu0 %v6941_v1  ;;  %v638_v23 = vcombine.low %v630_v16, %v637_v17  ;;  %v7366_v24 = vpack.c.bf16 %v466_v20, %v465_v19 }
  0xc0   : > { %5784 = vmatpush3.bf16.msra.mxu1 %v7217_v40 }
  0xc1   : > { %5785 = vmatprep.subr.bf16.mxu1 %v6940_v0  ;;  %5760 = vmatpush3.bf16.msra.mxu0 %v7327_v21 }
  0xc2   : > { %5761 = vmatprep.subr.bf16.mxu0 %v6940_v0  ;;  %736 = vmatmul.mubr.f32.gmra.mrb[8].mxu0 %v587_v41 }
  0xc3   : > { %741 = vmatprep.mubr.f32.mxu0 %v6941_v1 }
  0xc4   : > { %5787 = vmatpush3.bf16.msra.mxu1 %v7221_v52 }
  0xc5   : > { %5788 = vmatprep.subr.bf16.mxu1 %v6940_v0  ;;  %5763 = vmatpush3.bf16.msra.mxu0 %v7338_v42 }
  0xc6   : > { %5764 = vmatprep.subr.bf16.mxu0 %v6940_v0  ;;  %742 = vmatmul.mubr.f32.gmra.mrb[10].mxu0 %v604_v55 }
  0xc7   : > { %747 = vmatprep.mubr.f32.mxu0 %v6941_v1 }
  0xc8   : > { %5790 = vmatpush3.bf16.msra.mxu1 %v7237_v5 }
  0xc9   : > { %5791 = vmatprep.subr.bf16.mxu1 %v6940_v0  ;;  %5766 = vmatpush3.bf16.msra.mxu0 %v7349_v56 }
  0xca   : > { %5767 = vmatprep.subr.bf16.mxu0 %v6940_v0  ;;  %748 = vmatmul.mubr.f32.gmra.mrb[12].mxu0 %v621_v13 }
  0xcb   : > { %753 = vmatprep.mubr.f32.mxu0 %v6941_v1 }
  0xcc   : > { %5793 = vmatpush3.bf16.msra.mxu1 %v7247_v18 }
  0xcd   : > { %5794 = vmatprep.subr.bf16.mxu1 %v6940_v0  ;;  %5769 = vmatpush3.bf16.msra.mxu0 %v7359_v12 }
  0xce   : > { %5770 = vmatprep.subr.bf16.mxu0 %v6940_v0  ;;  %754 = vmatmul.mubr.f32.gmra.mrb[14].mxu0 %v638_v23 }
  0xcf   : > { %4640 = vmatprep.mubr.msk.f32.mxu0 %vm6942_vm0, %v6941_v1 }
  0xd0   : > { %5796 = vmatpush3.bf16.msra.mxu1 %v7253_v27 }
  0xd1   : > { %5821 = vmatprep.subr.bf16.mxu1 %v6940_v0  ;;  %5772 = vmatpush3.bf16.msra.mxu0 %v7366_v24 }
  0xd2   : > { %5797 = vmatprep.subr.bf16.mxu0 %v6940_v0 }
 0x185   : > { %v713_v25 = vpop.f32.mrb[0].mxu0 }
 0x186   : > { %v715_v26 = vpop.f32.mrb[1].mxu0  ;;  %v1024_v28 = vpop.f32.mrb[0].mxu1 }
 0x187   : > { %v776_v33 = vcombine.low %v713_v25, %v715_v26  ;;  %v7373_v34 = vcombine.high %v713_v25, %v715_v26  ;;  %v4607_v36 = vpop.f32.mrb[1].mxu1 }
 0x189   : > { %v814_v39 = vrot.slane %v776_v33, 4  ;;  %v1028_v41 = vadd.f32 %v1024_v28, %v776_v33  ;;  %v719_v51 = vpop.f32.mrb[2].mxu0 }
 0x18a   : > { %v721_v53 = vpop.f32.mrb[3].mxu0 }
 0x18b   : > { %v846_v43 = vadd.f32 %v7378_v38, %v814_v39  ;;  %v7417_v54 = vcombine.low %v719_v51, %v721_v53  ;;  %v7419_v55 = vcombine.high %v719_v51, %v721_v53 }
 0x18d   : > { %v3984_v44 = vmul.f32 -1.442695, %v846_v43  ;;  %v725_v57 = vpop.f32.mrb[4].mxu0  ;;  %v815_v43 = vrot.slane %v7373_v34, 4 }
 0x18e   : > { %v727_v58 = vpop.f32.mrb[5].mxu0 }
 0x18f   : > { %6582 = vpow2.f32 %v3984_v44  ;;  %v7421_v60 = vcombine.low %v725_v57, %v727_v58  ;;  %v7423_v61 = vcombine.high %v725_v57, %v727_v58  ;;  %v847_v44 = vadd.f32 %v7378_v38, %v815_v43 }
 0x190   : > { %6584 = vtanh.f32 %v1028_v41 }
 0x191   : > { %v731_v62 = vpop.f32.mrb[6].mxu0 }
 0x192   : > { %v733_v4 = vpop.f32.mrb[7].mxu0 }
 0x193   : > { %v7425_v7 = vcombine.low %v731_v62, %v733_v4  ;;  %v7427_v8 = vcombine.high %v731_v62, %v733_v4 }
 0x195   : > { %v737_v9 = vpop.f32.mrb[8].mxu0 }
 0x196   : > { %v739_v10 = vpop.f32.mrb[9].mxu0 }
 0x197   : > { %v7429_v11 = vcombine.low %v737_v9, %v739_v10  ;;  %v7431_v13 = vcombine.high %v737_v9, %v739_v10 }
 0x199   : > { %v6583_v45 = vpop.eup %6582  ;;  %v743_v16 = vpop.f32.mrb[10].mxu0 }
 0x19a   : > { %v910_v46 = vadd.f32 1.0, %v6583_v45  ;;  %v6585_v47 = vpop.eup %6584  ;;  %v745_v17 = vpop.f32.mrb[11].mxu0  ;;  %v4000_v45 = vld [vmem:[%s8254_s5] ss:$0 sm:$0xff] }
 0x19b   : > { %v7433_v19 = vcombine.low %v743_v16, %v745_v17  ;;  %v7435_v20 = vcombine.high %v743_v16, %v745_v17 }
 0x19c   : > { %6586 = vrcp.f32 %v910_v46  ;;  %v3985_v46 = vmul.f32 -1.442695, %v847_v44 }
 0x19d   : > { %v749_v23 = vpop.f32.mrb[12].mxu0 }
 0x19e   : > { %v751_v25 = vpop.f32.mrb[13].mxu0  ;;  %6588 = vpow2.f32 %v3985_v46 }
 0x19f   : > { %v7437_v26 = vcombine.low %v749_v23, %v751_v25  ;;  %v7439_v28 = vcombine.high %v749_v23, %v751_v25 }
 0x1a1   : > { %v755_v33 = vpop.f32.mrb[14].mxu0 }
 0x1a2   : > { %v757_v36 = vpop.f32.mrb[15].mxu0 }
 0x1a3   : > { %v7441_v39 = vcombine.low %v755_v33, %v757_v36  ;;  %v7443_v41 = vcombine.high %v755_v33, %v757_v36 }
 0x1a6   : > { %v6587_v48 = vpop.eup %6586 }
 0x1a7   : > { %v1030_v49 = vmul.f32 %v6587_v48, %v6585_v47  ;;  %v7451_v47 = vrot.slane %v4000_v45, %v7244_v15 }
 0x1a8   : > { %v6589_v57 = vpop.eup %6588 }
 0x1a9   : > { %4641 = vmatmul.mubr.f32.vlgmr.msra.gmra.mrb[16].mxu0 %v1030_v49  ;;  %4676 = vmatmul.mubr.f32.vlgmr.msra.gmra.mrb[2].mxu1 %v1030_v49  ;;  %v7455_v48 = vcombine.high %v7451_v47, %v7451_v47  ;;  %v1046_v49 = vmul.f32 %v7451_v47, %v7225_v59  ;;  %v911_v62 = vadd.f32 1.0, %v6589_v57 }
 0x1aa   : > { %5799 = vmatpush3.bf16.msra.mxu0 %v7293_v37  ;;  %5823 = vmatpush3.bf16.msra.mxu1 %v7206_v14 }
 0x1ab   : > { %5800 = vmatprep.subr.bf16.mxu0 %v6940_v0  ;;  %5824 = vmatprep.subr.bf16.mxu1 %v6940_v0  ;;  %v1047_v51 = vmul.f32 %v7455_v48, %v7231_v2  ;;  %6590 = vrcp.f32 %v911_v62  ;;  %v7504_v62 = vld [vmem:[%s8255_s6] ss:$0 sm:$0xff] }
 0x1ac   : > { %4710 = vmatprep.mubr.msk.f32.mxu0 %vm6942_vm0, %v6941_v1  ;;  %4745 = vmatprep.mubr.msk.f32.mxu1 %vm6942_vm0, %v6941_v1 }
 0x1ad   : > { %v1050_v53 = vcombine.low %v1046_v49, %v1047_v51 }
 0x1ae   : > { %5802 = vmatpush3.bf16.msra.mxu0 %v7305_v50  ;;  %5826 = vmatpush3.bf16.msra.mxu1 %v7209_v22 }
 0x1af   : > { %5803 = vmatprep.subr.bf16.mxu0 %v6940_v0  ;;  %5827 = vmatprep.subr.bf16.mxu1 %v6940_v0  ;;  %v1057_v58 = vrot.slane %v1050_v53, %v7244_v15 }
 0x1b2   : > { %5805 = vmatpush3.bf16.msra.mxu0 %v7316_v6  ;;  %5829 = vmatpush3.bf16.msra.mxu1 %v7213_v31 }
 0x1b3   : > { %5806 = vmatprep.subr.bf16.mxu0 %v6940_v0  ;;  %5830 = vmatprep.subr.bf16.mxu1 %v6940_v0 }
 0x1b5   : > { %v6591_v33 = vpop.eup %6590 }
 0x1b6   : > { %5808 = vmatpush3.bf16.msra.mxu0 %v7327_v21  ;;  %5832 = vmatpush3.bf16.msra.mxu1 %v7217_v40 }
 0x1b7   : > { %5809 = vmatprep.subr.bf16.mxu0 %v6940_v0  ;;  %5833 = vmatprep.subr.bf16.mxu1 %v6940_v0 }
 0x1ba   : > { %5811 = vmatpush3.bf16.msra.mxu0 %v7338_v42  ;;  %5835 = vmatpush3.bf16.msra.mxu1 %v7221_v52 }
 0x1bb   : > { %5812 = vmatprep.subr.bf16.mxu0 %v6940_v0  ;;  %5836 = vmatprep.subr.bf16.mxu1 %v6940_v0 }
 0x1be   : > { %5814 = vmatpush3.bf16.msra.mxu0 %v7349_v56  ;;  %5838 = vmatpush3.bf16.msra.mxu1 %v7237_v5 }
 0x1bf   : > { %5815 = vmatprep.subr.bf16.mxu0 %v6940_v0  ;;  %5839 = vmatprep.subr.bf16.mxu1 %v6940_v0 }
 0x1c2   : > { %5817 = vmatpush3.bf16.msra.mxu0 %v7359_v12  ;;  %5841 = vmatpush3.bf16.msra.mxu1 %v7247_v18 }
 0x1c3   : > { %5818 = vmatprep.subr.bf16.mxu0 %v6940_v0  ;;  %5842 = vmatprep.subr.bf16.mxu1 %v6940_v0 }
 0x1c6   : > { %5820 = vmatpush3.bf16.msra.mxu0 %v7366_v24  ;;  %5844 = vmatpush3.bf16.msra.mxu1 %v7253_v27 }
 0x1c7   : > { %5845 = vmatprep.subr.bf16.mxu0 %v6940_v0  ;;  %5869 = vmatprep.subr.bf16.mxu1 %v6940_v0 }
 0x27c   : > { %v1125_v4 = vpop.f32.mrb[16].mxu0  ;;  %v1226_v9 = vpop.f32.mrb[2].mxu1 }
 0x27d   : > { %v1126_v10 = vadd.f32 %v1125_v4, %v1057_v58  ;;  %v1230_v16 = vadd.f32 %v1226_v9, %v7373_v34  ;;  %v4642_v17 = vpop.f32.mrb[17].mxu0  ;;  %v4677_v23 = vpop.f32.mrb[3].mxu1  ;;  %v7509_v9 = vld [vmem:[%s8256_s7] ss:$0 sm:$0xff] }
 0x27f   : > { %6592 = vtanh.f32 %v1230_v16  ;;  %v1130_v59 = vsel %vm1129_vm1, %v1126_v10, 0.0  ;;  %v1134_v25 = vmul.f32 %v1126_v10, %v1126_v10 }
 0x280   : > { %1131 = vadd.xlane.f32.xlu0 %v1130_v59 }
 0x281   : > { %v1135_v2 = vsel %vm1129_vm1, %v1134_v25, 0.0 }
 0x284   : > { %1136 = vadd.xlane.f32.xlu0 %v1135_v2 }
 0x289   : > { %v6593_v36 = vpop.eup %6592 }
 0x28a   : > { %v1232_v43 = vmul.f32 %v6593_v36, %v6591_v33  ;;  %v1233_v33 = vmul.f32 %v7451_v47, %v7228_v63  ;;  %v1234_v36 = vmul.f32 %v7455_v48, %v7234_v3 }
 0x28c   : > { %4711 = vmatmul.mubr.f32.vlgmr.msra.gmra.mrb[18].mxu0 %v1232_v43  ;;  %4746 = vmatmul.mubr.f32.vlgmr.msra.gmra.mrb[4].mxu1 %v1232_v43  ;;  %v1237_v43 = vcombine.low %v1233_v33, %v1234_v36 }
 0x28d   : > { %5847 = vmatpush3.bf16.msra.mxu0 %v7293_v37  ;;  %5871 = vmatpush3.bf16.msra.mxu1 %v7206_v14 }
 0x28e   : > { %5848 = vmatprep.subr.bf16.mxu0 %v6940_v0  ;;  %5872 = vmatprep.subr.bf16.mxu1 %v6940_v0 }
 0x28f   : > { %4780 = vmatprep.mubr.msk.f32.mxu0 %vm6942_vm0, %v6941_v1  ;;  %4815 = vmatprep.mubr.msk.f32.mxu1 %vm6942_vm0, %v6941_v1 }
 0x291   : > { %5850 = vmatpush3.bf16.msra.mxu0 %v7305_v50  ;;  %5874 = vmatpush3.bf16.msra.mxu1 %v7209_v22 }
 0x292   : > { %5851 = vmatprep.subr.bf16.mxu0 %v6940_v0  ;;  %5875 = vmatprep.subr.bf16.mxu1 %v6940_v0 }
 0x295   : > { %5853 = vmatpush3.bf16.msra.mxu0 %v7316_v6  ;;  %5877 = vmatpush3.bf16.msra.mxu1 %v7213_v31 }
 0x296   : > { %5854 = vmatprep.subr.bf16.mxu0 %v6940_v0  ;;  %5878 = vmatprep.subr.bf16.mxu1 %v6940_v0 }
 0x299   : > { %5856 = vmatpush3.bf16.msra.mxu0 %v7327_v21  ;;  %5880 = vmatpush3.bf16.msra.mxu1 %v7217_v40 }
 0x29a   : > { %5857 = vmatprep.subr.bf16.mxu0 %v6940_v0  ;;  %5881 = vmatprep.subr.bf16.mxu1 %v6940_v0 }
 0x29d   : > { %5859 = vmatpush3.bf16.msra.mxu0 %v7338_v42  ;;  %5883 = vmatpush3.bf16.msra.mxu1 %v7221_v52 }
 0x29e   : > { %5860 = vmatprep.subr.bf16.mxu0 %v6940_v0  ;;  %5884 = vmatprep.subr.bf16.mxu1 %v6940_v0 }
 0x2a1   : > { %5862 = vmatpush3.bf16.msra.mxu0 %v7349_v56  ;;  %5886 = vmatpush3.bf16.msra.mxu1 %v7237_v5 }
 0x2a2   : > { %5863 = vmatprep.subr.bf16.mxu0 %v6940_v0  ;;  %5887 = vmatprep.subr.bf16.mxu1 %v6940_v0 }
 0x2a5   : > { %5865 = vmatpush3.bf16.msra.mxu0 %v7359_v12  ;;  %5889 = vmatpush3.bf16.msra.mxu1 %v7247_v18 }
 0x2a6   : > { %5866 = vmatprep.subr.bf16.mxu0 %v6940_v0  ;;  %5890 = vmatprep.subr.bf16.mxu1 %v6940_v0 }
 0x2a9   : > { %5868 = vmatpush3.bf16.msra.mxu0 %v7366_v24  ;;  %5892 = vmatpush3.bf16.msra.mxu1 %v7253_v27 }
 0x2aa   : > { %5893 = vmatprep.subr.bf16.mxu0 %v6940_v0  ;;  %5917 = vmatprep.subr.bf16.mxu1 %v6940_v0 }
 0x30d   : > { %v1132_v34 = vpop.xlane.xlu0 %1131 }
 0x30e   : > { %v1133_v44 = vmul.f32 0.03125, %v1132_v34 }
 0x310   : > { %v1139_v46 = vmul.f32 %v1133_v44, %v1133_v44  ;;  %v1141_v57 = vsub.f32 %v1126_v10, %v1133_v44  ;;  %v816_v10 = vrot.slane %v7417_v54, 4 }
 0x311   : > { %v1137_v45 = vpop.xlane.xlu0 %1136 }
 0x312   : > { %v1138_v49 = vmul.f32 0.03125, %v1137_v45  ;;  %v848_v25 = vadd.f32 %v7378_v38, %v816_v10  ;;  %v1244_v45 = vrot.slane %v1237_v43, %v7244_v15 }
 0x314   : > { %v1140_v51 = vsub.f32 %v1138_v49, %v1139_v46  ;;  %v3986_v2 = vmul.f32 -1.442695, %v848_v25 }
 0x316   : > { %v1142_v53 = vadd.f32 1e-05, %v1140_v51 }
 0x318   : > { %6594 = vrsqrt.f32 %v1142_v53 }
 0x319   : > { %6596 = vpow2.f32 %v3986_v2 }
 0x322   : > { %v6595_v58 = vpop.eup %6594 }
 0x323   : > { %v1144_v4 = vmul.f32 %v6595_v58, %v1141_v57  ;;  %v6597_v34 = vpop.eup %6596 }
 0x324   : > { %v912_v44 = vadd.f32 1.0, %v6597_v34 }
 0x325   : > { %v1151_v16 = vmul.f32 %v7504_v62, %v1144_v4 }
 0x326   : > { %6598 = vrcp.f32 %v912_v44 }
 0x327   : > { %v1158_v17 = vadd.f32 %v7509_v9, %v1151_v16 }
 0x329   : > { %1159 = vst [vmem:[#allocation2] sm:$0xf] %v1158_v17 }
 0x330   : > { %v3785_v23 = vld [vmem:[#allocation2] sm:$0x3]  ;;  %v3817_v59 = vld [vmem:[#allocation2 + $0x2] sm:$0x3]  ;;  %v6599_v16 = vpop.eup %6598 }
 0x331   : > { %3801 = vst [vmem:[%s7515_s10] sm:$0x3] %v3785_v23  ;;  %4003 = vst [vmem:[%s7515_s10 + $0x20] sm:$0x3] %v3817_v59 }
 0x35f   : > { %v1312_v46 = vpop.f32.mrb[18].mxu0  ;;  %v1401_v49 = vpop.f32.mrb[4].mxu1 }
 0x360   : > { %v1313_v51 = vadd.f32 %v1312_v46, %v1244_v45  ;;  %v1405_v53 = vadd.f32 %v1401_v49, %v7417_v54  ;;  %v4712_v57 = vpop.f32.mrb[19].mxu0  ;;  %v4747_v58 = vpop.f32.mrb[5].mxu1 }
 0x361   : > { %v817_v57 = vrot.slane %v7419_v55, 4 }
 0x362   : > { %6600 = vtanh.f32 %v1405_v53  ;;  %v1316_v4 = vsel %vm1129_vm1, %v1313_v51, 0.0  ;;  %v1320_v63 = vmul.f32 %v1313_v51, %v1313_v51 }
 0x363   : > { %1317 = vadd.xlane.f32.xlu0 %v1316_v4  ;;  %v849_v58 = vadd.f32 %v7378_v38, %v817_v57 }
 0x364   : > { %v1321_v3 = vsel %vm1129_vm1, %v1320_v63, 0.0  ;;  %v1409_v63 = vmul.f32 %v7455_v48, %v7286_v32 }
 0x365   : > { %1322 = vadd.xlane.f32.xlu1 %v1321_v3  ;;  %v3987_v4 = vmul.f32 -1.442695, %v849_v58 }
 0x36c   : > { %v6601_v17 = vpop.eup %6600 }
 0x36d   : > { %v1407_v23 = vmul.f32 %v6601_v17, %v6599_v16 }
 0x36f   : > { %4781 = vmatmul.mubr.f32.vlgmr.msra.gmra.mrb[20].mxu0 %v1407_v23  ;;  %4816 = vmatmul.mubr.f32.vlgmr.msra.gmra.mrb[6].mxu1 %v1407_v23 }
 0x370   : > { %5895 = vmatpush3.bf16.msra.mxu0 %v7293_v37  ;;  %5919 = vmatpush3.bf16.msra.mxu1 %v7206_v14 }
 0x371   : > { %5896 = vmatprep.subr.bf16.mxu0 %v6940_v0  ;;  %5920 = vmatprep.subr.bf16.mxu1 %v6940_v0 }
 0x372   : > { %4850 = vmatprep.mubr.msk.f32.mxu0 %vm6942_vm0, %v6941_v1  ;;  %4885 = vmatprep.mubr.msk.f32.mxu1 %vm6942_vm0, %v6941_v1 }
 0x374   : > { %5898 = vmatpush3.bf16.msra.mxu0 %v7305_v50  ;;  %5922 = vmatpush3.bf16.msra.mxu1 %v7209_v22 }
 0x375   : > { %5899 = vmatprep.subr.bf16.mxu0 %v6940_v0  ;;  %5923 = vmatprep.subr.bf16.mxu1 %v6940_v0 }
 0x378   : > { %5901 = vmatpush3.bf16.msra.mxu0 %v7316_v6  ;;  %5925 = vmatpush3.bf16.msra.mxu1 %v7213_v31 }
 0x379   : > { %5902 = vmatprep.subr.bf16.mxu0 %v6940_v0  ;;  %5926 = vmatprep.subr.bf16.mxu1 %v6940_v0 }
 0x37c   : > { %5904 = vmatpush3.bf16.msra.mxu0 %v7327_v21  ;;  %5928 = vmatpush3.bf16.msra.mxu1 %v7217_v40 }
 0x37d   : > { %5905 = vmatprep.subr.bf16.mxu0 %v6940_v0  ;;  %5929 = vmatprep.subr.bf16.mxu1 %v6940_v0 }
 0x380   : > { %5907 = vmatpush3.bf16.msra.mxu0 %v7338_v42  ;;  %5931 = vmatpush3.bf16.msra.mxu1 %v7221_v52 }
 0x381   : > { %5908 = vmatprep.subr.bf16.mxu0 %v6940_v0  ;;  %5932 = vmatprep.subr.bf16.mxu1 %v6940_v0 }
 0x384   : > { %5910 = vmatpush3.bf16.msra.mxu0 %v7349_v56  ;;  %5934 = vmatpush3.bf16.msra.mxu1 %v7237_v5 }
 0x385   : > { %5911 = vmatprep.subr.bf16.mxu0 %v6940_v0  ;;  %5935 = vmatprep.subr.bf16.mxu1 %v6940_v0 }
 0x388   : > { %5913 = vmatpush3.bf16.msra.mxu0 %v7359_v12  ;;  %5937 = vmatpush3.bf16.msra.mxu1 %v7247_v18 }
 0x389   : > { %5914 = vmatprep.subr.bf16.mxu0 %v6940_v0  ;;  %5938 = vmatprep.subr.bf16.mxu1 %v6940_v0 }
 0x38c   : > { %5916 = vmatpush3.bf16.msra.mxu0 %v7366_v24  ;;  %5940 = vmatpush3.bf16.msra.mxu1 %v7253_v27 }
 0x38d   : > { %5941 = vmatprep.subr.bf16.mxu0 %v6940_v0  ;;  %5965 = vmatprep.subr.bf16.mxu1 %v6940_v0 }
 0x3f0   : > { %v1318_v54 = vpop.xlane.xlu0 %1317 }
 0x3f1   : > { %v1319_v59 = vmul.f32 0.03125, %v1318_v54 }
 0x3f2   : > { %v1323_v10 = vpop.xlane.xlu1 %1322 }
 0x3f3   : > { %v1325_v25 = vmul.f32 %v1319_v59, %v1319_v59  ;;  %v1324_v2 = vmul.f32 0.03125, %v1323_v10  ;;  %v1327_v43 = vsub.f32 %v1313_v51, %v1319_v59  ;;  %v1408_v51 = vmul.f32 %v7451_v47, %v7280_v29 }
 0x3f5   : > { %v1326_v33 = vsub.f32 %v1324_v2, %v1325_v25  ;;  %v1412_v3 = vcombine.low %v1408_v51, %v1409_v63 }
 0x3f7   : > { %v1328_v36 = vadd.f32 1e-05, %v1326_v33  ;;  %v1419_v17 = vrot.slane %v1412_v3, %v7244_v15 }
 0x3f9   : > { %6602 = vrsqrt.f32 %v1328_v36 }
 0x3fa   : > { %6604 = vpow2.f32 %v3987_v4 }
 0x403   : > { %v6603_v34 = vpop.eup %6602 }
 0x404   : > { %v1330_v44 = vmul.f32 %v6603_v34, %v1327_v43  ;;  %v6605_v16 = vpop.eup %6604 }
 0x405   : > { %v913_v23 = vadd.f32 1.0, %v6605_v16 }
 0x406   : > { %v1331_v45 = vmul.f32 %v7504_v62, %v1330_v44 }
 0x407   : > { %6606 = vrcp.f32 %v913_v23 }
 0x408   : > { %v1332_v46 = vadd.f32 %v7509_v9, %v1331_v45 }
 0x40a   : > { %1334 = vst [vmem:[#allocation2 + $0x4] sm:$0xf] %v1332_v46 }
 0x411   : > { %v3786_v49 = vld [vmem:[#allocation2 + $0x4] sm:$0x3]  ;;  %v3818_v53 = vld [vmem:[#allocation2 + $0x6] sm:$0x3]  ;;  %v6607_v43 = vpop.eup %6606 }
 0x412   : > { %3802 = vst [vmem:[%s7515_s10 + $0x2] sm:$0x3] %v3786_v49  ;;  %4004 = vst [vmem:[%s7515_s10 + $0x22] sm:$0x3] %v3818_v53 }
 0x442   : > { %v1487_v54 = vpop.f32.mrb[20].mxu0  ;;  %v1576_v59 = vpop.f32.mrb[6].mxu1 }
 0x443   : > { %v1488_v10 = vadd.f32 %v1487_v54, %v1419_v17  ;;  %v1580_v25 = vadd.f32 %v1576_v59, %v7419_v55  ;;  %v4782_v2 = vpop.f32.mrb[21].mxu0  ;;  %v4817_v33 = vpop.f32.mrb[7].mxu1  ;;  %v818_v54 = vrot.slane %v7421_v60, 4 }
 0x444   : > { %v1584_v2 = vmul.f32 %v7455_v48, %v7289_v35 }
 0x445   : > { %6608 = vtanh.f32 %v1580_v25  ;;  %v1491_v36 = vsel %vm1129_vm1, %v1488_v10, 0.0  ;;  %v1495_v29 = vmul.f32 %v1488_v10, %v1488_v10  ;;  %v850_v59 = vadd.f32 %v7378_v38, %v818_v54 }
 0x446   : > { %1492 = vadd.xlane.f32.xlu1 %v1491_v36 }
 0x447   : > { %v1496_v32 = vsel %vm1129_vm1, %v1495_v29, 0.0  ;;  %v3988_v25 = vmul.f32 -1.442695, %v850_v59 }
 0x448   : > { %1497 = vadd.xlane.f32.xlu0 %v1496_v32 }
 0x44f   : > { %v6609_v34 = vpop.eup %6608 }
 0x450   : > { %v1582_v44 = vmul.f32 %v6609_v34, %v6607_v43 }
 0x452   : > { %4851 = vmatmul.mubr.f32.vlgmr.msra.gmra.mrb[22].mxu0 %v1582_v44  ;;  %4886 = vmatmul.mubr.f32.vlgmr.msra.gmra.mrb[8].mxu1 %v1582_v44 }
 0x453   : > { %5943 = vmatpush3.bf16.msra.mxu0 %v7293_v37  ;;  %5967 = vmatpush3.bf16.msra.mxu1 %v7206_v14 }
 0x454   : > { %5944 = vmatprep.subr.bf16.mxu0 %v6940_v0  ;;  %5968 = vmatprep.subr.bf16.mxu1 %v6940_v0 }
 0x455   : > { %4920 = vmatprep.mubr.msk.f32.mxu0 %vm6942_vm0, %v6941_v1  ;;  %4955 = vmatprep.mubr.msk.f32.mxu1 %vm6942_vm0, %v6941_v1 }
 0x457   : > { %5946 = vmatpush3.bf16.msra.mxu0 %v7305_v50  ;;  %5970 = vmatpush3.bf16.msra.mxu1 %v7209_v22 }
 0x458   : > { %5947 = vmatprep.subr.bf16.mxu0 %v6940_v0  ;;  %5971 = vmatprep.subr.bf16.mxu1 %v6940_v0 }
 0x45b   : > { %5949 = vmatpush3.bf16.msra.mxu0 %v7316_v6  ;;  %5973 = vmatpush3.bf16.msra.mxu1 %v7213_v31 }
 0x45c   : > { %5950 = vmatprep.subr.bf16.mxu0 %v6940_v0  ;;  %5974 = vmatprep.subr.bf16.mxu1 %v6940_v0 }
 0x45f   : > { %5952 = vmatpush3.bf16.msra.mxu0 %v7327_v21  ;;  %5976 = vmatpush3.bf16.msra.mxu1 %v7217_v40 }
 0x460   : > { %5953 = vmatprep.subr.bf16.mxu0 %v6940_v0  ;;  %5977 = vmatprep.subr.bf16.mxu1 %v6940_v0 }
 0x463   : > { %5955 = vmatpush3.bf16.msra.mxu0 %v7338_v42  ;;  %5979 = vmatpush3.bf16.msra.mxu1 %v7221_v52 }
 0x464   : > { %5956 = vmatprep.subr.bf16.mxu0 %v6940_v0  ;;  %5980 = vmatprep.subr.bf16.mxu1 %v6940_v0 }
 0x467   : > { %5958 = vmatpush3.bf16.msra.mxu0 %v7349_v56  ;;  %5982 = vmatpush3.bf16.msra.mxu1 %v7237_v5 }
 0x468   : > { %5959 = vmatprep.subr.bf16.mxu0 %v6940_v0  ;;  %5983 = vmatprep.subr.bf16.mxu1 %v6940_v0 }
 0x46b   : > { %5961 = vmatpush3.bf16.msra.mxu0 %v7359_v12  ;;  %5985 = vmatpush3.bf16.msra.mxu1 %v7247_v18 }
 0x46c   : > { %5962 = vmatprep.subr.bf16.mxu0 %v6940_v0  ;;  %5986 = vmatprep.subr.bf16.mxu1 %v6940_v0 }
 0x46f   : > { %5964 = vmatpush3.bf16.msra.mxu0 %v7366_v24  ;;  %5988 = vmatpush3.bf16.msra.mxu1 %v7253_v27 }
 0x470   : > { %5989 = vmatprep.subr.bf16.mxu0 %v6940_v0  ;;  %6013 = vmatprep.subr.bf16.mxu1 %v6940_v0 }
 0x4d3   : > { %v1493_v55 = vpop.xlane.xlu1 %1492 }
 0x4d4   : > { %v1494_v45 = vmul.f32 0.03125, %v1493_v55 }
 0x4d5   : > { %v1498_v46 = vpop.xlane.xlu0 %1497 }
 0x4d6   : > { %v1500_v49 = vmul.f32 %v1494_v45, %v1494_v45  ;;  %v1499_v53 = vmul.f32 0.03125, %v1498_v46  ;;  %v1502_v4 = vsub.f32 %v1488_v10, %v1494_v45  ;;  %v1583_v10 = vmul.f32 %v7451_v47, %v7283_v30 }
 0x4d8   : > { %v1501_v57 = vsub.f32 %v1499_v53, %v1500_v49  ;;  %v1587_v33 = vcombine.low %v1583_v10, %v1584_v2 }
 0x4da   : > { %v1503_v58 = vadd.f32 1e-05, %v1501_v57  ;;  %v1594_v32 = vrot.slane %v1587_v33, %v7244_v15 }
 0x4dc   : > { %6610 = vrsqrt.f32 %v1503_v58 }
 0x4dd   : > { %6612 = vpow2.f32 %v3988_v25 }
 0x4e6   : > { %v6611_v51 = vpop.eup %6610 }
 0x4e7   : > { %v1505_v63 = vmul.f32 %v6611_v51, %v1502_v4  ;;  %v6613_v36 = vpop.eup %6612 }
 0x4e8   : > { %v914_v29 = vadd.f32 1.0, %v6613_v36  ;;  %v819_v36 = vrot.slane %v7423_v61, 4 }
 0x4e9   : > { %v1506_v3 = vmul.f32 %v7504_v62, %v1505_v63 }
 0x4ea   : > { %6614 = vrcp.f32 %v914_v29  ;;  %v851_v29 = vadd.f32 %v7378_v38, %v819_v36 }
 0x4eb   : > { %v1507_v16 = vadd.f32 %v7509_v9, %v1506_v3 }
 0x4ed   : > { %1509 = vst [vmem:[#allocation2 + $0x8] sm:$0xf] %v1507_v16 }
 0x4f4   : > { %v3787_v17 = vld [vmem:[#allocation2 + $0x8] sm:$0x3]  ;;  %v3819_v23 = vld [vmem:[#allocation2 + $0xa] sm:$0x3]  ;;  %v6615_v53 = vpop.eup %6614 }
 0x4f5   : > { %3803 = vst [vmem:[%s7515_s10 + $0x4] sm:$0x3] %v3787_v17  ;;  %4005 = vst [vmem:[%s7515_s10 + $0x24] sm:$0x3] %v3819_v23 }
 0x525   : > { %v1662_v43 = vpop.f32.mrb[22].mxu0  ;;  %v1751_v34 = vpop.f32.mrb[8].mxu1 }
 0x526   : > { %v1663_v44 = vadd.f32 %v1662_v43, %v1594_v32  ;;  %v1755_v55 = vadd.f32 %v1751_v34, %v7421_v60  ;;  %v4852_v45 = vpop.f32.mrb[23].mxu0  ;;  %v4887_v46 = vpop.f32.mrb[9].mxu1  ;;  %v3989_v32 = vmul.f32 -1.442695, %v851_v29  ;;  %v6710_v43 = vld [vmem:[%s7188_s25 + $0x8] sm:$0x3] }
 0x527   : > { %v1758_v34 = vmul.f32 %v6710_v43, %v7451_v47 }
 0x528   : > { %6616 = vtanh.f32 %v1755_v55  ;;  %v1666_v49 = vsel %vm1129_vm1, %v1663_v44, 0.0  ;;  %v1670_v30 = vmul.f32 %v1663_v44, %v1663_v44 }
 0x529   : > { %1667 = vadd.xlane.f32.xlu1 %v1666_v49 }
 0x52a   : > { %v1671_v35 = vsel %vm1129_vm1, %v1670_v30, 0.0 }
 0x52d   : > { %1672 = vadd.xlane.f32.xlu1 %v1671_v35 }
 0x532   : > { %v6617_v57 = vpop.eup %6616 }
 0x533   : > { %v1757_v58 = vmul.f32 %v6617_v57, %v6615_v53 }
 0x535   : > { %4921 = vmatmul.mubr.f32.vlgmr.msra.gmra.mrb[24].mxu0 %v1757_v58  ;;  %4956 = vmatmul.mubr.f32.vlgmr.msra.gmra.mrb[10].mxu1 %v1757_v58 }
 0x536   : > { %5991 = vmatpush3.bf16.msra.mxu0 %v7293_v37  ;;  %6015 = vmatpush3.bf16.msra.mxu1 %v7206_v14 }
 0x537   : > { %5992 = vmatprep.subr.bf16.mxu0 %v6940_v0  ;;  %6016 = vmatprep.subr.bf16.mxu1 %v6940_v0 }
 0x538   : > { %4990 = vmatprep.mubr.msk.f32.mxu0 %vm6942_vm0, %v6941_v1  ;;  %5025 = vmatprep.mubr.msk.f32.mxu1 %vm6942_vm0, %v6941_v1 }
 0x53a   : > { %5994 = vmatpush3.bf16.msra.mxu0 %v7305_v50  ;;  %6018 = vmatpush3.bf16.msra.mxu1 %v7209_v22 }
 0x53b   : > { %5995 = vmatprep.subr.bf16.mxu0 %v6940_v0  ;;  %6019 = vmatprep.subr.bf16.mxu1 %v6940_v0 }
 0x53e   : > { %5997 = vmatpush3.bf16.msra.mxu0 %v7316_v6  ;;  %6021 = vmatpush3.bf16.msra.mxu1 %v7213_v31 }
 0x53f   : > { %5998 = vmatprep.subr.bf16.mxu0 %v6940_v0  ;;  %6022 = vmatprep.subr.bf16.mxu1 %v6940_v0 }
 0x542   : > { %6000 = vmatpush3.bf16.msra.mxu0 %v7327_v21  ;;  %6024 = vmatpush3.bf16.msra.mxu1 %v7217_v40 }
 0x543   : > { %6001 = vmatprep.subr.bf16.mxu0 %v6940_v0  ;;  %6025 = vmatprep.subr.bf16.mxu1 %v6940_v0 }
 0x546   : > { %6003 = vmatpush3.bf16.msra.mxu0 %v7338_v42  ;;  %6027 = vmatpush3.bf16.msra.mxu1 %v7221_v52 }
 0x547   : > { %6004 = vmatprep.subr.bf16.mxu0 %v6940_v0  ;;  %6028 = vmatprep.subr.bf16.mxu1 %v6940_v0 }
 0x54a   : > { %6006 = vmatpush3.bf16.msra.mxu0 %v7349_v56  ;;  %6030 = vmatpush3.bf16.msra.mxu1 %v7237_v5 }
 0x54b   : > { %6007 = vmatprep.subr.bf16.mxu0 %v6940_v0  ;;  %6031 = vmatprep.subr.bf16.mxu1 %v6940_v0 }
 0x54e   : > { %6009 = vmatpush3.bf16.msra.mxu0 %v7359_v12  ;;  %6033 = vmatpush3.bf16.msra.mxu1 %v7247_v18 }
 0x54f   : > { %6010 = vmatprep.subr.bf16.mxu0 %v6940_v0  ;;  %6034 = vmatprep.subr.bf16.mxu1 %v6940_v0 }
 0x552   : > { %6012 = vmatpush3.bf16.msra.mxu0 %v7366_v24  ;;  %6036 = vmatpush3.bf16.msra.mxu1 %v7253_v27 }
 0x553   : > { %6037 = vmatprep.subr.bf16.mxu0 %v6940_v0  ;;  %6061 = vmatprep.subr.bf16.mxu1 %v6940_v0 }
 0x5b6   : > { %v1668_v60 = vpop.xlane.xlu1 %1667 }
 0x5b7   : > { %v1669_v4 = vmul.f32 0.03125, %v1668_v60 }
 0x5b9   : > { %v1675_v63 = vmul.f32 %v1669_v4, %v1669_v4  ;;  %v1677_v23 = vsub.f32 %v1663_v44, %v1669_v4  ;;  %v6711_v44 = vld [vmem:[%s7188_s25 + $0x28] sm:$0x3] }
 0x5ba   : > { %v1673_v51 = vpop.xlane.xlu1 %1672  ;;  %v1759_v55 = vmul.f32 %v6711_v44, %v7455_v48 }
 0x5bb   : > { %v1674_v3 = vmul.f32 0.03125, %v1673_v51 }
 0x5bc   : > { %v1762_v45 = vcombine.low %v1758_v34, %v1759_v55 }
 0x5bd   : > { %v1676_v16 = vsub.f32 %v1674_v3, %v1675_v63 }
 0x5be   : > { %v1769_v49 = vrot.slane %v1762_v45, %v7244_v15  ;;  %v820_v45 = vrot.slane %v7425_v7, 4 }
 0x5bf   : > { %v1678_v17 = vadd.f32 1e-05, %v1676_v16 }
 0x5c1   : > { %6618 = vrsqrt.f32 %v1678_v17 }
 0x5c2   : > { %6620 = vpow2.f32 %v3989_v32 }
 0x5cb   : > { %v6619_v54 = vpop.eup %6618 }
 0x5cc   : > { %v1680_v59 = vmul.f32 %v6619_v54, %v1677_v23  ;;  %v6621_v46 = vpop.eup %6620 }
 0x5cd   : > { %v915_v30 = vadd.f32 1.0, %v6621_v46  ;;  %v852_v46 = vadd.f32 %v7378_v38, %v820_v45 }
 0x5ce   : > { %v1681_v25 = vmul.f32 %v7504_v62, %v1680_v59 }
 0x5cf   : > { %6622 = vrcp.f32 %v915_v30  ;;  %v6712_v30 = vld [vmem:[%s7188_s25 + $0xa] sm:$0x3] }
 0x5d0   : > { %v1682_v10 = vadd.f32 %v7509_v9, %v1681_v25 }
 0x5d2   : > { %1684 = vst [vmem:[#allocation2 + $0xc] sm:$0xf] %v1682_v10 }
 0x5d9   : > { %v3788_v2 = vld [vmem:[#allocation2 + $0xc] sm:$0x3]  ;;  %v3820_v33 = vld [vmem:[#allocation2 + $0xe] sm:$0x3]  ;;  %v6623_v16 = vpop.eup %6622 }
 0x5da   : > { %3804 = vst [vmem:[%s7515_s10 + $0x6] sm:$0x3] %v3788_v2  ;;  %4006 = vst [vmem:[%s7515_s10 + $0x26] sm:$0x3] %v3820_v33 }
 0x608   : > { %v1837_v35 = vpop.f32.mrb[24].mxu0  ;;  %v1926_v53 = vpop.f32.mrb[10].mxu1 }
 0x609   : > { %v1838_v57 = vadd.f32 %v1837_v35, %v1769_v49  ;;  %v1930_v58 = vadd.f32 %v1926_v53, %v7423_v61  ;;  %v4922_v60 = vpop.f32.mrb[25].mxu0  ;;  %v4957_v4 = vpop.f32.mrb[11].mxu1  ;;  %v3990_v49 = vmul.f32 -1.442695, %v852_v46  ;;  %v1933_v35 = vmul.f32 %v6712_v30, %v7451_v47  ;;  %v6713_v53 = vld [vmem:[%s7188_s25 + $0x2a] sm:$0x3] }
 0x60b   : > { %6624 = vtanh.f32 %v1930_v58  ;;  %v1841_v51 = vsel %vm1129_vm1, %v1838_v57, 0.0  ;;  %v1845_v63 = vmul.f32 %v1838_v57, %v1838_v57 }
 0x60c   : > { %1842 = vadd.xlane.f32.xlu0 %v1841_v51 }
 0x60d   : > { %v1846_v3 = vsel %vm1129_vm1, %v1845_v63, 0.0 }
 0x610   : > { %1847 = vadd.xlane.f32.xlu0 %v1846_v3 }
 0x615   : > { %v6625_v17 = vpop.eup %6624 }
 0x616   : > { %v1932_v23 = vmul.f32 %v6625_v17, %v6623_v16 }
 0x618   : > { %4991 = vmatmul.mubr.f32.vlgmr.msra.gmra.mrb[26].mxu0 %v1932_v23  ;;  %5026 = vmatmul.mubr.f32.vlgmr.msra.gmra.mrb[12].mxu1 %v1932_v23 }
 0x619   : > { %6039 = vmatpush3.bf16.msra.mxu0 %v7293_v37  ;;  %6063 = vmatpush3.bf16.msra.mxu1 %v7206_v14 }
 0x61a   : > { %6040 = vmatprep.subr.bf16.mxu0 %v6940_v0  ;;  %6064 = vmatprep.subr.bf16.mxu1 %v6940_v0 }
 0x61b   : > { %5060 = vmatprep.mubr.msk.f32.mxu0 %vm6942_vm0, %v6941_v1  ;;  %5095 = vmatprep.mubr.msk.f32.mxu1 %vm6942_vm0, %v6941_v1 }
 0x61d   : > { %6042 = vmatpush3.bf16.msra.mxu0 %v7305_v50  ;;  %6066 = vmatpush3.bf16.msra.mxu1 %v7209_v22 }
 0x61e   : > { %6043 = vmatprep.subr.bf16.mxu0 %v6940_v0  ;;  %6067 = vmatprep.subr.bf16.mxu1 %v6940_v0 }
 0x621   : > { %6045 = vmatpush3.bf16.msra.mxu0 %v7316_v6  ;;  %6069 = vmatpush3.bf16.msra.mxu1 %v7213_v31 }
 0x622   : > { %6046 = vmatprep.subr.bf16.mxu0 %v6940_v0  ;;  %6070 = vmatprep.subr.bf16.mxu1 %v6940_v0 }
 0x625   : > { %6048 = vmatpush3.bf16.msra.mxu0 %v7327_v21  ;;  %6072 = vmatpush3.bf16.msra.mxu1 %v7217_v40 }
 0x626   : > { %6049 = vmatprep.subr.bf16.mxu0 %v6940_v0  ;;  %6073 = vmatprep.subr.bf16.mxu1 %v6940_v0 }
 0x629   : > { %6051 = vmatpush3.bf16.msra.mxu0 %v7338_v42  ;;  %6075 = vmatpush3.bf16.msra.mxu1 %v7221_v52 }
 0x62a   : > { %6052 = vmatprep.subr.bf16.mxu0 %v6940_v0  ;;  %6076 = vmatprep.subr.bf16.mxu1 %v6940_v0 }
 0x62d   : > { %6054 = vmatpush3.bf16.msra.mxu0 %v7349_v56  ;;  %6078 = vmatpush3.bf16.msra.mxu1 %v7237_v5 }
 0x62e   : > { %6055 = vmatprep.subr.bf16.mxu0 %v6940_v0  ;;  %6079 = vmatprep.subr.bf16.mxu1 %v6940_v0 }
 0x631   : > { %6057 = vmatpush3.bf16.msra.mxu0 %v7359_v12  ;;  %6081 = vmatpush3.bf16.msra.mxu1 %v7247_v18 }
 0x632   : > { %6058 = vmatprep.subr.bf16.mxu0 %v6940_v0  ;;  %6082 = vmatprep.subr.bf16.mxu1 %v6940_v0 }
 0x635   : > { %6060 = vmatpush3.bf16.msra.mxu0 %v7366_v24  ;;  %6084 = vmatpush3.bf16.msra.mxu1 %v7253_v27 }
 0x636   : > { %6085 = vmatprep.subr.bf16.mxu0 %v6940_v0  ;;  %6109 = vmatprep.subr.bf16.mxu1 %v6940_v0 }
 0x699   : > { %v1843_v61 = vpop.xlane.xlu0 %1842 }
 0x69a   : > { %v1844_v54 = vmul.f32 0.03125, %v1843_v61 }
 0x69c   : > { %v1850_v25 = vmul.f32 %v1844_v54, %v1844_v54  ;;  %v1852_v36 = vsub.f32 %v1838_v57, %v1844_v54  ;;  %v1934_v57 = vmul.f32 %v6713_v53, %v7455_v48  ;;  %v821_v53 = vrot.slane %v7427_v8, 4 }
 0x69d   : > { %v1848_v59 = vpop.xlane.xlu0 %1847 }
 0x69e   : > { %v1849_v10 = vmul.f32 0.03125, %v1848_v59  ;;  %v1937_v58 = vcombine.low %v1933_v35, %v1934_v57  ;;  %v7773_v57 = vld [vmem:[%s8253_s4] ss:$0 sm:$0xff] }
 0x6a0   : > { %v1851_v2 = vsub.f32 %v1849_v10, %v1850_v25  ;;  %v1944_v51 = vrot.slane %v1937_v58, %v7244_v15  ;;  %v853_v58 = vadd.f32 %v7773_v57, %v821_v53 }
 0x6a2   : > { %v1853_v33 = vadd.f32 1e-05, %v1851_v2 }
 0x6a4   : > { %6626 = vrsqrt.f32 %v1853_v33 }
 0x6a5   : > { %6628 = vpow2.f32 %v3990_v49 }
 0x6ae   : > { %v6627_v29 = vpop.eup %6626 }
 0x6af   : > { %v1855_v32 = vmul.f32 %v6627_v29, %v1852_v36  ;;  %v6629_v60 = vpop.eup %6628 }
 0x6b0   : > { %v916_v4 = vadd.f32 1.0, %v6629_v60  ;;  %v3991_v60 = vmul.f32 -1.442695, %v853_v58 }
 0x6b1   : > { %v1856_v43 = vmul.f32 %v7504_v62, %v1855_v32 }
 0x6b2   : > { %6630 = vrcp.f32 %v916_v4  ;;  %v6715_v4 = vld [vmem:[%s7188_s25 + $0xc] sm:$0x3] }
 0x6b3   : > { %v1857_v34 = vadd.f32 %v7509_v9, %v1856_v43 }
 0x6b5   : > { %1859 = vst [vmem:[#allocation2 + $0x10] sm:$0xf] %v1857_v34 }
 0x6bc   : > { %v3789_v44 = vld [vmem:[#allocation2 + $0x10] sm:$0x3]  ;;  %v3821_v55 = vld [vmem:[#allocation2 + $0x12] sm:$0x3]  ;;  %v6631_v25 = vpop.eup %6630 }
 0x6bd   : > { %3805 = vst [vmem:[%s7515_s10 + $0x8] sm:$0x3] %v3789_v44  ;;  %4007 = vst [vmem:[%s7515_s10 + $0x28] sm:$0x3] %v3821_v55 }
 0x6eb   : > { %v2012_v63 = vpop.f32.mrb[26].mxu0  ;;  %v2101_v3 = vpop.f32.mrb[12].mxu1 }
 0x6ec   : > { %v2013_v16 = vadd.f32 %v2012_v63, %v1944_v51  ;;  %v2105_v17 = vadd.f32 %v2101_v3, %v7425_v7  ;;  %v4992_v38 = vpop.f32.mrb[27].mxu0  ;;  %v5027_v23 = vpop.f32.mrb[13].mxu1  ;;  %v2108_v51 = vmul.f32 %v6715_v4, %v7451_v47  ;;  %v6716_v63 = vld [vmem:[%s7188_s25 + $0x2c] sm:$0x3] }
 0x6ed   : > { %v2109_v3 = vmul.f32 %v6716_v63, %v7455_v48  ;;  %v822_v63 = vrot.slane %v7429_v11, 4 }
 0x6ee   : > { %6632 = vtanh.f32 %v2105_v17  ;;  %v2016_v61 = vsel %vm1129_vm1, %v2013_v16, 0.0  ;;  %v2020_v54 = vmul.f32 %v2013_v16, %v2013_v16 }
 0x6ef   : > { %2017 = vadd.xlane.f32.xlu1 %v2016_v61 }
 0x6f0   : > { %v2021_v59 = vsel %vm1129_vm1, %v2020_v54, 0.0 }
 0x6f3   : > { %2022 = vadd.xlane.f32.xlu1 %v2021_v59 }
 0x6f8   : > { %v6633_v10 = vpop.eup %6632 }
 0x6f9   : > { %v2107_v2 = vmul.f32 %v6633_v10, %v6631_v25 }
 0x6fb   : > { %5061 = vmatmul.mubr.f32.vlgmr.msra.gmra.mrb[28].mxu0 %v2107_v2  ;;  %5096 = vmatmul.mubr.f32.vlgmr.msra.gmra.mrb[14].mxu1 %v2107_v2 }
 0x6fc   : > { %6087 = vmatpush3.bf16.msra.mxu0 %v7293_v37  ;;  %6111 = vmatpush3.bf16.msra.mxu1 %v7206_v14 }
 0x6fd   : > { %6088 = vmatprep.subr.bf16.mxu0 %v6940_v0  ;;  %6112 = vmatprep.subr.bf16.mxu1 %v6940_v0 }
 0x6fe   : > { %5130 = vmatprep.mubr.msk.f32.mxu0 %vm6942_vm0, %v6941_v1  ;;  %5165 = vmatprep.mubr.msk.f32.mxu1 %vm6942_vm0, %v6941_v1 }
 0x700   : > { %6090 = vmatpush3.bf16.msra.mxu0 %v7305_v50  ;;  %6114 = vmatpush3.bf16.msra.mxu1 %v7209_v22 }
 0x701   : > { %6091 = vmatprep.subr.bf16.mxu0 %v6940_v0  ;;  %6115 = vmatprep.subr.bf16.mxu1 %v6940_v0 }
 0x704   : > { %6093 = vmatpush3.bf16.msra.mxu0 %v7316_v6  ;;  %6117 = vmatpush3.bf16.msra.mxu1 %v7213_v31 }
 0x705   : > { %6094 = vmatprep.subr.bf16.mxu0 %v6940_v0  ;;  %6118 = vmatprep.subr.bf16.mxu1 %v6940_v0 }
 0x708   : > { %6096 = vmatpush3.bf16.msra.mxu0 %v7327_v21  ;;  %6120 = vmatpush3.bf16.msra.mxu1 %v7217_v40 }
 0x709   : > { %6097 = vmatprep.subr.bf16.mxu0 %v6940_v0  ;;  %6121 = vmatprep.subr.bf16.mxu1 %v6940_v0 }
 0x70c   : > { %6099 = vmatpush3.bf16.msra.mxu0 %v7338_v42  ;;  %6123 = vmatpush3.bf16.msra.mxu1 %v7221_v52 }
 0x70d   : > { %6100 = vmatprep.subr.bf16.mxu0 %v6940_v0  ;;  %6124 = vmatprep.subr.bf16.mxu1 %v6940_v0 }
 0x710   : > { %6102 = vmatpush3.bf16.msra.mxu0 %v7349_v56  ;;  %6126 = vmatpush3.bf16.msra.mxu1 %v7237_v5 }
 0x711   : > { %6103 = vmatprep.subr.bf16.mxu0 %v6940_v0  ;;  %6127 = vmatprep.subr.bf16.mxu1 %v6940_v0 }
 0x714   : > { %6105 = vmatpush3.bf16.msra.mxu0 %v7359_v12  ;;  %6129 = vmatpush3.bf16.msra.mxu1 %v7247_v18 }
 0x715   : > { %6106 = vmatprep.subr.bf16.mxu0 %v6940_v0  ;;  %6130 = vmatprep.subr.bf16.mxu1 %v6940_v0 }
 0x718   : > { %6108 = vmatpush3.bf16.msra.mxu0 %v7366_v24  ;;  %6132 = vmatpush3.bf16.msra.mxu1 %v7253_v27 }
 0x719   : > { %6133 = vmatprep.subr.bf16.mxu0 %v6940_v0  ;;  %6157 = vmatprep.subr.bf16.mxu1 %v6940_v0 }
 0x77c   : > { %v2018_v7 = vpop.xlane.xlu1 %2017 }
 0x77d   : > { %v2019_v33 = vmul.f32 0.03125, %v2018_v7 }
 0x77f   : > { %v2025_v29 = vmul.f32 %v2019_v33, %v2019_v33  ;;  %v2027_v44 = vsub.f32 %v2013_v16, %v2019_v33  ;;  %v2112_v16 = vcombine.low %v2108_v51, %v2109_v3  ;;  %v854_v3 = vadd.f32 %v7773_v57, %v822_v63  ;;  %v7879_v63 = vld [vmem:[%s8256_s7] ss:$0 sm:$0xff] }
 0x780   : > { %v2023_v36 = vpop.xlane.xlu1 %2022 }
 0x781   : > { %v2024_v32 = vmul.f32 0.03125, %v2023_v36  ;;  %v2119_v38 = vrot.slane %v2112_v16, %v7244_v15  ;;  %v3992_v16 = vmul.f32 -1.442695, %v854_v3 }
 0x783   : > { %v2026_v43 = vsub.f32 %v2024_v32, %v2025_v29 }
 0x785   : > { %v2028_v34 = vadd.f32 1e-05, %v2026_v43 }
 0x787   : > { %6634 = vrsqrt.f32 %v2028_v34 }
 0x788   : > { %6636 = vpow2.f32 %v3991_v60 }
 0x791   : > { %v6635_v55 = vpop.eup %6634 }
 0x792   : > { %v2030_v45 = vmul.f32 %v6635_v55, %v2027_v44  ;;  %v6637_v17 = vpop.eup %6636 }
 0x793   : > { %v917_v23 = vadd.f32 1.0, %v6637_v17  ;;  %v6717_v17 = vld [vmem:[%s7188_s25 + $0xe] sm:$0x3] }
 0x794   : > { %v2031_v46 = vmul.f32 %v7504_v62, %v2030_v45 }
 0x795   : > { %6638 = vrcp.f32 %v917_v23  ;;  %v6718_v23 = vld [vmem:[%s7188_s25 + $0x2e] sm:$0x3] }
 0x796   : > { %v2032_v49 = vadd.f32 %v7509_v9, %v2031_v46 }
 0x798   : > { %2034 = vst [vmem:[#allocation2 + $0x14] sm:$0xf] %v2032_v49 }
 0x79f   : > { %v3790_v30 = vld [vmem:[#allocation2 + $0x14] sm:$0x3]  ;;  %v3822_v35 = vld [vmem:[#allocation2 + $0x16] sm:$0x3]  ;;  %v6639_v29 = vpop.eup %6638 }
 0x7a0   : > { %3806 = vst [vmem:[%s7515_s10 + $0xa] sm:$0x3] %v3790_v30  ;;  %4008 = vst [vmem:[%s7515_s10 + $0x2a] sm:$0x3] %v3822_v35 }
 0x7ce   : > { %v2187_v61 = vpop.f32.mrb[28].mxu0  ;;  %v2276_v54 = vpop.f32.mrb[14].mxu1 }
 0x7cf   : > { %v2188_v59 = vadd.f32 %v2187_v61, %v2119_v38  ;;  %v2280_v25 = vadd.f32 %v2276_v54, %v7427_v8  ;;  %v5062_v10 = vpop.f32.mrb[29].mxu0  ;;  %v5097_v2 = vpop.f32.mrb[15].mxu1  ;;  %v2283_v38 = vmul.f32 %v6717_v17, %v7451_v47  ;;  %v2284_v61 = vmul.f32 %v6718_v23, %v7455_v48 }
 0x7d1   : > { %6640 = vtanh.f32 %v2280_v25  ;;  %v2191_v7 = vsel %vm1129_vm1, %v2188_v59, 0.0  ;;  %v2195_v33 = vmul.f32 %v2188_v59, %v2188_v59 }
 0x7d2   : > { %2192 = vadd.xlane.f32.xlu0 %v2191_v7 }
 0x7d3   : > { %v2196_v36 = vsel %vm1129_vm1, %v2195_v33, 0.0 }
 0x7d6   : > { %2197 = vadd.xlane.f32.xlu0 %v2196_v36 }
 0x7db   : > { %v6641_v32 = vpop.eup %6640 }
 0x7dc   : > { %v2282_v43 = vmul.f32 %v6641_v32, %v6639_v29 }
 0x7de   : > { %5131 = vmatmul.mubr.f32.vlgmr.msra.gmra.mrb[30].mxu0 %v2282_v43  ;;  %5166 = vmatmul.mubr.f32.vlgmr.msra.gmra.mrb[16].mxu1 %v2282_v43 }
 0x7df   : > { %6135 = vmatpush3.bf16.msra.mxu0 %v7293_v37  ;;  %6159 = vmatpush3.bf16.msra.mxu1 %v7206_v14 }
 0x7e0   : > { %6136 = vmatprep.subr.bf16.mxu0 %v6940_v0  ;;  %6160 = vmatprep.subr.bf16.mxu1 %v6940_v0 }
 0x7e1   : > { %5200 = vmatprep.mubr.msk.f32.mxu0 %vm6942_vm0, %v6941_v1  ;;  %5235 = vmatprep.mubr.msk.f32.mxu1 %vm6942_vm0, %v6941_v1 }
 0x7e3   : > { %6138 = vmatpush3.bf16.msra.mxu0 %v7305_v50  ;;  %6162 = vmatpush3.bf16.msra.mxu1 %v7209_v22 }
 0x7e4   : > { %6139 = vmatprep.subr.bf16.mxu0 %v6940_v0  ;;  %6163 = vmatprep.subr.bf16.mxu1 %v6940_v0 }
 0x7e7   : > { %6141 = vmatpush3.bf16.msra.mxu0 %v7316_v6  ;;  %6165 = vmatpush3.bf16.msra.mxu1 %v7213_v31 }
 0x7e8   : > { %6142 = vmatprep.subr.bf16.mxu0 %v6940_v0  ;;  %6166 = vmatprep.subr.bf16.mxu1 %v6940_v0 }
 0x7eb   : > { %6144 = vmatpush3.bf16.msra.mxu0 %v7327_v21  ;;  %6168 = vmatpush3.bf16.msra.mxu1 %v7217_v40 }
 0x7ec   : > { %6145 = vmatprep.subr.bf16.mxu0 %v6940_v0  ;;  %6169 = vmatprep.subr.bf16.mxu1 %v6940_v0 }
 0x7ef   : > { %6147 = vmatpush3.bf16.msra.mxu0 %v7338_v42  ;;  %6171 = vmatpush3.bf16.msra.mxu1 %v7221_v52 }
 0x7f0   : > { %6148 = vmatprep.subr.bf16.mxu0 %v6940_v0  ;;  %6172 = vmatprep.subr.bf16.mxu1 %v6940_v0 }
 0x7f3   : > { %6150 = vmatpush3.bf16.msra.mxu0 %v7349_v56  ;;  %6174 = vmatpush3.bf16.msra.mxu1 %v7237_v5 }
 0x7f4   : > { %6151 = vmatprep.subr.bf16.mxu0 %v6940_v0  ;;  %6175 = vmatprep.subr.bf16.mxu1 %v6940_v0 }
 0x7f7   : > { %6153 = vmatpush3.bf16.msra.mxu0 %v7359_v12  ;;  %6177 = vmatpush3.bf16.msra.mxu1 %v7247_v18 }
 0x7f8   : > { %6154 = vmatprep.subr.bf16.mxu0 %v6940_v0  ;;  %6178 = vmatprep.subr.bf16.mxu1 %v6940_v0 }
 0x7fb   : > { %6156 = vmatpush3.bf16.msra.mxu0 %v7366_v24  ;;  %6180 = vmatpush3.bf16.msra.mxu1 %v7253_v27 }
 0x7fc   : > { %6181 = vmatprep.subr.bf16.mxu0 %v6940_v0  ;;  %6205 = vmatprep.subr.bf16.mxu1 %v6940_v0 }
 0x85f   : > { %v2193_v8 = vpop.xlane.xlu0 %2192 }
 0x860   : > { %v2194_v34 = vmul.f32 0.03125, %v2193_v8 }
 0x862   : > { %v2200_v55 = vmul.f32 %v2194_v34, %v2194_v34  ;;  %v2202_v30 = vsub.f32 %v2188_v59, %v2194_v34 }
 0x863   : > { %v2198_v44 = vpop.xlane.xlu0 %2197 }
 0x864   : > { %v2199_v45 = vmul.f32 0.03125, %v2198_v44 }
 0x866   : > { %v2201_v46 = vsub.f32 %v2199_v45, %v2200_v55 }
 0x868   : > { %v2203_v49 = vadd.f32 1e-05, %v2201_v46 }
 0x86a   : > { %6642 = vrsqrt.f32 %v2203_v49 }
 0x86b   : > { %6644 = vpow2.f32 %v3992_v16 }
 0x874   : > { %v6643_v35 = vpop.eup %6642 }
 0x875   : > { %v2205_v53 = vmul.f32 %v6643_v35, %v2202_v30  ;;  %v6645_v54 = vpop.eup %6644 }
 0x877   : > { %v2206_v58 = vmul.f32 %v7504_v62, %v2205_v53  ;;  %v2287_v62 = vcombine.low %v2283_v38, %v2284_v61  ;;  %v823_v38 = vrot.slane %v7431_v13, 4 }
 0x879   : > { %v2207_v60 = vadd.f32 %v7509_v9, %v2206_v58  ;;  %v918_v9 = vadd.f32 1.0, %v6645_v54  ;;  %v2294_v59 = vrot.slane %v2287_v62, %v7244_v15  ;;  %v855_v23 = vadd.f32 %v7773_v57, %v823_v38  ;;  %v6721_v62 = vld [vmem:[%s7188_s25 + $0x10] sm:$0x3] }
 0x87a   : > { %v2458_v54 = vmul.f32 %v6721_v62, %v7451_v47  ;;  %v824_v62 = vrot.slane %v7433_v19, 4 }
 0x87b   : > { %2209 = vst [vmem:[#allocation2 + $0x18] sm:$0xf] %v2207_v60  ;;  %6646 = vrcp.f32 %v918_v9  ;;  %v3993_v61 = vmul.f32 -1.442695, %v855_v23  ;;  %v6722_v9 = vld [vmem:[%s7188_s25 + $0x30] sm:$0x3] }
 0x882   : > { %v3791_v4 = vld [vmem:[#allocation2 + $0x18] sm:$0x3]  ;;  %v3823_v51 = vld [vmem:[#allocation2 + $0x1a] sm:$0x3] }
 0x883   : > { %3807 = vst [vmem:[%s7515_s10 + $0xc] sm:$0x3] %v3791_v4  ;;  %4009 = vst [vmem:[%s7515_s10 + $0x2c] sm:$0x3] %v3823_v51  ;;  %v7873_v4 = vld [vmem:[%s8255_s6] ss:$0 sm:$0xff] }
 0x885   : > { %v6647_v8 = vpop.eup %6646 }
 0x8b1   : > { %v2362_v25 = vpop.f32.mrb[30].mxu0  ;;  %v2451_v10 = vpop.f32.mrb[16].mxu1 }
 0x8b2   : > { %v2363_v2 = vadd.f32 %v2362_v25, %v2294_v59  ;;  %v2455_v7 = vadd.f32 %v2451_v10, %v7429_v11  ;;  %v5132_v33 = vpop.f32.mrb[31].mxu0  ;;  %v5167_v36 = vpop.f32.mrb[17].mxu1  ;;  %v2459_v59 = vmul.f32 %v6722_v9, %v7455_v48 }
 0x8b4   : > { %6648 = vtanh.f32 %v2455_v7  ;;  %v2366_v29 = vsel %vm1129_vm1, %v2363_v2, 0.0  ;;  %v2370_v32 = vmul.f32 %v2363_v2, %v2363_v2  ;;  %v2462_v25 = vcombine.low %v2458_v54, %v2459_v59  ;;  %v6723_v59 = vld [vmem:[%s7188_s25 + $0x12] sm:$0x3] }
 0x8b5   : > { %2367 = vadd.xlane.f32.xlu1 %v2366_v29  ;;  %v856_v54 = vadd.f32 %v7773_v57, %v824_v62 }
 0x8b6   : > { %v2371_v43 = vsel %vm1129_vm1, %v2370_v32, 0.0 }
 0x8b7   : > { %v3994_v9 = vmul.f32 -1.442695, %v856_v54 }
 0x8b9   : > { %2372 = vadd.xlane.f32.xlu1 %v2371_v43 }
 0x8be   : > { %v6649_v34 = vpop.eup %6648 }
 0x8bf   : > { %v2457_v44 = vmul.f32 %v6649_v34, %v6647_v8 }
 0x8c1   : > { %5201 = vmatmul.mubr.f32.vlgmr.msra.gmra.mrb[32].mxu0 %v2457_v44  ;;  %5236 = vmatmul.mubr.f32.vlgmr.msra.gmra.mrb[18].mxu1 %v2457_v44 }
 0x8c2   : > { %6183 = vmatpush3.bf16.msra.mxu0 %v7293_v37  ;;  %6207 = vmatpush3.bf16.msra.mxu1 %v7206_v14 }
 0x8c3   : > { %6184 = vmatprep.subr.bf16.mxu0 %v6940_v0  ;;  %6208 = vmatprep.subr.bf16.mxu1 %v6940_v0 }
 0x8c4   : > { %5270 = vmatprep.mubr.msk.f32.mxu0 %vm6942_vm0, %v6941_v1  ;;  %5305 = vmatprep.mubr.msk.f32.mxu1 %vm6942_vm0, %v6941_v1 }
 0x8c6   : > { %6186 = vmatpush3.bf16.msra.mxu0 %v7305_v50  ;;  %6210 = vmatpush3.bf16.msra.mxu1 %v7209_v22 }
 0x8c7   : > { %6187 = vmatprep.subr.bf16.mxu0 %v6940_v0  ;;  %6211 = vmatprep.subr.bf16.mxu1 %v6940_v0 }
 0x8ca   : > { %6189 = vmatpush3.bf16.msra.mxu0 %v7316_v6  ;;  %6213 = vmatpush3.bf16.msra.mxu1 %v7213_v31 }
 0x8cb   : > { %6190 = vmatprep.subr.bf16.mxu0 %v6940_v0  ;;  %6214 = vmatprep.subr.bf16.mxu1 %v6940_v0 }
 0x8ce   : > { %6192 = vmatpush3.bf16.msra.mxu0 %v7327_v21  ;;  %6216 = vmatpush3.bf16.msra.mxu1 %v7217_v40 }
 0x8cf   : > { %6193 = vmatprep.subr.bf16.mxu0 %v6940_v0  ;;  %6217 = vmatprep.subr.bf16.mxu1 %v6940_v0 }
 0x8d2   : > { %6195 = vmatpush3.bf16.msra.mxu0 %v7338_v42  ;;  %6219 = vmatpush3.bf16.msra.mxu1 %v7221_v52 }
 0x8d3   : > { %6196 = vmatprep.subr.bf16.mxu0 %v6940_v0  ;;  %6220 = vmatprep.subr.bf16.mxu1 %v6940_v0 }
 0x8d6   : > { %6198 = vmatpush3.bf16.msra.mxu0 %v7349_v56  ;;  %6222 = vmatpush3.bf16.msra.mxu1 %v7237_v5 }
 0x8d7   : > { %6199 = vmatprep.subr.bf16.mxu0 %v6940_v0  ;;  %6223 = vmatprep.subr.bf16.mxu1 %v6940_v0 }
 0x8da   : > { %6201 = vmatpush3.bf16.msra.mxu0 %v7359_v12  ;;  %6225 = vmatpush3.bf16.msra.mxu1 %v7247_v18 }
 0x8db   : > { %6202 = vmatprep.subr.bf16.mxu0 %v6940_v0  ;;  %6226 = vmatprep.subr.bf16.mxu1 %v6940_v0 }
 0x8de   : > { %6204 = vmatpush3.bf16.msra.mxu0 %v7366_v24  ;;  %6228 = vmatpush3.bf16.msra.mxu1 %v7253_v27 }
 0x8df   : > { %6229 = vmatprep.subr.bf16.mxu0 %v6940_v0  ;;  %6253 = vmatprep.subr.bf16.mxu1 %v6940_v0 }
 0x942   : > { %v2368_v11 = vpop.xlane.xlu1 %2367 }
 0x943   : > { %v2369_v55 = vmul.f32 0.03125, %v2368_v11 }
 0x945   : > { %v2375_v46 = vmul.f32 %v2369_v55, %v2369_v55  ;;  %v2377_v53 = vsub.f32 %v2363_v2, %v2369_v55  ;;  %v2469_v2 = vrot.slane %v2462_v25, %v7244_v15  ;;  %v2633_v25 = vmul.f32 %v6723_v59, %v7451_v47 }
 0x946   : > { %v2373_v45 = vpop.xlane.xlu1 %2372 }
 0x947   : > { %v2374_v49 = vmul.f32 0.03125, %v2373_v45 }
 0x949   : > { %v2376_v30 = vsub.f32 %v2374_v49, %v2375_v46 }
 0x94b   : > { %v2378_v35 = vadd.f32 1e-05, %v2376_v30 }
 0x94d   : > { %6650 = vrsqrt.f32 %v2378_v35 }
 0x94e   : > { %6652 = vpow2.f32 %v3993_v61 }
 0x957   : > { %v6651_v58 = vpop.eup %6650 }
 0x958   : > { %v2380_v60 = vmul.f32 %v6651_v58, %v2377_v53  ;;  %v6653_v10 = vpop.eup %6652 }
 0x959   : > { %v919_v7 = vadd.f32 1.0, %v6653_v10  ;;  %v6724_v10 = vld [vmem:[%s7188_s25 + $0x32] sm:$0x3] }
 0x95a   : > { %v2381_v51 = vmul.f32 %v7873_v4, %v2380_v60 }
 0x95b   : > { %6654 = vrcp.f32 %v919_v7 }
 0x95c   : > { %v2382_v3 = vadd.f32 %v7879_v63, %v2381_v51 }
 0x95e   : > { %2384 = vst [vmem:[#allocation2 + $0x1c] sm:$0xf] %v2382_v3 }
 0x965   : > { %v3792_v16 = vld [vmem:[#allocation2 + $0x1c] sm:$0x3]  ;;  %v3824_v17 = vld [vmem:[#allocation2 + $0x1e] sm:$0x3]  ;;  %v6655_v55 = vpop.eup %6654 }
 0x966   : > { %3808 = vst [vmem:[%s7515_s10 + $0xe] sm:$0x3] %v3792_v16  ;;  %4010 = vst [vmem:[%s7515_s10 + $0x2e] sm:$0x3] %v3824_v17 }
 0x994   : > { %v2537_v33 = vpop.f32.mrb[32].mxu0  ;;  %v2626_v36 = vpop.f32.mrb[18].mxu1 }
 0x995   : > { %v2538_v29 = vadd.f32 %v2537_v33, %v2469_v2  ;;  %v2630_v32 = vadd.f32 %v2626_v36, %v7431_v13  ;;  %v5202_v43 = vpop.f32.mrb[33].mxu0  ;;  %v5237_v8 = vpop.f32.mrb[19].mxu1  ;;  %v2634_v2 = vmul.f32 %v6724_v10, %v7455_v48  ;;  %v6725_v10 = vld [vmem:[%s7188_s25 + $0x14] sm:$0x3] }
 0x997   : > { %6656 = vtanh.f32 %v2630_v32  ;;  %v2541_v34 = vsel %vm1129_vm1, %v2538_v29, 0.0  ;;  %v2545_v44 = vmul.f32 %v2538_v29, %v2538_v29  ;;  %v2637_v7 = vcombine.low %v2633_v25, %v2634_v2 }
 0x998   : > { %2542 = vadd.xlane.f32.xlu0 %v2541_v34  ;;  %v2808_v2 = vmul.f32 %v6725_v10, %v7451_v47 }
 0x999   : > { %v2546_v11 = vsel %vm1129_vm1, %v2545_v44, 0.0 }
 0x99c   : > { %2547 = vadd.xlane.f32.xlu0 %v2546_v11 }
 0x9a1   : > { %v6657_v45 = vpop.eup %6656 }
 0x9a2   : > { %v2632_v46 = vmul.f32 %v6657_v45, %v6655_v55 }
 0x9a4   : > { %5271 = vmatmul.mubr.f32.vlgmr.msra.gmra.mrb[34].mxu0 %v2632_v46  ;;  %5306 = vmatmul.mubr.f32.vlgmr.msra.gmra.mrb[20].mxu1 %v2632_v46 }
 0x9a5   : > { %6231 = vmatpush3.bf16.msra.mxu0 %v7293_v37  ;;  %6255 = vmatpush3.bf16.msra.mxu1 %v7206_v14 }
 0x9a6   : > { %6232 = vmatprep.subr.bf16.mxu0 %v6940_v0  ;;  %6256 = vmatprep.subr.bf16.mxu1 %v6940_v0 }
 0x9a7   : > { %5340 = vmatprep.mubr.msk.f32.mxu0 %vm6942_vm0, %v6941_v1  ;;  %5375 = vmatprep.mubr.msk.f32.mxu1 %vm6942_vm0, %v6941_v1 }
 0x9a9   : > { %6234 = vmatpush3.bf16.msra.mxu0 %v7305_v50  ;;  %6258 = vmatpush3.bf16.msra.mxu1 %v7209_v22 }
 0x9aa   : > { %6235 = vmatprep.subr.bf16.mxu0 %v6940_v0  ;;  %6259 = vmatprep.subr.bf16.mxu1 %v6940_v0 }
 0x9ad   : > { %6237 = vmatpush3.bf16.msra.mxu0 %v7316_v6  ;;  %6261 = vmatpush3.bf16.msra.mxu1 %v7213_v31 }
 0x9ae   : > { %6238 = vmatprep.subr.bf16.mxu0 %v6940_v0  ;;  %6262 = vmatprep.subr.bf16.mxu1 %v6940_v0 }
 0x9b1   : > { %6240 = vmatpush3.bf16.msra.mxu0 %v7327_v21  ;;  %6264 = vmatpush3.bf16.msra.mxu1 %v7217_v40 }
 0x9b2   : > { %6241 = vmatprep.subr.bf16.mxu0 %v6940_v0  ;;  %6265 = vmatprep.subr.bf16.mxu1 %v6940_v0 }
 0x9b5   : > { %6243 = vmatpush3.bf16.msra.mxu0 %v7338_v42  ;;  %6267 = vmatpush3.bf16.msra.mxu1 %v7221_v52 }
 0x9b6   : > { %6244 = vmatprep.subr.bf16.mxu0 %v6940_v0  ;;  %6268 = vmatprep.subr.bf16.mxu1 %v6940_v0 }
 0x9b9   : > { %6246 = vmatpush3.bf16.msra.mxu0 %v7349_v56  ;;  %6270 = vmatpush3.bf16.msra.mxu1 %v7237_v5 }
 0x9ba   : > { %6247 = vmatprep.subr.bf16.mxu0 %v6940_v0  ;;  %6271 = vmatprep.subr.bf16.mxu1 %v6940_v0 }
 0x9bd   : > { %6249 = vmatpush3.bf16.msra.mxu0 %v7359_v12  ;;  %6273 = vmatpush3.bf16.msra.mxu1 %v7247_v18 }
 0x9be   : > { %6250 = vmatprep.subr.bf16.mxu0 %v6940_v0  ;;  %6274 = vmatprep.subr.bf16.mxu1 %v6940_v0 }
 0x9c1   : > { %6252 = vmatpush3.bf16.msra.mxu0 %v7366_v24  ;;  %6276 = vmatpush3.bf16.msra.mxu1 %v7253_v27 }
 0x9c2   : > { %6277 = vmatprep.subr.bf16.mxu0 %v6940_v0  ;;  %6301 = vmatprep.subr.bf16.mxu1 %v6940_v0 }
 0xa25   : > { %v2543_v13 = vpop.xlane.xlu0 %2542 }
 0xa26   : > { %v2544_v49 = vmul.f32 0.03125, %v2543_v13 }
 0xa28   : > { %v2550_v35 = vmul.f32 %v2544_v49, %v2544_v49  ;;  %v2552_v51 = vsub.f32 %v2538_v29, %v2544_v49  ;;  %v2644_v29 = vrot.slane %v2637_v7, %v7244_v15  ;;  %v6726_v7 = vld [vmem:[%s7188_s25 + $0x34] sm:$0x3] }
 0xa29   : > { %v2548_v30 = vpop.xlane.xlu0 %2547 }
 0xa2a   : > { %v2549_v53 = vmul.f32 0.03125, %v2548_v30 }
 0xa2c   : > { %v2551_v58 = vsub.f32 %v2549_v53, %v2550_v35 }
 0xa2e   : > { %v2553_v60 = vadd.f32 1e-05, %v2551_v58 }
 0xa30   : > { %6658 = vrsqrt.f32 %v2553_v60 }
 0xa31   : > { %6660 = vpow2.f32 %v3994_v9  ;;  %v825_v9 = vrot.slane %v7435_v20, 4 }
 0xa33   : > { %v857_v59 = vadd.f32 %v7773_v57, %v825_v9 }
 0xa35   : > { %v3995_v25 = vmul.f32 -1.442695, %v857_v59  ;;  %v826_v59 = vrot.slane %v7437_v26, 4 }
 0xa3a   : > { %v6659_v3 = vpop.eup %6658 }
 0xa3b   : > { %v2555_v16 = vmul.f32 %v6659_v3, %v2552_v51  ;;  %v6661_v33 = vpop.eup %6660 }
 0xa3c   : > { %v920_v36 = vadd.f32 1.0, %v6661_v33  ;;  %v2809_v33 = vmul.f32 %v6726_v7, %v7455_v48 }
 0xa3d   : > { %v2556_v17 = vmul.f32 %v7873_v4, %v2555_v16 }
 0xa3e   : > { %6662 = vrcp.f32 %v920_v36  ;;  %v2812_v36 = vcombine.low %v2808_v2, %v2809_v33  ;;  %v6727_v2 = vld [vmem:[%s7188_s25 + $0x16] sm:$0x3] }
 0xa3f   : > { %v2557_v38 = vadd.f32 %v7879_v63, %v2556_v17  ;;  %v2983_v7 = vmul.f32 %v6727_v2, %v7451_v47  ;;  %v6728_v33 = vld [vmem:[%s7188_s25 + $0x36] sm:$0x3]  ;;  %v6729_v2 = vld [vmem:[%s7188_s25 + $0x18] sm:$0x3] }
 0xa41   : > { %2559 = vst [vmem:[#allocation2 + $0x20] sm:$0xf] %v2557_v38 }
 0xa48   : > { %v3793_v23 = vld [vmem:[#allocation2 + $0x20] sm:$0x3]  ;;  %v3825_v61 = vld [vmem:[#allocation2 + $0x22] sm:$0x3]  ;;  %v6663_v13 = vpop.eup %6662 }
 0xa49   : > { %3809 = vst [vmem:[%s7515_s10 + $0x10] sm:$0x3] %v3793_v23  ;;  %4011 = vst [vmem:[%s7515_s10 + $0x30] sm:$0x3] %v3825_v61 }
 0xa77   : > { %v2712_v32 = vpop.f32.mrb[34].mxu0  ;;  %v2801_v43 = vpop.f32.mrb[20].mxu1 }
 0xa78   : > { %v2713_v8 = vadd.f32 %v2712_v32, %v2644_v29  ;;  %v2805_v34 = vadd.f32 %v2801_v43, %v7433_v19  ;;  %v5272_v44 = vpop.f32.mrb[35].mxu0  ;;  %v5307_v11 = vpop.f32.mrb[21].mxu1  ;;  %v2819_v32 = vrot.slane %v2812_v36, %v7244_v15  ;;  %v2984_v36 = vmul.f32 %v6728_v33, %v7455_v48  ;;  %v6730_v33 = vld [vmem:[%s7188_s25 + $0x38] sm:$0x3] }
 0xa7a   : > { %6664 = vtanh.f32 %v2805_v34  ;;  %v2716_v55 = vsel %vm1129_vm1, %v2713_v8, 0.0  ;;  %v2720_v45 = vmul.f32 %v2713_v8, %v2713_v8 }
 0xa7b   : > { %2717 = vadd.xlane.f32.xlu1 %v2716_v55 }
 0xa7c   : > { %v2721_v46 = vsel %vm1129_vm1, %v2720_v45, 0.0 }
 0xa7f   : > { %2722 = vadd.xlane.f32.xlu1 %v2721_v46 }
 0xa84   : > { %v6665_v49 = vpop.eup %6664 }
 0xa85   : > { %v2807_v30 = vmul.f32 %v6665_v49, %v6663_v13 }
 0xa87   : > { %5341 = vmatmul.mubr.f32.vlgmr.msra.gmra.mrb[36].mxu0 %v2807_v30  ;;  %5376 = vmatmul.mubr.f32.vlgmr.msra.gmra.mrb[22].mxu1 %v2807_v30 }
 0xa88   : > { %6279 = vmatpush3.bf16.msra.mxu0 %v7293_v37  ;;  %6303 = vmatpush3.bf16.msra.mxu1 %v7206_v14 }
 0xa89   : > { %6280 = vmatprep.subr.bf16.mxu0 %v6940_v0  ;;  %6304 = vmatprep.subr.bf16.mxu1 %v6940_v0 }
 0xa8a   : > { %5410 = vmatprep.mubr.msk.f32.mxu0 %vm6942_vm0, %v6941_v1  ;;  %5445 = vmatprep.mubr.msk.f32.mxu1 %vm6942_vm0, %v6941_v1 }
 0xa8c   : > { %6282 = vmatpush3.bf16.msra.mxu0 %v7305_v50  ;;  %6306 = vmatpush3.bf16.msra.mxu1 %v7209_v22 }
 0xa8d   : > { %6283 = vmatprep.subr.bf16.mxu0 %v6940_v0  ;;  %6307 = vmatprep.subr.bf16.mxu1 %v6940_v0 }
 0xa90   : > { %6285 = vmatpush3.bf16.msra.mxu0 %v7316_v6  ;;  %6309 = vmatpush3.bf16.msra.mxu1 %v7213_v31 }
 0xa91   : > { %6286 = vmatprep.subr.bf16.mxu0 %v6940_v0  ;;  %6310 = vmatprep.subr.bf16.mxu1 %v6940_v0 }
 0xa94   : > { %6288 = vmatpush3.bf16.msra.mxu0 %v7327_v21  ;;  %6312 = vmatpush3.bf16.msra.mxu1 %v7217_v40 }
 0xa95   : > { %6289 = vmatprep.subr.bf16.mxu0 %v6940_v0  ;;  %6313 = vmatprep.subr.bf16.mxu1 %v6940_v0 }
 0xa98   : > { %6291 = vmatpush3.bf16.msra.mxu0 %v7338_v42  ;;  %6315 = vmatpush3.bf16.msra.mxu1 %v7221_v52 }
 0xa99   : > { %6292 = vmatprep.subr.bf16.mxu0 %v6940_v0  ;;  %6316 = vmatprep.subr.bf16.mxu1 %v6940_v0 }
 0xa9c   : > { %6294 = vmatpush3.bf16.msra.mxu0 %v7349_v56  ;;  %6318 = vmatpush3.bf16.msra.mxu1 %v7237_v5 }
 0xa9d   : > { %6295 = vmatprep.subr.bf16.mxu0 %v6940_v0  ;;  %6319 = vmatprep.subr.bf16.mxu1 %v6940_v0 }
 0xaa0   : > { %6297 = vmatpush3.bf16.msra.mxu0 %v7359_v12  ;;  %6321 = vmatpush3.bf16.msra.mxu1 %v7247_v18 }
 0xaa1   : > { %6298 = vmatprep.subr.bf16.mxu0 %v6940_v0  ;;  %6322 = vmatprep.subr.bf16.mxu1 %v6940_v0 }
 0xaa4   : > { %6300 = vmatpush3.bf16.msra.mxu0 %v7366_v24  ;;  %6324 = vmatpush3.bf16.msra.mxu1 %v7253_v27 }
 0xaa5   : > { %6325 = vmatprep.subr.bf16.mxu0 %v6940_v0  ;;  %6349 = vmatprep.subr.bf16.mxu1 %v6940_v0 }
 0xb08   : > { %v2718_v19 = vpop.xlane.xlu1 %2717 }
 0xb09   : > { %v2719_v35 = vmul.f32 0.03125, %v2718_v19 }
 0xb0b   : > { %v2725_v58 = vmul.f32 %v2719_v35, %v2719_v35  ;;  %v2727_v16 = vsub.f32 %v2713_v8, %v2719_v35 }
 0xb0c   : > { %v2723_v53 = vpop.xlane.xlu1 %2722 }
 0xb0d   : > { %v2724_v60 = vmul.f32 0.03125, %v2723_v53 }
 0xb0f   : > { %v2726_v51 = vsub.f32 %v2724_v60, %v2725_v58 }
 0xb11   : > { %v2728_v3 = vadd.f32 1e-05, %v2726_v51 }
 0xb13   : > { %6666 = vrsqrt.f32 %v2728_v3 }
 0xb14   : > { %6668 = vpow2.f32 %v3995_v25  ;;  %v858_v25 = vadd.f32 %v7773_v57, %v826_v59  ;;  %v827_v59 = vrot.slane %v7439_v28, 4 }
 0xb16   : > { %v3996_v10 = vmul.f32 -1.442695, %v858_v25  ;;  %v859_v25 = vadd.f32 %v7773_v57, %v827_v59 }
 0xb1d   : > { %v6667_v17 = vpop.eup %6666 }
 0xb1e   : > { %v2730_v38 = vmul.f32 %v6667_v17, %v2727_v16  ;;  %v6669_v29 = vpop.eup %6668 }
 0xb1f   : > { %v921_v43 = vadd.f32 1.0, %v6669_v29  ;;  %v2987_v29 = vcombine.low %v2983_v7, %v2984_v36  ;;  %v3158_v7 = vmul.f32 %v6729_v2, %v7451_v47  ;;  %v3159_v36 = vmul.f32 %v6730_v33, %v7455_v48 }
 0xb20   : > { %v2731_v23 = vmul.f32 %v7873_v4, %v2730_v38 }
 0xb21   : > { %6670 = vrcp.f32 %v921_v43 }
 0xb22   : > { %v2732_v61 = vadd.f32 %v7879_v63, %v2731_v23 }
 0xb24   : > { %2734 = vst [vmem:[#allocation2 + $0x24] sm:$0xf] %v2732_v61 }
 0xb2b   : > { %v3794_v62 = vld [vmem:[#allocation2 + $0x24] sm:$0x3]  ;;  %v3826_v54 = vld [vmem:[#allocation2 + $0x26] sm:$0x3]  ;;  %v6671_v30 = vpop.eup %6670 }
 0xb2c   : > { %3810 = vst [vmem:[%s7515_s10 + $0x12] sm:$0x3] %v3794_v62  ;;  %4012 = vst [vmem:[%s7515_s10 + $0x32] sm:$0x3] %v3826_v54 }
 0xb5a   : > { %v2887_v8 = vpop.f32.mrb[36].mxu0  ;;  %v2976_v34 = vpop.f32.mrb[22].mxu1 }
 0xb5b   : > { %v2888_v44 = vadd.f32 %v2887_v8, %v2819_v32  ;;  %v2980_v11 = vadd.f32 %v2976_v34, %v7435_v20  ;;  %v5342_v55 = vpop.f32.mrb[37].mxu0  ;;  %v5377_v45 = vpop.f32.mrb[23].mxu1  ;;  %v2994_v8 = vrot.slane %v2987_v29, %v7244_v15  ;;  %v3162_v29 = vcombine.low %v3158_v7, %v3159_v36 }
 0xb5d   : > { %6672 = vtanh.f32 %v2980_v11  ;;  %v2891_v46 = vsel %vm1129_vm1, %v2888_v44, 0.0  ;;  %v2895_v13 = vmul.f32 %v2888_v44, %v2888_v44 }
 0xb5e   : > { %2892 = vadd.xlane.f32.xlu0 %v2891_v46 }
 0xb5f   : > { %v2896_v49 = vsel %vm1129_vm1, %v2895_v13, 0.0 }
 0xb62   : > { %2897 = vadd.xlane.f32.xlu0 %v2896_v49 }
 0xb67   : > { %v6673_v19 = vpop.eup %6672 }
 0xb68   : > { %v2982_v35 = vmul.f32 %v6673_v19, %v6671_v30 }
 0xb6a   : > { %5411 = vmatmul.mubr.f32.vlgmr.msra.gmra.mrb[38].mxu0 %v2982_v35  ;;  %5446 = vmatmul.mubr.f32.vlgmr.msra.gmra.mrb[24].mxu1 %v2982_v35 }
 0xb6b   : > { %6327 = vmatpush3.bf16.msra.mxu0 %v7293_v37  ;;  %6351 = vmatpush3.bf16.msra.mxu1 %v7206_v14 }
 0xb6c   : > { %6328 = vmatprep.subr.bf16.mxu0 %v6940_v0  ;;  %6352 = vmatprep.subr.bf16.mxu1 %v6940_v0 }
 0xb6d   : > { %5480 = vmatprep.mubr.msk.f32.mxu0 %vm6942_vm0, %v6941_v1  ;;  %5515 = vmatprep.mubr.msk.f32.mxu1 %vm6942_vm0, %v6941_v1 }
 0xb6f   : > { %6330 = vmatpush3.bf16.msra.mxu0 %v7305_v50  ;;  %6354 = vmatpush3.bf16.msra.mxu1 %v7209_v22 }
 0xb70   : > { %6331 = vmatprep.subr.bf16.mxu0 %v6940_v0  ;;  %6355 = vmatprep.subr.bf16.mxu1 %v6940_v0 }
 0xb73   : > { %6333 = vmatpush3.bf16.msra.mxu0 %v7316_v6  ;;  %6357 = vmatpush3.bf16.msra.mxu1 %v7213_v31 }
 0xb74   : > { %6334 = vmatprep.subr.bf16.mxu0 %v6940_v0  ;;  %6358 = vmatprep.subr.bf16.mxu1 %v6940_v0 }
 0xb77   : > { %6336 = vmatpush3.bf16.msra.mxu0 %v7327_v21  ;;  %6360 = vmatpush3.bf16.msra.mxu1 %v7217_v40 }
 0xb78   : > { %6337 = vmatprep.subr.bf16.mxu0 %v6940_v0  ;;  %6361 = vmatprep.subr.bf16.mxu1 %v6940_v0 }
 0xb7b   : > { %6339 = vmatpush3.bf16.msra.mxu0 %v7338_v42  ;;  %6363 = vmatpush3.bf16.msra.mxu1 %v7221_v52 }
 0xb7c   : > { %6340 = vmatprep.subr.bf16.mxu0 %v6940_v0  ;;  %6364 = vmatprep.subr.bf16.mxu1 %v6940_v0 }
 0xb7f   : > { %6342 = vmatpush3.bf16.msra.mxu0 %v7349_v56  ;;  %6366 = vmatpush3.bf16.msra.mxu1 %v7237_v5 }
 0xb80   : > { %6343 = vmatprep.subr.bf16.mxu0 %v6940_v0  ;;  %6367 = vmatprep.subr.bf16.mxu1 %v6940_v0 }
 0xb83   : > { %6345 = vmatpush3.bf16.msra.mxu0 %v7359_v12  ;;  %6369 = vmatpush3.bf16.msra.mxu1 %v7247_v18 }
 0xb84   : > { %6346 = vmatprep.subr.bf16.mxu0 %v6940_v0  ;;  %6370 = vmatprep.subr.bf16.mxu1 %v6940_v0 }
 0xb87   : > { %6348 = vmatpush3.bf16.msra.mxu0 %v7366_v24  ;;  %6372 = vmatpush3.bf16.msra.mxu1 %v7253_v27 }
 0xb88   : > { %6373 = vmatprep.subr.bf16.mxu0 %v6940_v0  ;;  %6397 = vmatprep.subr.bf16.mxu1 %v6940_v0 }
 0xbeb   : > { %v2893_v20 = vpop.xlane.xlu0 %2892 }
 0xbec   : > { %v2894_v53 = vmul.f32 0.03125, %v2893_v20 }
 0xbee   : > { %v2900_v60 = vmul.f32 %v2894_v53, %v2894_v53  ;;  %v2902_v17 = vsub.f32 %v2888_v44, %v2894_v53 }
 0xbef   : > { %v2898_v58 = vpop.xlane.xlu0 %2897 }
 0xbf0   : > { %v2899_v51 = vmul.f32 0.03125, %v2898_v58 }
 0xbf2   : > { %v2901_v3 = vsub.f32 %v2899_v51, %v2900_v60 }
 0xbf4   : > { %v2903_v16 = vadd.f32 1e-05, %v2901_v3 }
 0xbf6   : > { %6674 = vrsqrt.f32 %v2903_v16 }
 0xbf7   : > { %6676 = vpow2.f32 %v3996_v10  ;;  %v3997_v10 = vmul.f32 -1.442695, %v859_v25 }
 0xc00   : > { %v6675_v38 = vpop.eup %6674 }
 0xc01   : > { %v2905_v23 = vmul.f32 %v6675_v38, %v2902_v17  ;;  %v6677_v32 = vpop.eup %6676 }
 0xc02   : > { %v922_v43 = vadd.f32 1.0, %v6677_v32 }
 0xc03   : > { %v2906_v61 = vmul.f32 %v7873_v4, %v2905_v23 }
 0xc04   : > { %6678 = vrcp.f32 %v922_v43  ;;  %v3169_v43 = vrot.slane %v3162_v29, %v7244_v15 }
 0xc05   : > { %v2907_v62 = vadd.f32 %v7879_v63, %v2906_v61 }
 0xc07   : > { %2909 = vst [vmem:[#allocation2 + $0x28] sm:$0xf] %v2907_v62 }
 0xc0e   : > { %v3795_v54 = vld [vmem:[#allocation2 + $0x28] sm:$0x3]  ;;  %v3827_v9 = vld [vmem:[#allocation2 + $0x2a] sm:$0x3]  ;;  %v6679_v19 = vpop.eup %6678 }
 0xc0f   : > { %3811 = vst [vmem:[%s7515_s10 + $0x14] sm:$0x3] %v3795_v54  ;;  %4013 = vst [vmem:[%s7515_s10 + $0x34] sm:$0x3] %v3827_v9 }
 0xc3d   : > { %v3062_v34 = vpop.f32.mrb[38].mxu0  ;;  %v3151_v44 = vpop.f32.mrb[24].mxu1 }
 0xc3e   : > { %v3063_v11 = vadd.f32 %v3062_v34, %v2994_v8  ;;  %v3155_v55 = vadd.f32 %v3151_v44, %v7437_v26  ;;  %v5412_v45 = vpop.f32.mrb[39].mxu0  ;;  %v5447_v46 = vpop.f32.mrb[25].mxu1 }
 0xc40   : > { %6680 = vtanh.f32 %v3155_v55  ;;  %v3066_v13 = vsel %vm1129_vm1, %v3063_v11, 0.0  ;;  %v3070_v49 = vmul.f32 %v3063_v11, %v3063_v11 }
 0xc41   : > { %3067 = vadd.xlane.f32.xlu1 %v3066_v13 }
 0xc42   : > { %v3071_v30 = vsel %vm1129_vm1, %v3070_v49, 0.0 }
 0xc45   : > { %3072 = vadd.xlane.f32.xlu1 %v3071_v30 }
 0xc4a   : > { %v6681_v35 = vpop.eup %6680 }
 0xc4b   : > { %v3157_v20 = vmul.f32 %v6681_v35, %v6679_v19 }
 0xc4d   : > { %5481 = vmatmul.mubr.f32.vlgmr.msra.gmra.mrb[40].mxu0 %v3157_v20  ;;  %5516 = vmatmul.mubr.f32.vlgmr.msra.gmra.mrb[26].mxu1 %v3157_v20 }
 0xc4e   : > { %6375 = vmatpush3.bf16.msra.mxu0 %v7293_v37  ;;  %6399 = vmatpush3.bf16.msra.mxu1 %v7206_v14 }
 0xc4f   : > { %6376 = vmatprep.subr.bf16.mxu0 %v6940_v0  ;;  %6400 = vmatprep.subr.bf16.mxu1 %v6940_v0 }
 0xc50   : > { %5550 = vmatprep.mubr.msk.f32.mxu0 %vm6942_vm0, %v6941_v1  ;;  %5585 = vmatprep.mubr.msk.f32.mxu1 %vm6942_vm0, %v6941_v1 }
 0xc52   : > { %6378 = vmatpush3.bf16.msra.mxu0 %v7305_v50  ;;  %6402 = vmatpush3.bf16.msra.mxu1 %v7209_v22 }
 0xc53   : > { %6379 = vmatprep.subr.bf16.mxu0 %v6940_v0  ;;  %6403 = vmatprep.subr.bf16.mxu1 %v6940_v0 }
 0xc56   : > { %6381 = vmatpush3.bf16.msra.mxu0 %v7316_v6  ;;  %6405 = vmatpush3.bf16.msra.mxu1 %v7213_v31 }
 0xc57   : > { %6382 = vmatprep.subr.bf16.mxu0 %v6940_v0  ;;  %6406 = vmatprep.subr.bf16.mxu1 %v6940_v0 }
 0xc5a   : > { %6384 = vmatpush3.bf16.msra.mxu0 %v7327_v21  ;;  %6408 = vmatpush3.bf16.msra.mxu1 %v7217_v40 }
 0xc5b   : > { %6385 = vmatprep.subr.bf16.mxu0 %v6940_v0  ;;  %6409 = vmatprep.subr.bf16.mxu1 %v6940_v0 }
 0xc5e   : > { %6387 = vmatpush3.bf16.msra.mxu0 %v7338_v42  ;;  %6411 = vmatpush3.bf16.msra.mxu1 %v7221_v52 }
 0xc5f   : > { %6388 = vmatprep.subr.bf16.mxu0 %v6940_v0  ;;  %6412 = vmatprep.subr.bf16.mxu1 %v6940_v0 }
 0xc62   : > { %6390 = vmatpush3.bf16.msra.mxu0 %v7349_v56  ;;  %6414 = vmatpush3.bf16.msra.mxu1 %v7237_v5 }
 0xc63   : > { %6391 = vmatprep.subr.bf16.mxu0 %v6940_v0  ;;  %6415 = vmatprep.subr.bf16.mxu1 %v6940_v0 }
 0xc66   : > { %6393 = vmatpush3.bf16.msra.mxu0 %v7359_v12  ;;  %6417 = vmatpush3.bf16.msra.mxu1 %v7247_v18 }
 0xc67   : > { %6394 = vmatprep.subr.bf16.mxu0 %v6940_v0  ;;  %6418 = vmatprep.subr.bf16.mxu1 %v6940_v0 }
 0xc6a   : > { %6396 = vmatpush3.bf16.msra.mxu0 %v7366_v24  ;;  %6420 = vmatpush3.bf16.msra.mxu1 %v7253_v27 }
 0xc6b   : > { %6421 = vmatprep.subr.bf16.mxu0 %v6940_v0  ;;  %6445 = vmatprep.subr.bf16.mxu1 %v6940_v0 }
 0xcce   : > { %v3068_v26 = vpop.xlane.xlu1 %3067 }
 0xccf   : > { %v3069_v53 = vmul.f32 0.03125, %v3068_v26 }
 0xcd1   : > { %v3075_v60 = vmul.f32 %v3069_v53, %v3069_v53  ;;  %v3077_v17 = vsub.f32 %v3063_v11, %v3069_v53 }
 0xcd2   : > { %v3073_v58 = vpop.xlane.xlu1 %3072 }
 0xcd3   : > { %v3074_v51 = vmul.f32 0.03125, %v3073_v58 }
 0xcd5   : > { %v3076_v3 = vsub.f32 %v3074_v51, %v3075_v60  ;;  %v828_v51 = vrot.slane %v7441_v39, 4 }
 0xcd7   : > { %v3078_v16 = vadd.f32 1e-05, %v3076_v3  ;;  %v8137_v3 = vld [vmem:[%s8253_s4] ss:$0 sm:$0xff] }
 0xcd9   : > { %6682 = vrsqrt.f32 %v3078_v16  ;;  %v860_v16 = vadd.f32 %v8137_v3, %v828_v51 }
 0xcda   : > { %6684 = vpow2.f32 %v3997_v10 }
 0xce3   : > { %v6683_v38 = vpop.eup %6682 }
 0xce4   : > { %v3080_v23 = vmul.f32 %v6683_v38, %v3077_v17  ;;  %v6685_v32 = vpop.eup %6684  ;;  %v3998_v17 = vmul.f32 -1.442695, %v860_v16  ;;  %v6732_v38 = vld [vmem:[%s7188_s25 + $0x1a] sm:$0x3] }
 0xce5   : > { %v923_v8 = vadd.f32 1.0, %v6685_v32 }
 0xce6   : > { %v3081_v61 = vmul.f32 %v7873_v4, %v3080_v23  ;;  %v3333_v23 = vmul.f32 %v6732_v38, %v7451_v47 }
 0xce7   : > { %6686 = vrcp.f32 %v923_v8 }
 0xce8   : > { %v3082_v62 = vadd.f32 %v7879_v63, %v3081_v61  ;;  %v6733_v61 = vld [vmem:[%s7188_s25 + $0x3a] sm:$0x3] }
 0xcea   : > { %3084 = vst [vmem:[#allocation2 + $0x2c] sm:$0xf] %v3082_v62  ;;  %v3334_v62 = vmul.f32 %v6733_v61, %v7455_v48 }
 0xcf1   : > { %v3796_v54 = vld [vmem:[#allocation2 + $0x2c] sm:$0x3]  ;;  %v3828_v9 = vld [vmem:[#allocation2 + $0x2e] sm:$0x3]  ;;  %v6687_v30 = vpop.eup %6686 }
 0xcf2   : > { %3812 = vst [vmem:[%s7515_s10 + $0x16] sm:$0x3] %v3796_v54  ;;  %4014 = vst [vmem:[%s7515_s10 + $0x36] sm:$0x3] %v3828_v9  ;;  %v3337_v54 = vcombine.low %v3333_v23, %v3334_v62 }
 0xcf4   : > { %v3344_v59 = vrot.slane %v3337_v54, %v7244_v15 }
 0xd20   : > { %v3237_v34 = vpop.f32.mrb[40].mxu0  ;;  %v3326_v44 = vpop.f32.mrb[26].mxu1 }
 0xd21   : > { %v3238_v11 = vadd.f32 %v3237_v34, %v3169_v43  ;;  %v3330_v55 = vadd.f32 %v3326_v44, %v7439_v28  ;;  %v5482_v45 = vpop.f32.mrb[41].mxu0  ;;  %v5517_v57 = vpop.f32.mrb[27].mxu1 }
 0xd23   : > { %6688 = vtanh.f32 %v3330_v55  ;;  %v3241_v46 = vsel %vm1129_vm1, %v3238_v11, 0.0  ;;  %v3245_v13 = vmul.f32 %v3238_v11, %v3238_v11 }
 0xd24   : > { %3242 = vadd.xlane.f32.xlu0 %v3241_v46  ;;  %v829_v46 = vrot.slane %v7443_v41, 4 }
 0xd25   : > { %v3246_v49 = vsel %vm1129_vm1, %v3245_v13, 0.0 }
 0xd26   : > { %v861_v13 = vadd.f32 %v8137_v3, %v829_v46 }
 0xd28   : > { %3247 = vadd.xlane.f32.xlu0 %v3246_v49  ;;  %v3999_v49 = vmul.f32 -1.442695, %v861_v13 }
 0xd2d   : > { %v6689_v19 = vpop.eup %6688 }
 0xd2e   : > { %v3332_v35 = vmul.f32 %v6689_v19, %v6687_v30  ;;  %v6734_v30 = vld [vmem:[%s7188_s25 + $0x1c] sm:$0x3] }
 0xd2f   : > { %v3508_v19 = vmul.f32 %v6734_v30, %v7451_v47 }
 0xd30   : > { %5551 = vmatmul.mubr.f32.vlgmr.msra.gmra.mrb[42].mxu0 %v3332_v35  ;;  %5586 = vmatmul.mubr.f32.vlgmr.msra.gmra.mrb[28].mxu1 %v3332_v35  ;;  %v6735_v35 = vld [vmem:[%s7188_s25 + $0x3c] sm:$0x3] }
 0xd31   : > { %6423 = vmatpush3.bf16.msra.mxu0 %v7293_v37  ;;  %6447 = vmatpush3.bf16.msra.mxu1 %v7206_v14 }
 0xd32   : > { %6424 = vmatprep.subr.bf16.mxu0 %v6940_v0  ;;  %6448 = vmatprep.subr.bf16.mxu1 %v6940_v0 }
 0xd33   : > { %5620 = vmatprep.mubr.msk.f32.mxu0 %vm6942_vm0, %v6941_v1  ;;  %5655 = vmatprep.mubr.msk.f32.mxu1 %vm6942_vm0, %v6941_v1 }
 0xd35   : > { %6426 = vmatpush3.bf16.msra.mxu0 %v7305_v50  ;;  %6450 = vmatpush3.bf16.msra.mxu1 %v7209_v22 }
 0xd36   : > { %6427 = vmatprep.subr.bf16.mxu0 %v6940_v0  ;;  %6451 = vmatprep.subr.bf16.mxu1 %v6940_v0 }
 0xd39   : > { %6429 = vmatpush3.bf16.msra.mxu0 %v7316_v6  ;;  %6453 = vmatpush3.bf16.msra.mxu1 %v7213_v31 }
 0xd3a   : > { %6430 = vmatprep.subr.bf16.mxu0 %v6940_v0  ;;  %6454 = vmatprep.subr.bf16.mxu1 %v6940_v0 }
 0xd3d   : > { %6432 = vmatpush3.bf16.msra.mxu0 %v7327_v21  ;;  %6456 = vmatpush3.bf16.msra.mxu1 %v7217_v40 }
 0xd3e   : > { %6433 = vmatprep.subr.bf16.mxu0 %v6940_v0  ;;  %6457 = vmatprep.subr.bf16.mxu1 %v6940_v0 }
 0xd41   : > { %6435 = vmatpush3.bf16.msra.mxu0 %v7338_v42  ;;  %6459 = vmatpush3.bf16.msra.mxu1 %v7221_v52 }
 0xd42   : > { %6436 = vmatprep.subr.bf16.mxu0 %v6940_v0  ;;  %6460 = vmatprep.subr.bf16.mxu1 %v6940_v0 }
 0xd45   : > { %6438 = vmatpush3.bf16.msra.mxu0 %v7349_v56  ;;  %6462 = vmatpush3.bf16.msra.mxu1 %v7237_v5 }
 0xd46   : > { %6439 = vmatprep.subr.bf16.mxu0 %v6940_v0  ;;  %6463 = vmatprep.subr.bf16.mxu1 %v6940_v0 }
 0xd49   : > { %6441 = vmatpush3.bf16.msra.mxu0 %v7359_v12  ;;  %6465 = vmatpush3.bf16.msra.mxu1 %v7247_v18 }
 0xd4a   : > { %6442 = vmatprep.subr.bf16.mxu0 %v6940_v0  ;;  %6466 = vmatprep.subr.bf16.mxu1 %v6940_v0 }
 0xd4d   : > { %6444 = vmatpush3.bf16.msra.mxu0 %v7366_v24  ;;  %6468 = vmatpush3.bf16.msra.mxu1 %v7253_v27 }
 0xd4e   : > { %6469 = vmatprep.subr.bf16.mxu0 %v6940_v0 }
 0xdb1   : > { %v3243_v14 = vpop.xlane.xlu0 %3242 }
 0xdb2   : > { %v3244_v22 = vmul.f32 0.03125, %v3243_v14  ;;  %v3509_v14 = vmul.f32 %v6735_v35, %v7455_v48 }
 0xdb4   : > { %v3250_v40 = vmul.f32 %v3244_v22, %v3244_v22  ;;  %v3252_v18 = vsub.f32 %v3238_v11, %v3244_v22  ;;  %v3512_v22 = vcombine.low %v3508_v19, %v3509_v14 }
 0xdb5   : > { %v3248_v31 = vpop.xlane.xlu0 %3247 }
 0xdb6   : > { %v3249_v52 = vmul.f32 0.03125, %v3248_v31 }
 0xdb8   : > { %v3251_v5 = vsub.f32 %v3249_v52, %v3250_v40  ;;  %v3519_v40 = vrot.slane %v3512_v22, %v7244_v15 }
 0xdba   : > { %v3253_v28 = vadd.f32 1e-05, %v3251_v5 }
 0xdbc   : > { %6690 = vrsqrt.f32 %v3253_v28 }
 0xdbd   : > { %6692 = vpow2.f32 %v3998_v17 }
 0xdc6   : > { %v6691_v20 = vpop.eup %6690 }
 0xdc7   : > { %v3255_v26 = vmul.f32 %v6691_v20, %v3252_v18  ;;  %v6693_v9 = vpop.eup %6692 }
 0xdc8   : > { %v924_v25 = vadd.f32 1.0, %v6693_v9 }
 0xdc9   : > { %v3256_v53 = vmul.f32 %v7873_v4, %v3255_v26 }
 0xdca   : > { %6694 = vrcp.f32 %v924_v25 }
 0xdcb   : > { %v3257_v27 = vadd.f32 %v7879_v63, %v3256_v53 }
 0xdcd   : > { %3259 = vst [vmem:[#allocation2 + $0x30] sm:$0xf] %v3257_v27 }
 0xdd4   : > { %v3797_v58 = vld [vmem:[#allocation2 + $0x30] sm:$0x3]  ;;  %v3829_v60 = vld [vmem:[#allocation2 + $0x32] sm:$0x3]  ;;  %v6695_v34 = vpop.eup %6694 }
 0xdd5   : > { %3813 = vst [vmem:[%s7515_s10 + $0x18] sm:$0x3] %v3797_v58  ;;  %4015 = vst [vmem:[%s7515_s10 + $0x38] sm:$0x3] %v3829_v60 }
 0xe03   : > { %v3412_v10 = vpop.f32.mrb[42].mxu0  ;;  %v3501_v2 = vpop.f32.mrb[28].mxu1 }
 0xe04   : > { %v3413_v7 = vadd.f32 %v3412_v10, %v3344_v59  ;;  %v3505_v33 = vadd.f32 %v3501_v2, %v7441_v39  ;;  %v5552_v36 = vpop.f32.mrb[43].mxu0  ;;  %v5587_v29 = vpop.f32.mrb[29].mxu1 }
 0xe05   : > { %v6736_v36 = vld [vmem:[%s7188_s25 + $0x1e] sm:$0x3] }
 0xe06   : > { %6696 = vtanh.f32 %v3505_v33  ;;  %v3416_v32 = vsel %vm1129_vm1, %v3413_v7, 0.0  ;;  %v3420_v43 = vmul.f32 %v3413_v7, %v3413_v7  ;;  %v3683_v29 = vmul.f32 %v6736_v36, %v7451_v47 }
 0xe07   : > { %3417 = vadd.xlane.f32.xlu1 %v3416_v32  ;;  %v6737_v32 = vld [vmem:[%s7188_s25 + $0x3e] sm:$0x3] }
 0xe08   : > { %v3421_v8 = vsel %vm1129_vm1, %v3420_v43, 0.0  ;;  %v3684_v43 = vmul.f32 %v6737_v32, %v7455_v48 }
 0xe0b   : > { %3422 = vadd.xlane.f32.xlu1 %v3421_v8  ;;  %v3687_v8 = vcombine.low %v3683_v29, %v3684_v43 }
 0xe10   : > { %v6697_v44 = vpop.eup %6696 }
 0xe11   : > { %v3507_v11 = vmul.f32 %v6697_v44, %v6695_v34  ;;  %v3694_v34 = vrot.slane %v3687_v8, %v7244_v15 }
 0xe13   : > { %5621 = vmatmul.mubr.f32.vlgmr.msra.gmra.mrb[44].mxu0 %v3507_v11  ;;  %5656 = vmatmul.mubr.f32.vlgmr.msra.gmra.mrb[30].mxu1 %v3507_v11 }
 0xe14   : > { %6471 = vmatpush3.bf16.msra.mxu0 %v7293_v37  ;;  %5690 = vmatprep.mubr.msk.f32.mxu0 %vm6942_vm0, %v6941_v1 }
 0xe15   : > { %6472 = vmatprep.subr.bf16.mxu0 %v6940_v0 }
 0xe18   : > { %6474 = vmatpush3.bf16.msra.mxu0 %v7305_v50 }
 0xe19   : > { %6475 = vmatprep.subr.bf16.mxu0 %v6940_v0 }
 0xe1c   : > { %6477 = vmatpush3.bf16.msra.mxu0 %v7316_v6 }
 0xe1d   : > { %6478 = vmatprep.subr.bf16.mxu0 %v6940_v0 }
 0xe20   : > { %6480 = vmatpush3.bf16.msra.mxu0 %v7327_v21 }
 0xe21   : > { %6481 = vmatprep.subr.bf16.mxu0 %v6940_v0 }
 0xe24   : > { %6483 = vmatpush3.bf16.msra.mxu0 %v7338_v42 }
 0xe25   : > { %6484 = vmatprep.subr.bf16.mxu0 %v6940_v0 }
 0xe28   : > { %6486 = vmatpush3.bf16.msra.mxu0 %v7349_v56 }
 0xe29   : > { %6487 = vmatprep.subr.bf16.mxu0 %v6940_v0 }
 0xe2c   : > { %6489 = vmatpush3.bf16.msra.mxu0 %v7359_v12 }
 0xe2d   : > { %6490 = vmatprep.subr.bf16.mxu0 %v6940_v0 }
 0xe30   : > { %6492 = vmatpush3.bf16.msra.mxu0 %v7366_v24 }
 0xe94   : > { %v3418_v1 = vpop.xlane.xlu1 %3417 }
 0xe95   : > { %v3419_v37 = vmul.f32 0.03125, %v3418_v1 }
 0xe97   : > { %v3425_v6 = vmul.f32 %v3419_v37, %v3419_v37  ;;  %v3427_v56 = vsub.f32 %v3413_v7, %v3419_v37 }
 0xe98   : > { %v3423_v50 = vpop.xlane.xlu1 %3422 }
 0xe99   : > { %v3424_v21 = vmul.f32 0.03125, %v3423_v50 }
 0xe9b   : > { %v3426_v42 = vsub.f32 %v3424_v21, %v3425_v6 }
 0xe9d   : > { %v3428_v39 = vadd.f32 1e-05, %v3426_v42 }
 0xe9f   : > { %6698 = vrsqrt.f32 %v3428_v39 }
 0xea0   : > { %6700 = vpow2.f32 %v3999_v49 }
 0xea9   : > { %v6699_v55 = vpop.eup %6698 }
 0xeaa   : > { %v3430_v45 = vmul.f32 %v6699_v55, %v3427_v56  ;;  %v6701_v31 = vpop.eup %6700 }
 0xeab   : > { %v925_v52 = vadd.f32 1.0, %v6701_v31 }
 0xeac   : > { %v3431_v12 = vmul.f32 %v7873_v4, %v3430_v45  ;;  %v6738_v45 = vld [vmem:[%s8255_s6] ss:$0 sm:$0xff] }
 0xead   : > { %6702 = vrcp.f32 %v925_v52 }
 0xeae   : > { %v3432_v0 = vadd.f32 %v7879_v63, %v3431_v12 }
 0xeb0   : > { %3434 = vst [vmem:[#allocation2 + $0x34] sm:$0xf] %v3432_v0  ;;  %v6739_v0 = vld [vmem:[%s8256_s7] ss:$0 sm:$0xff] }
 0xeb7   : > { %v3798_v24 = vld [vmem:[#allocation2 + $0x34] sm:$0x3]  ;;  %v3830_v57 = vld [vmem:[#allocation2 + $0x36] sm:$0x3]  ;;  %v6703_v51 = vpop.eup %6702 }
 0xeb8   : > { %3814 = vst [vmem:[%s7515_s10 + $0x1a] sm:$0x3] %v3798_v24  ;;  %4016 = vst [vmem:[%s7515_s10 + $0x3a] sm:$0x3] %v3830_v57 }
 0xee6   : > { %v3587_v5 = vpop.f32.mrb[44].mxu0  ;;  %v3676_v28 = vpop.f32.mrb[30].mxu1 }
 0xee7   : > { %v3588_v18 = vadd.f32 %v3587_v5, %v3519_v40  ;;  %v3680_v20 = vadd.f32 %v3676_v28, %v7443_v41  ;;  %v5622_v26 = vpop.f32.mrb[45].mxu0  ;;  %v5657_v53 = vpop.f32.mrb[31].mxu1 }
 0xee9   : > { %6704 = vtanh.f32 %v3680_v20  ;;  %v3591_v27 = vsel %vm1129_vm1, %v3588_v18, 0.0  ;;  %v3595_v58 = vmul.f32 %v3588_v18, %v3588_v18 }
 0xeea   : > { %3592 = vadd.xlane.f32.xlu0 %v3591_v27 }
 0xeeb   : > { %v3596_v60 = vsel %vm1129_vm1, %v3595_v58, 0.0 }
 0xeee   : > { %3597 = vadd.xlane.f32.xlu0 %v3596_v60 }
 0xef3   : > { %v6705_v3 = vpop.eup %6704 }
 0xef4   : > { %v3682_v16 = vmul.f32 %v6705_v3, %v6703_v51 }
 0xef6   : > { %5691 = vmatmul.mubr.f32.vlgmr.msra.gmra.mrb[46].mxu0 %v3682_v16 }
 0xf77   : > { %v3593_v17 = vpop.xlane.xlu0 %3592 }
 0xf78   : > { %v3594_v38 = vmul.f32 0.03125, %v3593_v17 }
 0xf7a   : > { %v3600_v23 = vmul.f32 %v3594_v38, %v3594_v38  ;;  %v3602_v9 = vsub.f32 %v3588_v18, %v3594_v38 }
 0xf7b   : > { %v3598_v41 = vpop.xlane.xlu0 %3597 }
 0xf7c   : > { %v3599_v61 = vmul.f32 0.03125, %v3598_v41 }
 0xf7e   : > { %v3601_v62 = vsub.f32 %v3599_v61, %v3600_v23 }
 0xf80   : > { %v3603_v54 = vadd.f32 1e-05, %v3601_v62 }
 0xf82   : > { %6706 = vrsqrt.f32 %v3603_v54 }
 0xf8c   : > { %v6707_v59 = vpop.eup %6706 }
 0xf8d   : > { %v3605_v25 = vmul.f32 %v6707_v59, %v3602_v9 }
 0xf8f   : > { %v3606_v10 = vmul.f32 %v7873_v4, %v3605_v25 }
 0xf91   : > { %v3607_v2 = vadd.f32 %v7879_v63, %v3606_v10 }
 0xf93   : > { %3609 = vst [vmem:[#allocation2 + $0x38] sm:$0xf] %v3607_v2 }
 0xf9a   : > { %v3799_v7 = vld [vmem:[#allocation2 + $0x38] sm:$0x3]  ;;  %v3831_v33 = vld [vmem:[#allocation2 + $0x3a] sm:$0x3] }
 0xf9b   : > { %3815 = vst [vmem:[%s7515_s10 + $0x1c] sm:$0x3] %v3799_v7  ;;  %4017 = vst [vmem:[%s7515_s10 + $0x3c] sm:$0x3] %v3831_v33 }
 0xfc9   : > { %v3762_v44 = vpop.f32.mrb[46].mxu0 }
 0xfca   : > { %v3763_v11 = vadd.f32 %v3762_v44, %v3694_v34  ;;  %v5692_v1 = vpop.f32.mrb[47].mxu0 }
 0xfcc   : > { %v3766_v4 = vsel %vm1129_vm1, %v3763_v11, 0.0  ;;  %v3770_v63 = vmul.f32 %v3763_v11, %v3763_v11 }
 0xfcd   : > { %3767 = vadd.xlane.f32.xlu1 %v3766_v4 }
 0xfce   : > { %v3771_v37 = vsel %vm1129_vm1, %v3770_v63, 0.0 }
 0xfd1   : > { %3772 = vadd.xlane.f32.xlu1 %v3771_v37 }
0x105a   : > { %v3768_v50 = vpop.xlane.xlu1 %3767 }
0x105b   : > { %v3769_v6 = vmul.f32 0.03125, %v3768_v50 }
0x105d   : > { %v3775_v21 = vmul.f32 %v3769_v6, %v3769_v6  ;;  %v3777_v15 = vsub.f32 %v3763_v11, %v3769_v6 }
0x105e   : > { %v3773_v47 = vpop.xlane.xlu1 %3772 }
0x105f   : > { %v3774_v48 = vmul.f32 0.03125, %v3773_v47 }
0x1061   : > { %v3776_v42 = vsub.f32 %v3774_v48, %v3775_v21 }
0x1063   : > { %v3778_v39 = vadd.f32 1e-05, %v3776_v42 }
0x1065   : > { %6708 = vrsqrt.f32 %v3778_v39 }
0x106f   : > { %v6709_v56 = vpop.eup %6708 }
0x1070   : > { %v3780_v55 = vmul.f32 %v6709_v56, %v3777_v15 }
0x1072   : > { %v3781_v12 = vmul.f32 %v6738_v45, %v3780_v55 }
0x1074   : > { %v3782_v24 = vadd.f32 %v6739_v0, %v3781_v12 }
0x1076   : > { %3784 = vst [vmem:[#allocation2 + $0x3c] sm:$0xf] %v3782_v24 }
0x107d   : > { %v3800_v57 = vld [vmem:[#allocation2 + $0x3c] sm:$0x3]  ;;  %v3832_v46 = vld [vmem:[#allocation2 + $0x3e] sm:$0x3] }
0x107e   : > { %3816 = vst [vmem:[%s7515_s10 + $0x1e] sm:$0x3] %v3800_v57  ;;  %4018 = vst [vmem:[%s7515_s10 + $0x3e] sm:$0x3] %v3832_v46 }
0x107f   : > { %6867 = shalt.err (!%p6864_p4)
}
0x1080   : > { %s6868_s10 = scalar_lea.hbm %s8201_s19, 1024  ;;  %s6872_s21 = scalar_lea.hbm %s8257_s8, 2048 }
0x1081   : > { %p6869_p9 = scmp.ne.s32.totalorder %s8201_s19, %s6868_s10  ;;  %p6873_p8 = scmp.lt.u32.totalorder %s8201_s19, %s8257_s8 }
0x1082   : > { %p6874_p13 = scmp.lt.u32.totalorder %s6872_s21, %s6868_s10  ;;  %p6876_p10 = scmp.lt.u32.totalorder %s6868_s10, %s8201_s19 }
0x1083   : > { %p6870_p0 = pnand %p6869_p9, %p7134_p5 }
0x1084   : > { %p6875_p6 = por %p6874_p13, %p6873_p8 }
0x1085   : > { %p6871_p11 = pneg %p6870_p0 }
0x1086   : > { %p6877_p3 = por %p6876_p10, %p6875_p6 }
0x1088   : > { %p6878_p7 = pnand %p6877_p3, %p6871_p11 }
0x108a   : > { %6881 = shalt.err (!%p6878_p7)
}
0x108b   : > { %s6945_s20 = smov 32   ;;  %s6946_s12 = smov 2  }
0x108c   : > { %6507 = dma.vmem_to_hbm [thread:$0]  (%p7134_p5), %s8203_s26, 1024, %s8201_s19, %s3851_s27, %s6945_s20, %s6945_s20, %s6946_s12  }
0x108d PF: > { %s8281_s17 = sld [smem:[#allocation16_spill]]  ;;  %s8282_s23 = sld [smem:[#allocation17_spill]] }
0x108e   : > { %p8284_p2 = scmp.ge.s32.totalorder %s6928_s30, 2 }
0x1093   : > { %s3880_s9 = sand.u32 1, %s8281_s17   ;;  %p8283_p12 = scmp.ne.s32.totalorder %s8282_s23, 0 }
0x1094   : > { %s3881_s11 = scalar_lea.sflag [#allocation5], %s3880_s9 }
0x1095   : > { %p6524_p1 = pnand %p8284_p2, %p8283_p12 }
0x1097   : > { %6911 = dma.done.wait (!%p6524_p1), %s3881_s11, 1024  }
0x1098   : > { %6913 = vsyncadd (!%p6524_p1), %s3881_s11, 4294966272  ;;  %p23_p4 = scmp.ge.s32.totalorder %s7102_s22, 4   ;;  %s8285_s27 = smov %s6920_s28 }
0x1099   : > { %s8286_s28 = smov %s6924_s29  ;;  %s8287_s29 = smov %s7130_s16 }
0x109a   : > { %s8288_s30 = smov %s7102_s22  ;;  %25 = sbr.rel (!%p23_p4) target bundleno = 9 (0x9), region = 125 }
0x10a1   :  { %3886 = vsyncpa [#allocation4], 1 }
0x10a2   :  { %3888 = vsyncpa [#allocation4 + $0x1], 1 }
0x10a3   :  { %3889 = vsyncpa [#allocation7], 1 }
0x10a4   :  { %3890 = vsyncpa [#allocation10], 1 }
0x10a5   :  { %3891 = vsyncpa [#allocation5], 1 }
0x10a6   :  { %3893 = vsyncpa [#allocation5 + $0x1], 1 }

</bundles_post_ra>
